<compile_context>
chip_gen: v6e
topology: v6e:2x2x1
jax: 0.10.0
libtpu: 0.0.40
codegen_flags: <defaults>
</compile_context>

<pallas_src>
import functools

import jax
import jax.numpy as jnp
from jax.experimental import pallas as pl
from jax.experimental.pallas import tpu as pltpu

NUM_FEATURES = 11
EDGE_DIM = 4
DIM = 64          # node feature width
EH = 128          # edge-network hidden width
ROW_TILE = 512    # per perf review: <=512 rows keeps the P scratch (8 MiB)
                  # safely inside v7x's smaller VMEM; fine on v5e/v6e too


# ------------------------------ small helpers ------------------------------

def _round_up(n, m):
    return ((n + m - 1) // m) * m


def _tile_and_pad(n, max_tile=ROW_TILE):
    """Pick a row tile (multiple of 8, <= max_tile) and padded row count.
    Guarantees >=2 grid steps when rows permit so both v7x TensorCores get
    work (harmless no-op on single-TC v5e/v6e)."""
    n = max(int(n), 1)
    t = min(max_tile, _round_up(n, 8))
    if _round_up(n, t) // t < 2 and n >= 16:
        t = _round_up((n + 1) // 2, 8)
    return t, _round_up(n, t)


def _pad_to(a, rows):
    n = a.shape[0]
    if rows == n:
        return a
    return jnp.zeros((rows,) + a.shape[1:], a.dtype).at[:n].set(a)


# ----------------------------- Pallas kernels ------------------------------

def _dense_kernel(*refs, relu, has_bias):
    if has_bias:
        x_ref, w_ref, b_ref, o_ref = refs
    else:
        x_ref, w_ref, o_ref = refs
    acc = jnp.dot(x_ref[...], w_ref[...], preferred_element_type=jnp.float32)
    if has_bias:
        acc = acc + b_ref[...]
    if relu:
        acc = jnp.maximum(acc, 0.0)
    o_ref[...] = acc.astype(o_ref.dtype)


def dense(x, w, b=None, relu=False, out_dtype=jnp.float32):
    """y = x @ w (+ b) (+ relu); rows tiled over a 'parallel' grid, weight
    resident.  K is tiny (<=11) here, so operands stay f32; output can be
    emitted directly in bf16 (used for the edge-net hidden layer)."""
    m, k = x.shape
    k2, n = w.shape
    assert k == k2
    mt, mp = _tile_and_pad(m)
    xp = _pad_to(x.astype(jnp.float32), mp)
    args = [xp, w.astype(jnp.float32)]
    in_specs = [
        pl.BlockSpec((mt, k), lambda i: (i, 0)),
        pl.BlockSpec((k, n), lambda i: (0, 0)),      # resident weight block
    ]
    if b is not None:
        args.append(jnp.asarray(b, jnp.float32).reshape(1, n))
        in_specs.append(pl.BlockSpec((1, n), lambda i: (0, 0)))
    out = pl.pallas_call(
        functools.partial(_dense_kernel, relu=relu, has_bias=b is not None),
        out_shape=jax.ShapeDtypeStruct((mp, n), out_dtype),
        grid=(mp // mt,),
        in_specs=in_specs,
        out_specs=pl.BlockSpec((mt, n), lambda i: (i, 0)),
        compiler_params=pltpu.CompilerParams(
            dimension_semantics=("parallel",)),
    )(*args)
    return out[:m]


def _edge_msg_kernel(xs_ref, h1_ref, wflat_ref, b2_ref, o_ref, p_ref):
    # msg[e, o] = sum_{k,c} x_src[e,k] * h1[e,c] * e2_w[c, k*DIM+o]
    #           + sum_k     x_src[e,k] * e2_b[k*DIM+o]
    # Build P[e, k*EH + c] = x_src[e,k] * h1[e,c] in a bf16 VMEM scratch with
    # 64 lane-aligned column-block stores, then ONE K=8192 MXU contraction
    # against the resident wflat[k*EH + c, o]; the bias term is x_src @ B2.
    xs = xs_ref[...]                                  # [T, DIM]  bf16
    h1 = h1_ref[...]                                  # [T, EH]   bf16
    for k in range(DIM):
        p_ref[:, k * EH:(k + 1) * EH] = xs[:, k:k + 1] * h1
    acc = jnp.dot(p_ref[...], wflat_ref[...],
                  preferred_element_type=jnp.float32)
    acc = acc + jnp.dot(xs, b2_ref[...], preferred_element_type=jnp.float32)
    o_ref[...] = acc


def edge_messages(x_src_bf, h1p, wflat, b2, et, n_edges):
    """Per-edge NNConv messages.  x_src_bf: [E, DIM] bf16 (gathered in bf16),
    h1p: [Ep, EH] bf16 (padded once outside the conv loop),
    wflat: [DIM*EH, DIM] bf16 (resident), b2: [DIM, DIM] bf16 (resident)."""
    ep = h1p.shape[0]
    xs = _pad_to(x_src_bf, ep)
    out = pl.pallas_call(
        _edge_msg_kernel,
        out_shape=jax.ShapeDtypeStruct((ep, DIM), jnp.float32),
        grid=(ep // et,),
        in_specs=[
            pl.BlockSpec((et, DIM), lambda i: (i, 0)),
            pl.BlockSpec((et, EH), lambda i: (i, 0)),
            pl.BlockSpec((DIM * EH, DIM), lambda i: (0, 0)),   # resident
            pl.BlockSpec((DIM, DIM), lambda i: (0, 0)),        # resident
        ],
        out_specs=pl.BlockSpec((et, DIM), lambda i: (i, 0)),
        scratch_shapes=[pltpu.VMEM((et, DIM * EH), jnp.bfloat16)],
        compiler_params=pltpu.CompilerParams(
            dimension_semantics=("parallel",)),
    )(xs, h1p, wflat, b2)
    return out[:n_edges]


def _nnconv_update_kernel(agg_ref, invdeg_ref, x_ref, wr_ref, b_ref, o_ref):
    # Fused NNConv epilogue: mean-aggregation divide + root matmul + bias + ReLU.
    root = jnp.dot(x_ref[...], wr_ref[...], preferred_element_type=jnp.float32)
    out = agg_ref[...] * invdeg_ref[...] + root + b_ref[...]
    o_ref[...] = jnp.maximum(out, 0.0)


def nnconv_update(agg_sum, inv_deg_p, x_bf, w_root_bf, bias, nt, npad, n):
    aggp = _pad_to(agg_sum.astype(jnp.float32), npad)
    xp = _pad_to(x_bf, npad)
    out = pl.pallas_call(
        _nnconv_update_kernel,
        out_shape=jax.ShapeDtypeStruct((npad, DIM), jnp.float32),
        grid=(npad // nt,),
        in_specs=[
            pl.BlockSpec((nt, DIM), lambda i: (i, 0)),
            pl.BlockSpec((nt, 1), lambda i: (i, 0)),
            pl.BlockSpec((nt, DIM), lambda i: (i, 0)),
            pl.BlockSpec((DIM, DIM), lambda i: (0, 0)),        # resident
            pl.BlockSpec((1, DIM), lambda i: (0, 0)),          # resident
        ],
        out_specs=pl.BlockSpec((nt, DIM), lambda i: (i, 0)),
        compiler_params=pltpu.CompilerParams(
            dimension_semantics=("parallel",)),
    )(aggp, inv_deg_p, xp, w_root_bf, bias)
    return out[:n]


# ------------------------------- model glue --------------------------------

def set2set(params, x, batch, num_graphs, steps=3):
    """Set2Set pooling.  The LSTM / attention work on ~num_graphs rows, so it
    stays in plain XLA (pallas launch overhead would dominate, per review)."""
    n, d = x.shape
    h = jnp.zeros((num_graphs, d), jnp.float32)
    c = jnp.zeros((num_graphs, d), jnp.float32)
    q_star = jnp.zeros((num_graphs, 2 * d), jnp.float32)
    w_ih = params["lstm_wih"]
    w_hh = params["lstm_whh"]
    b = (params["lstm_bih"] + params["lstm_bhh"]).reshape(1, 4 * d)
    for _ in range(steps):
        gates = q_star @ w_ih + h @ w_hh + b
        i = jax.nn.sigmoid(gates[:, 0 * d:1 * d])
        f = jax.nn.sigmoid(gates[:, 1 * d:2 * d])
        g = jnp.tanh(gates[:, 2 * d:3 * d])
        o = jax.nn.sigmoid(gates[:, 3 * d:4 * d])
        c = f * c + i * g
        h = o * jnp.tanh(c)
        q = h                                                       # [B, D]
        # per-graph attention softmax (PyG semantics, incl. +1e-16)
        e = jnp.sum(x * jnp.take(q, batch, axis=0), axis=-1)        # [N]
        e_max = jax.ops.segment_max(e, batch, num_segments=num_graphs)
        alpha = jnp.exp(e - jnp.take(e_max, batch))
        denom = jax.ops.segment_sum(alpha, batch, num_segments=num_graphs)
        a = alpha / (jnp.take(denom, batch) + 1e-16)
        r = jax.ops.segment_sum(a[:, None] * x, batch,
                                num_segments=num_graphs)            # [B, D]
        q_star = jnp.concatenate([q, r], axis=1)                    # [B, 2D]
    return q_star


def net_forward(params, x, edge_index, edge_attr, batch, num_graphs):
    n = x.shape[0]
    n_edges = edge_index.shape[1]
    src, dst = edge_index[0], edge_index[1]

    out = dense(x, params["lin0_w"], params["lin0_b"], relu=True)   # [N, D]

    # Edge-network hidden state (same conv module all 3 layers -> computed
    # once), emitted directly in bf16 by the dense kernel.
    h1_bf = dense(edge_attr, params["e1_w"], params["e1_b"], relu=True,
                  out_dtype=jnp.bfloat16)                           # [E, 128]

    # Pre-flattened second edge-net layer (never materialize wflat [E, D*D]):
    #   wflat[k*EH + c, o] = e2_w[c, k*DIM + o]   (matches PyG .view(-1,in,out))
    #   b2[k, o]           = e2_b[k*DIM + o]
    wflat = (params["e2_w"].reshape(EH, DIM, DIM).transpose(1, 0, 2)
             .reshape(DIM * EH, DIM).astype(jnp.bfloat16))
    b2 = params["e2_b"].reshape(DIM, DIM).astype(jnp.bfloat16)
    w_root_bf = params["conv_root"].astype(jnp.bfloat16)
    conv_bias = jnp.asarray(params["conv_bias"], jnp.float32).reshape(1, DIM)

    # Tiling / padding / aggregation bookkeeping hoisted out of the conv loop.
    et, ep = _tile_and_pad(n_edges)
    h1p = _pad_to(h1_bf, ep)                          # padded ONCE, reused x3
    nt, npad = _tile_and_pad(n)
    deg = jax.ops.segment_sum(jnp.ones((n_edges,), jnp.float32), dst,
                              num_segments=n)
    inv_deg_p = _pad_to((1.0 / jnp.maximum(deg, 1.0)).reshape(n, 1), npad)
    # scatter-mean; 0 contribution handled by padded rows, isolated nodes safe.

    for _ in range(3):
        out_bf = out.astype(jnp.bfloat16)             # bf16 gather + root matmul
        x_src = jnp.take(out_bf, src, axis=0)                       # [E, D] bf16
        msg = edge_messages(x_src, h1p, wflat, b2, et, n_edges)     # [E, D] f32
        agg = jax.ops.segment_sum(msg, dst, num_segments=n)         # [N, D]
        out = nnconv_update(agg, inv_deg_p, out_bf, w_root_bf, conv_bias,
                            nt, npad, n)                            # [N, D]

    q_star = set2set(params, out, batch, num_graphs)                # [B, 2D]
    # Tail layers on ~num_graphs rows: plain XLA (per perf review).
    hid = jnp.maximum(q_star @ params["lin1_w"] + params["lin1_b"], 0.0)
    y = hid @ params["lin2_w"] + params["lin2_b"]
    return y.reshape(-1)


# ------------------------------- parameters --------------------------------

def init_params(key):
    def lin(k, fan_in, fan_out):
        k1, k2 = jax.random.split(k)
        bound = 1.0 / (fan_in ** 0.5)
        w = jax.random.uniform(k1, (fan_in, fan_out), jnp.float32, -bound, bound)
        b = jax.random.uniform(k2, (fan_out,), jnp.float32, -bound, bound)
        return w, b

    ks = jax.random.split(key, 10)
    p = {}
    p["lin0_w"], p["lin0_b"] = lin(ks[0], NUM_FEATURES, DIM)
    p["e1_w"], p["e1_b"] = lin(ks[1], EDGE_DIM, EH)
    p["e2_w"], p["e2_b"] = lin(ks[2], EH, DIM * DIM)
    p["conv_root"], p["conv_bias"] = lin(ks[3], DIM, DIM)
    # LSTM(input=2*DIM, hidden=DIM), weights pre-transposed for x @ W
    bound = 1.0 / (DIM ** 0.5)
    p["lstm_wih"] = jax.random.uniform(ks[4], (2 * DIM, 4 * DIM), jnp.float32,
                                       -bound, bound)
    p["lstm_whh"] = jax.random.uniform(ks[5], (DIM, 4 * DIM), jnp.float32,
                                       -bound, bound)
    p["lstm_bih"] = jax.random.uniform(ks[6], (4 * DIM,), jnp.float32,
                                       -bound, bound)
    p["lstm_bhh"] = jax.random.uniform(ks[7], (4 * DIM,), jnp.float32,
                                       -bound, bound)
    p["lin1_w"], p["lin1_b"] = lin(ks[8], 2 * DIM, DIM)
    p["lin2_w"], p["lin2_b"] = lin(ks[9], DIM, 1)
    return p


# ---------------------------------- main ------------------------------------

if __name__ == "__main__":
    key = jax.random.PRNGKey(0)
    pkey, xkey, ekey = jax.random.split(key, 3)
    params = init_params(pkey)

    # small synthetic batched graph: 3 graphs x 4 nodes, bidirectional rings
    num_graphs = 3
    nodes_per_graph = 4
    n_nodes = num_graphs * nodes_per_graph
    srcs, dsts = [], []
    for g in range(num_graphs):
        base = g * nodes_per_graph
        for i in range(nodes_per_graph):
            s, t = base + i, base + (i + 1) % nodes_per_graph
            srcs += [s, t]
            dsts += [t, s]
    edge_index = jnp.array([srcs, dsts], dtype=jnp.int32)           # [2, 24]
    n_edges = edge_index.shape[1]

    x = jax.random.normal(xkey, (n_nodes, NUM_FEATURES), jnp.float32)
    edge_attr = jax.random.normal(ekey, (n_edges, EDGE_DIM), jnp.float32)
    batch = jnp.repeat(jnp.arange(num_graphs, dtype=jnp.int32),
                       nodes_per_graph)

    fwd = jax.jit(net_forward, static_argnums=(5,))
    y = fwd(params, x, edge_index, edge_attr, batch, num_graphs)
    jax.block_until_ready(y)
    assert y.shape == (num_graphs,)
    print("KERNEL_OK")
</pallas_src>

<mosaic_0001>
module attributes {stable_mosaic.version = 11 : i64} {
  func.func private @main(%arg0: i32) attributes {dimension_semantics = [#tpu.dimension_semantics<core_parallel>], iteration_bounds = array<i64: 2>, tpu.core_type = #tpu.core_type<sc_scalar_subcore>, window_params = []} {
    return
  }
}

module attributes {stable_mosaic.version = 11 : i64} {
  func.func private @main(%arg0: i32) attributes {dimension_semantics = [#tpu.dimension_semantics<core_parallel>], iteration_bounds = array<i64: 2>, tpu.core_type = #tpu.core_type<sc_scalar_subcore>, window_params = []} {
    return
  }
}

module attributes {stable_mosaic.version = 11 : i64} {
  func.func @_dense_kernel(%arg0: i32, %arg1: memref<16x11xf32, #tpu.memory_space<vmem>>, %arg2: memref<11x64xf32, #tpu.memory_space<vmem>>, %arg3: memref<1x64xf32, #tpu.memory_space<vmem>>, %arg4: memref<16x64xf32, #tpu.memory_space<vmem>>) attributes {dimension_semantics = [#tpu.dimension_semantics<parallel>], iteration_bounds = array<i64: 1>, scalar_prefetch = 0 : i64, scratch_operands = 0 : i64, tpu.core_type = #tpu.core_type<tc>, window_params = [{transform_indices = @transform_0, window_bounds = array<i64: 16, 11>}, {pipeline_mode = #tpu.pipeline_mode<synchronous>, transform_indices = @transform_1, window_bounds = array<i64: 11, 64>}, {pipeline_mode = #tpu.pipeline_mode<synchronous>, transform_indices = @transform_2, window_bounds = array<i64: 1, 64>}, {transform_indices = @transform_3, window_bounds = array<i64: 16, 64>}]} {
    %c0 = arith.constant 0 : index
    %c0_0 = arith.constant 0 : index
    %0 = vector.load %arg1[%c0, %c0_0] : memref<16x11xf32, #tpu.memory_space<vmem>>, vector<16x11xf32>
    %c0_1 = arith.constant 0 : index
    %c0_2 = arith.constant 0 : index
    %1 = vector.load %arg2[%c0_1, %c0_2] : memref<11x64xf32, #tpu.memory_space<vmem>>, vector<11x64xf32>
    %cst = arith.constant dense<0.000000e+00> : vector<16x64xf32>
    %2 = tpu.matmul %0, %1, %cst {dimension_numbers = #tpu.dot_dimension_numbers<[1], [0], [0], [1], [0, 0, 1, 1], [], []>} : vector<16x11xf32>, vector<11x64xf32>, vector<16x64xf32> -> vector<16x64xf32>
    %c0_3 = arith.constant 0 : index
    %c0_4 = arith.constant 0 : index
    %3 = vector.load %arg3[%c0_3, %c0_4] : memref<1x64xf32, #tpu.memory_space<vmem>>, vector<1x64xf32>
    %4 = vector.broadcast %3 : vector<1x64xf32> to vector<16x64xf32>
    %5 = arith.addf %2, %4 : vector<16x64xf32>
    %cst_5 = arith.constant 0.000000e+00 : f32
    %6 = vector.broadcast %cst_5 : f32 to vector<16x64xf32>
    %7 = arith.maximumf %5, %6 : vector<16x64xf32>
    %c0_6 = arith.constant 0 : index
    %c0_7 = arith.constant 0 : index
    %8 = vector.load %arg4[%c0_6, %c0_7] : memref<16x64xf32, #tpu.memory_space<vmem>>, vector<16x64xf32>
    tpu.vector_store %arg4[%c0_6, %c0_7], %7 {strides = array<i32>} : memref<16x64xf32, #tpu.memory_space<vmem>>, vector<16x64xf32>,
    return
  }
  func.func @transform_0(%arg0: i32) -> (i32, i32) {
    %c0_i32 = arith.constant 0 : i32
    %c0_i32_0 = arith.constant 0 : i32
    return %arg0, %c0_i32 : i32, i32
  }
  func.func @transform_1(%arg0: i32) -> (i32, i32) {
    %c0_i32 = arith.constant 0 : i32
    %c0_i32_0 = arith.constant 0 : i32
    %c0_i32_1 = arith.constant 0 : i32
    return %c0_i32, %c0_i32_0 : i32, i32
  }
  func.func @transform_2(%arg0: i32) -> (i32, i32) {
    %c0_i32 = arith.constant 0 : i32
    %c0_i32_0 = arith.constant 0 : i32
    %c0_i32_1 = arith.constant 0 : i32
    return %c0_i32, %c0_i32_0 : i32, i32
  }
  func.func @transform_3(%arg0: i32) -> (i32, i32) {
    %c0_i32 = arith.constant 0 : i32
    %c0_i32_0 = arith.constant 0 : i32
    return %arg0, %c0_i32 : i32, i32
  }
}

module attributes {stable_mosaic.version = 11 : i64} {
  func.func @_dense_kernel(%arg0: i32, %arg1: memref<16x4xf32, #tpu.memory_space<vmem>>, %arg2: memref<4x128xf32, #tpu.memory_space<vmem>>, %arg3: memref<1x128xf32, #tpu.memory_space<vmem>>, %arg4: memref<16x128xbf16, #tpu.memory_space<vmem>>) attributes {dimension_semantics = [#tpu.dimension_semantics<parallel>], iteration_bounds = array<i64: 2>, scalar_prefetch = 0 : i64, scratch_operands = 0 : i64, tpu.core_type = #tpu.core_type<tc>, window_params = [{transform_indices = @transform_0, window_bounds = array<i64: 16, 4>}, {pipeline_mode = #tpu.pipeline_mode<synchronous>, transform_indices = @transform_1, window_bounds = array<i64: 4, 128>}, {pipeline_mode = #tpu.pipeline_mode<synchronous>, transform_indices = @transform_2, window_bounds = array<i64: 1, 128>}, {transform_indices = @transform_3, window_bounds = array<i64: 16, 128>}]} {
    %c0 = arith.constant 0 : index
    %c0_0 = arith.constant 0 : index
    %0 = vector.load %arg1[%c0, %c0_0] : memref<16x4xf32, #tpu.memory_space<vmem>>, vector<16x4xf32>
    %c0_1 = arith.constant 0 : index
    %c0_2 = arith.constant 0 : index
    %1 = vector.load %arg2[%c0_1, %c0_2] : memref<4x128xf32, #tpu.memory_space<vmem>>, vector<4x128xf32>
    %cst = arith.constant dense<0.000000e+00> : vector<16x128xf32>
    %2 = tpu.matmul %0, %1, %cst {dimension_numbers = #tpu.dot_dimension_numbers<[1], [0], [0], [1], [0, 0, 1, 1], [], []>} : vector<16x4xf32>, vector<4x128xf32>, vector<16x128xf32> -> vector<16x128xf32>
    %c0_3 = arith.constant 0 : index
    %c0_4 = arith.constant 0 : index
    %3 = vector.load %arg3[%c0_3, %c0_4] : memref<1x128xf32, #tpu.memory_space<vmem>>, vector<1x128xf32>
    %4 = vector.broadcast %3 : vector<1x128xf32> to vector<16x128xf32>
    %5 = arith.addf %2, %4 : vector<16x128xf32>
    %cst_5 = arith.constant 0.000000e+00 : f32
    %6 = vector.broadcast %cst_5 : f32 to vector<16x128xf32>
    %7 = arith.maximumf %5, %6 : vector<16x128xf32>
    %8 = arith.truncf %7 : vector<16x128xf32> to vector<16x128xbf16>
    %c0_6 = arith.constant 0 : index
    %c0_7 = arith.constant 0 : index
    %9 = vector.load %arg4[%c0_6, %c0_7] : memref<16x128xbf16, #tpu.memory_space<vmem>>, vector<16x128xbf16>
    tpu.vector_store %arg4[%c0_6, %c0_7], %8 {strides = array<i32>} : memref<16x128xbf16, #tpu.memory_space<vmem>>, vector<16x128xbf16>,
    return
  }
  func.func @transform_0(%arg0: i32) -> (i32, i32) {
    %c0_i32 = arith.constant 0 : i32
    %c0_i32_0 = arith.constant 0 : i32
    return %arg0, %c0_i32 : i32, i32
  }
  func.func @transform_1(%arg0: i32) -> (i32, i32) {
    %c0_i32 = arith.constant 0 : i32
    %c0_i32_0 = arith.constant 0 : i32
    %c0_i32_1 = arith.constant 0 : i32
    return %c0_i32, %c0_i32_0 : i32, i32
  }
  func.func @transform_2(%arg0: i32) -> (i32, i32) {
    %c0_i32 = arith.constant 0 : i32
    %c0_i32_0 = arith.constant 0 : i32
    %c0_i32_1 = arith.constant 0 : i32
    return %c0_i32, %c0_i32_0 : i32, i32
  }
  func.func @transform_3(%arg0: i32) -> (i32, i32) {
    %c0_i32 = arith.constant 0 : i32
    %c0_i32_0 = arith.constant 0 : i32
    return %arg0, %c0_i32 : i32, i32
  }
}

module attributes {stable_mosaic.version = 11 : i64} {
  func.func @_edge_msg_kernel(%arg0: i32, %arg1: memref<16x64xbf16, #tpu.memory_space<vmem>>, %arg2: memref<16x128xbf16, #tpu.memory_space<vmem>>, %arg3: memref<8192x64xbf16, #tpu.memory_space<vmem>>, %arg4: memref<64x64xbf16, #tpu.memory_space<vmem>>, %arg5: memref<16x64xf32, #tpu.memory_space<vmem>>, %arg6: memref<16x8192xbf16, #tpu.memory_space<vmem>>) attributes {dimension_semantics = [#tpu.dimension_semantics<parallel>], iteration_bounds = array<i64: 2>, scalar_prefetch = 0 : i64, scratch_operands = 1 : i64, tpu.core_type = #tpu.core_type<tc>, window_params = [{transform_indices = @transform_0, window_bounds = array<i64: 16, 64>}, {transform_indices = @transform_1, window_bounds = array<i64: 16, 128>}, {pipeline_mode = #tpu.pipeline_mode<synchronous>, transform_indices = @transform_2, window_bounds = array<i64: 8192, 64>}, {pipeline_mode = #tpu.pipeline_mode<synchronous>, transform_indices = @transform_3, window_bounds = array<i64: 64, 64>}, {transform_indices = @transform_4, window_bounds = array<i64: 16, 64>}]} {
    %c0 = arith.constant 0 : index
    %c0_0 = arith.constant 0 : index
    %0 = vector.load %arg1[%c0, %c0_0] : memref<16x64xbf16, #tpu.memory_space<vmem>>, vector<16x64xbf16>
    %c0_1 = arith.constant 0 : index
    %c0_2 = arith.constant 0 : index
    %1 = vector.load %arg2[%c0_1, %c0_2] : memref<16x128xbf16, #tpu.memory_space<vmem>>, vector<16x128xbf16>
    %2 = vector.extract_strided_slice %0 {offsets = [0, 0], sizes = [16, 1], strides = [1, 1]} : vector<16x64xbf16> to vector<16x1xbf16>
    %3 = vector.broadcast %2 : vector<16x1xbf16> to vector<16x128xbf16>
    %4 = arith.mulf %3, %1 : vector<16x128xbf16>
    %c0_3 = arith.constant 0 : index
    %c0_4 = arith.constant 0 : index
    %5 = vector.load %arg6[%c0_3, %c0_4] : memref<16x8192xbf16, #tpu.memory_space<vmem>>, vector<16x128xbf16>
    tpu.vector_store %arg6[%c0_3, %c0_4], %4 {strides = array<i32>} : memref<16x8192xbf16, #tpu.memory_space<vmem>>, vector<16x128xbf16>,
    %6 = vector.extract_strided_slice %0 {offsets = [0, 1], sizes = [16, 1], strides = [1, 1]} : vector<16x64xbf16> to vector<16x1xbf16>
    %7 = vector.broadcast %6 : vector<16x1xbf16> to vector<16x128xbf16>
    %8 = arith.mulf %7, %1 : vector<16x128xbf16>
    %c0_5 = arith.constant 0 : index
    %c128 = arith.constant 128 : index
    %9 = vector.load %arg6[%c0_5, %c128] : memref<16x8192xbf16, #tpu.memory_space<vmem>>, vector<16x128xbf16>
    tpu.vector_store %arg6[%c0_5, %c128], %8 {strides = array<i32>} : memref<16x8192xbf16, #tpu.memory_space<vmem>>, vector<16x128xbf16>,
    %10 = vector.extract_strided_slice %0 {offsets = [0, 2], sizes = [16, 1], strides = [1, 1]} : vector<16x64xbf16> to vector<16x1xbf16>
    %11 = vector.broadcast %10 : vector<16x1xbf16> to vector<16x128xbf16>
    %12 = arith.mulf %11, %1 : vector<16x128xbf16>
    %c0_6 = arith.constant 0 : index
    %c256 = arith.constant 256 : index
    %13 = vector.load %arg6[%c0_6, %c256] : memref<16x8192xbf16, #tpu.memory_space<vmem>>, vector<16x128xbf16>
    tpu.vector_store %arg6[%c0_6, %c256], %12 {strides = array<i32>} : memref<16x8192xbf16, #tpu.memory_space<vmem>>, vector<16x128xbf16>,
    %14 = vector.extract_strided_slice %0 {offsets = [0, 3], sizes = [16, 1], strides = [1, 1]} : vector<16x64xbf16> to vector<16x1xbf16>
    %15 = vector.broadcast %14 : vector<16x1xbf16> to vector<16x128xbf16>
    %16 = arith.mulf %15, %1 : vector<16x128xbf16>
    %c0_7 = arith.constant 0 : index
    %c384 = arith.constant 384 : index
    %17 = vector.load %arg6[%c0_7, %c384] : memref<16x8192xbf16, #tpu.memory_space<vmem>>, vector<16x128xbf16>
    tpu.vector_store %arg6[%c0_7, %c384], %16 {strides = array<i32>} : memref<16x8192xbf16, #tpu.memory_space<vmem>>, vector<16x128xbf16>,
    %18 = vector.extract_strided_slice %0 {offsets = [0, 4], sizes = [16, 1], strides = [1, 1]} : vector<16x64xbf16> to vector<16x1xbf16>
    %19 = vector.broadcast %18 : vector<16x1xbf16> to vector<16x128xbf16>
    %20 = arith.mulf %19, %1 : vector<16x128xbf16>
    %c0_8 = arith.constant 0 : index
    %c512 = arith.constant 512 : index
    %21 = vector.load %arg6[%c0_8, %c512] : memref<16x8192xbf16, #tpu.memory_space<vmem>>, vector<16x128xbf16>
    tpu.vector_store %arg6[%c0_8, %c512], %20 {strides = array<i32>} : memref<16x8192xbf16, #tpu.memory_space<vmem>>, vector<16x128xbf16>,
    %22 = vector.extract_strided_slice %0 {offsets = [0, 5], sizes = [16, 1], strides = [1, 1]} : vector<16x64xbf16> to vector<16x1xbf16>
    %23 = vector.broadcast %22 : vector<16x1xbf16> to vector<16x128xbf16>
    %24 = arith.mulf %23, %1 : vector<16x128xbf16>
    %c0_9 = arith.constant 0 : index
    %c640 = arith.constant 640 : index
    %25 = vector.load %arg6[%c0_9, %c640] : memref<16x8192xbf16, #tpu.memory_space<vmem>>, vector<16x128xbf16>
    tpu.vector_store %arg6[%c0_9, %c640], %24 {strides = array<i32>} : memref<16x8192xbf16, #tpu.memory_space<vmem>>, vector<16x128xbf16>,
    %26 = vector.extract_strided_slice %0 {offsets = [0, 6], sizes = [16, 1], strides = [1, 1]} : vector<16x64xbf16> to vector<16x1xbf16>
    %27 = vector.broadcast %26 : vector<16x1xbf16> to vector<16x128xbf16>
    %28 = arith.mulf %27, %1 : vector<16x128xbf16>
    %c0_10 = arith.constant 0 : index
    %c768 = arith.constant 768 : index
    %29 = vector.load %arg6[%c0_10, %c768] : memref<16x8192xbf16, #tpu.memory_space<vmem>>, vector<16x128xbf16>
    tpu.vector_store %arg6[%c0_10, %c768], %28 {strides = array<i32>} : memref<16x8192xbf16, #tpu.memory_space<vmem>>, vector<16x128xbf16>,
    %30 = vector.extract_strided_slice %0 {offsets = [0, 7], sizes = [16, 1], strides = [1, 1]} : vector<16x64xbf16> to vector<16x1xbf16>
    %31 = vector.broadcast %30 : vector<16x1xbf16> to vector<16x128xbf16>
    %32 = arith.mulf %31, %1 : vector<16x128xbf16>
    %c0_11 = arith.constant 0 : index
    %c896 = arith.constant 896 : index
    %33 = vector.load %arg6[%c0_11, %c896] : memref<16x8192xbf16, #tpu.memory_space<vmem>>, vector<16x128xbf16>
    tpu.vector_store %arg6[%c0_11, %c896], %32 {strides = array<i32>} : memref<16x8192xbf16, #tpu.memory_space<vmem>>, vector<16x128xbf16>,
    %34 = vector.extract_strided_slice %0 {offsets = [0, 8], sizes = [16, 1], strides = [1, 1]} : vector<16x64xbf16> to vector<16x1xbf16>
    %35 = vector.broadcast %34 : vector<16x1xbf16> to vector<16x128xbf16>
    %36 = arith.mulf %35, %1 : vector<16x128xbf16>
    %c0_12 = arith.constant 0 : index
    %c1024 = arith.constant 1024 : index
    %37 = vector.load %arg6[%c0_12, %c1024] : memref<16x8192xbf16, #tpu.memory_space<vmem>>, vector<16x128xbf16>
    tpu.vector_store %arg6[%c0_12, %c1024], %36 {strides = array<i32>} : memref<16x8192xbf16, #tpu.memory_space<vmem>>, vector<16x128xbf16>,
    %38 = vector.extract_strided_slice %0 {offsets = [0, 9], sizes = [16, 1], strides = [1, 1]} : vector<16x64xbf16> to vector<16x1xbf16>
    %39 = vector.broadcast %38 : vector<16x1xbf16> to vector<16x128xbf16>
    %40 = arith.mulf %39, %1 : vector<16x128xbf16>
    %c0_13 = arith.constant 0 : index
    %c1152 = arith.constant 1152 : index
    %41 = vector.load %arg6[%c0_13, %c1152] : memref<16x8192xbf16, #tpu.memory_space<vmem>>, vector<16x128xbf16>
    tpu.vector_store %arg6[%c0_13, %c1152], %40 {strides = array<i32>} : memref<16x8192xbf16, #tpu.memory_space<vmem>>, vector<16x128xbf16>,
    %42 = vector.extract_strided_slice %0 {offsets = [0, 10], sizes = [16, 1], strides = [1, 1]} : vector<16x64xbf16> to vector<16x1xbf16>
    %43 = vector.broadcast %42 : vector<16x1xbf16> to vector<16x128xbf16>
    %44 = arith.mulf %43, %1 : vector<16x128xbf16>
    %c0_14 = arith.constant 0 : index
    %c1280 = arith.constant 1280 : index
    %45 = vector.load %arg6[%c0_14, %c1280] : memref<16x8192xbf16, #tpu.memory_space<vmem>>, vector<16x128xbf16>
    tpu.vector_store %arg6[%c0_14, %c1280], %44 {strides = array<i32>} : memref<16x8192xbf16, #tpu.memory_space<vmem>>, vector<16x128xbf16>,
    %46 = vector.extract_strided_slice %0 {offsets = [0, 11], sizes = [16, 1], strides = [1, 1]} : vector<16x64xbf16> to vector<16x1xbf16>
    %47 = vector.broadcast %46 : vector<16x1xbf16> to vector<16x128xbf16>
    %48 = arith.mulf %47, %1 : vector<16x128xbf16>
    %c0_15 = arith.constant 0 : index
    %c1408 = arith.constant 1408 : index
    %49 = vector.load %arg6[%c0_15, %c1408] : memref<16x8192xbf16, #tpu.memory_space<vmem>>, vector<16x128xbf16>
    tpu.vector_store %arg6[%c0_15, %c1408], %48 {strides = array<i32>} : memref<16x8192xbf16, #tpu.memory_space<vmem>>, vector<16x128xbf16>,
    %50 = vector.extract_strided_slice %0 {offsets = [0, 12], sizes = [16, 1], strides = [1, 1]} : vector<16x64xbf16> to vector<16x1xbf16>
    %51 = vector.broadcast %50 : vector<16x1xbf16> to vector<16x128xbf16>
    %52 = arith.mulf %51, %1 : vector<16x128xbf16>
    %c0_16 = arith.constant 0 : index
    %c1536 = arith.constant 1536 : index
    %53 = vector.load %arg6[%c0_16, %c1536] : memref<16x8192xbf16, #tpu.memory_space<vmem>>, vector<16x128xbf16>
    tpu.vector_store %arg6[%c0_16, %c1536], %52 {strides = array<i32>} : memref<16x8192xbf16, #tpu.memory_space<vmem>>, vector<16x128xbf16>,
    %54 = vector.extract_strided_slice %0 {offsets = [0, 13], sizes = [16, 1], strides = [1, 1]} : vector<16x64xbf16> to vector<16x1xbf16>
    %55 = vector.broadcast %54 : vector<16x1xbf16> to vector<16x128xbf16>
    %56 = arith.mulf %55, %1 : vector<16x128xbf16>
    %c0_17 = arith.constant 0 : index
    %c1664 = arith.constant 1664 : index
    %57 = vector.load %arg6[%c0_17, %c1664] : memref<16x8192xbf16, #tpu.memory_space<vmem>>, vector<16x128xbf16>
    tpu.vector_store %arg6[%c0_17, %c1664], %56 {strides = array<i32>} : memref<16x8192xbf16, #tpu.memory_space<vmem>>, vector<16x128xbf16>,
    %58 = vector.extract_strided_slice %0 {offsets = [0, 14], sizes = [16, 1], strides = [1, 1]} : vector<16x64xbf16> to vector<16x1xbf16>
    %59 = vector.broadcast %58 : vector<16x1xbf16> to vector<16x128xbf16>
    %60 = arith.mulf %59, %1 : vector<16x128xbf16>
    %c0_18 = arith.constant 0 : index
    %c1792 = arith.constant 1792 : index
    %61 = vector.load %arg6[%c0_18, %c1792] : memref<16x8192xbf16, #tpu.memory_space<vmem>>, vector<16x128xbf16>
    tpu.vector_store %arg6[%c0_18, %c1792], %60 {strides = array<i32>} : memref<16x8192xbf16, #tpu.memory_space<vmem>>, vector<16x128xbf16>,
    %62 = vector.extract_strided_slice %0 {offsets = [0, 15], sizes = [16, 1], strides = [1, 1]} : vector<16x64xbf16> to vector<16x1xbf16>
    %63 = vector.broadcast %62 : vector<16x1xbf16> to vector<16x128xbf16>
    %64 = arith.mulf %63, %1 : vector<16x128xbf16>
    %c0_19 = arith.constant 0 : index
    %c1920 = arith.constant 1920 : index
    %65 = vector.load %arg6[%c0_19, %c1920] : memref<16x8192xbf16, #tpu.memory_space<vmem>>, vector<16x128xbf16>
    tpu.vector_store %arg6[%c0_19, %c1920], %64 {strides = array<i32>} : memref<16x8192xbf16, #tpu.memory_space<vmem>>, vector<16x128xbf16>,
    %66 = vector.extract_strided_slice %0 {offsets = [0, 16], sizes = [16, 1], strides = [1, 1]} : vector<16x64xbf16> to vector<16x1xbf16>
    %67 = vector.broadcast %66 : vector<16x1xbf16> to vector<16x128xbf16>
    %68 = arith.mulf %67, %1 : vector<16x128xbf16>
    %c0_20 = arith.constant 0 : index
    %c2048 = arith.constant 2048 : index
    %69 = vector.load %arg6[%c0_20, %c2048] : memref<16x8192xbf16, #tpu.memory_space<vmem>>, vector<16x128xbf16>
    tpu.vector_store %arg6[%c0_20, %c2048], %68 {strides = array<i32>} : memref<16x8192xbf16, #tpu.memory_space<vmem>>, vector<16x128xbf16>,
    %70 = vector.extract_strided_slice %0 {offsets = [0, 17], sizes = [16, 1], strides = [1, 1]} : vector<16x64xbf16> to vector<16x1xbf16>
    %71 = vector.broadcast %70 : vector<16x1xbf16> to vector<16x128xbf16>
    %72 = arith.mulf %71, %1 : vector<16x128xbf16>
    %c0_21 = arith.constant 0 : index
    %c2176 = arith.constant 2176 : index
    %73 = vector.load %arg6[%c0_21, %c2176] : memref<16x8192xbf16, #tpu.memory_space<vmem>>, vector<16x128xbf16>
    tpu.vector_store %arg6[%c0_21, %c2176], %72 {strides = array<i32>} : memref<16x8192xbf16, #tpu.memory_space<vmem>>, vector<16x128xbf16>,
    %74 = vector.extract_strided_slice %0 {offsets = [0, 18], sizes = [16, 1], strides = [1, 1]} : vector<16x64xbf16> to vector<16x1xbf16>
    %75 = vector.broadcast %74 : vector<16x1xbf16> to vector<16x128xbf16>
    %76 = arith.mulf %75, %1 : vector<16x128xbf16>
    %c0_22 = arith.constant 0 : index
    %c2304 = arith.constant 2304 : index
    %77 = vector.load %arg6[%c0_22, %c2304] : memref<16x8192xbf16, #tpu.memory_space<vmem>>, vector<16x128xbf16>
    tpu.vector_store %arg6[%c0_22, %c2304], %76 {strides = array<i32>} : memref<16x8192xbf16, #tpu.memory_space<vmem>>, vector<16x128xbf16>,
    %78 = vector.extract_strided_slice %0 {offsets = [0, 19], sizes = [16, 1], strides = [1, 1]} : vector<16x64xbf16> to vector<16x1xbf16>
    %79 = vector.broadcast %78 : vector<16x1xbf16> to vector<16x128xbf16>
    %80 = arith.mulf %79, %1 : vector<16x128xbf16>
    %c0_23 = arith.constant 0 : index
    %c2432 = arith.constant 2432 : index
    %81 = vector.load %arg6[%c0_23, %c2432] : memref<16x8192xbf16, #tpu.memory_space<vmem>>, vector<16x128xbf16>
    tpu.vector_store %arg6[%c0_23, %c2432], %80 {strides = array<i32>} : memref<16x8192xbf16, #tpu.memory_space<vmem>>, vector<16x128xbf16>,
    %82 = vector.extract_strided_slice %0 {offsets = [0, 20], sizes = [16, 1], strides = [1, 1]} : vector<16x64xbf16> to vector<16x1xbf16>
    %83 = vector.broadcast %82 : vector<16x1xbf16> to vector<16x128xbf16>
    %84 = arith.mulf %83, %1 : vector<16x128xbf16>
    %c0_24 = arith.constant 0 : index
    %c2560 = arith.constant 2560 : index
    %85 = vector.load %arg6[%c0_24, %c2560] : memref<16x8192xbf16, #tpu.memory_space<vmem>>, vector<16x128xbf16>
    tpu.vector_store %arg6[%c0_24, %c2560], %84 {strides = array<i32>} : memref<16x8192xbf16, #tpu.memory_space<vmem>>, vector<16x128xbf16>,
    %86 = vector.extract_strided_slice %0 {offsets = [0, 21], sizes = [16, 1], strides = [1, 1]} : vector<16x64xbf16> to vector<16x1xbf16>
    %87 = vector.broadcast %86 : vector<16x1xbf16> to vector<16x128xbf16>
    %88 = arith.mulf %87, %1 : vector<16x128xbf16>
    %c0_25 = arith.constant 0 : index
    %c2688 = arith.constant 2688 : index
    %89 = vector.load %arg6[%c0_25, %c2688] : memref<16x8192xbf16, #tpu.memory_space<vmem>>, vector<16x128xbf16>
    tpu.vector_store %arg6[%c0_25, %c2688], %88 {strides = array<i32>} : memref<16x8192xbf16, #tpu.memory_space<vmem>>, vector<16x128xbf16>,
    %90 = vector.extract_strided_slice %0 {offsets = [0, 22], sizes = [16, 1], strides = [1, 1]} : vector<16x64xbf16> to vector<16x1xbf16>
    %91 = vector.broadcast %90 : vector<16x1xbf16> to vector<16x128xbf16>
    %92 = arith.mulf %91, %1 : vector<16x128xbf16>
    %c0_26 = arith.constant 0 : index
    %c2816 = arith.constant 2816 : index
    %93 = vector.load %arg6[%c0_26, %c2816] : memref<16x8192xbf16, #tpu.memory_space<vmem>>, vector<16x128xbf16>
    tpu.vector_store %arg6[%c0_26, %c2816], %92 {strides = array<i32>} : memref<16x8192xbf16, #tpu.memory_space<vmem>>, vector<16x128xbf16>,
    %94 = vector.extract_strided_slice %0 {offsets = [0, 23], sizes = [16, 1], strides = [1, 1]} : vector<16x64xbf16> to vector<16x1xbf16>
    %95 = vector.broadcast %94 : vector<16x1xbf16> to vector<16x128xbf16>
    %96 = arith.mulf %95, %1 : vector<16x128xbf16>
    %c0_27 = arith.constant 0 : index
    %c2944 = arith.constant 2944 : index
    %97 = vector.load %arg6[%c0_27, %c2944] : memref<16x8192xbf16, #tpu.memory_space<vmem>>, vector<16x128xbf16>
    tpu.vector_store %arg6[%c0_27, %c2944], %96 {strides = array<i32>} : memref<16x8192xbf16, #tpu.memory_space<vmem>>, vector<16x128xbf16>,
    %98 = vector.extract_strided_slice %0 {offsets = [0, 24], sizes = [16, 1], strides = [1, 1]} : vector<16x64xbf16> to vector<16x1xbf16>
    %99 = vector.broadcast %98 : vector<16x1xbf16> to vector<16x128xbf16>
    %100 = arith.mulf %99, %1 : vector<16x128xbf16>
    %c0_28 = arith.constant 0 : index
    %c3072 = arith.constant 3072 : index
    %101 = vector.load %arg6[%c0_28, %c3072] : memref<16x8192xbf16, #tpu.memory_space<vmem>>, vector<16x128xbf16>
    tpu.vector_store %arg6[%c0_28, %c3072], %100 {strides = array<i32>} : memref<16x8192xbf16, #tpu.memory_space<vmem>>, vector<16x128xbf16>,
    %102 = vector.extract_strided_slice %0 {offsets = [0, 25], sizes = [16, 1], strides = [1, 1]} : vector<16x64xbf16> to vector<16x1xbf16>
    %103 = vector.broadcast %102 : vector<16x1xbf16> to vector<16x128xbf16>
    %104 = arith.mulf %103, %1 : vector<16x128xbf16>
    %c0_29 = arith.constant 0 : index
    %c3200 = arith.constant 3200 : index
    %105 = vector.load %arg6[%c0_29, %c3200] : memref<16x8192xbf16, #tpu.memory_space<vmem>>, vector<16x128xbf16>
    tpu.vector_store %arg6[%c0_29, %c3200], %104 {strides = array<i32>} : memref<16x8192xbf16, #tpu.memory_space<vmem>>, vector<16x128xbf16>,
    %106 = vector.extract_strided_slice %0 {offsets = [0, 26], sizes = [16, 1], strides = [1, 1]} : vector<16x64xbf16> to vector<16x1xbf16>
    %107 = vector.broadcast %106 : vector<16x1xbf16> to vector<16x128xbf16>
    %108 = arith.mulf %107, %1 : vector<16x128xbf16>
    %c0_30 = arith.constant 0 : index
    %c3328 = arith.constant 3328 : index
    %109 = vector.load %arg6[%c0_30, %c3328] : memref<16x8192xbf16, #tpu.memory_space<vmem>>, vector<16x128xbf16>
    tpu.vector_store %arg6[%c0_30, %c3328], %108 {strides = array<i32>} : memref<16x8192xbf16, #tpu.memory_space<vmem>>, vector<16x128xbf16>,
    %110 = vector.extract_strided_slice %0 {offsets = [0, 27], sizes = [16, 1], strides = [1, 1]} : vector<16x64xbf16> to vector<16x1xbf16>
    %111 = vector.broadcast %110 : vector<16x1xbf16> to vector<16x128xbf16>
    %112 = arith.mulf %111, %1 : vector<16x128xbf16>
    %c0_31 = arith.constant 0 : index
    %c3456 = arith.constant 3456 : index
    %113 = vector.load %arg6[%c0_31, %c3456] : memref<16x8192xbf16, #tpu.memory_space<vmem>>, vector<16x128xbf16>
    tpu.vector_store %arg6[%c0_31, %c3456], %112 {strides = array<i32>} : memref<16x8192xbf16, #tpu.memory_space<vmem>>, vector<16x128xbf16>,
    %114 = vector.extract_strided_slice %0 {offsets = [0, 28], sizes = [16, 1], strides = [1, 1]} : vector<16x64xbf16> to vector<16x1xbf16>
    %115 = vector.broadcast %114 : vector<16x1xbf16> to vector<16x128xbf16>
    %116 = arith.mulf %115, %1 : vector<16x128xbf16>
    %c0_32 = arith.constant 0 : index
    %c3584 = arith.constant 3584 : index
    %117 = vector.load %arg6[%c0_32, %c3584] : memref<16x8192xbf16, #tpu.memory_space<vmem>>, vector<16x128xbf16>
    tpu.vector_store %arg6[%c0_32, %c3584], %116 {strides = array<i32>} : memref<16x8192xbf16, #tpu.memory_space<vmem>>, vector<16x128xbf16>,
    %118 = vector.extract_strided_slice %0 {offsets = [0, 29], sizes = [16, 1], strides = [1, 1]} : vector<16x64xbf16> to vector<16x1xbf16>
    %119 = vector.broadcast %118 : vector<16x1xbf16> to vector<16x128xbf16>
    %120 = arith.mulf %119, %1 : vector<16x128xbf16>
    %c0_33 = arith.constant 0 : index
    %c3712 = arith.constant 3712 : index
    %121 = vector.load %arg6[%c0_33, %c3712] : memref<16x8192xbf16, #tpu.memory_space<vmem>>, vector<16x128xbf16>
    tpu.vector_store %arg6[%c0_33, %c3712], %120 {strides = array<i32>} : memref<16x8192xbf16, #tpu.memory_space<vmem>>, vector<16x128xbf16>,
    %122 = vector.extract_strided_slice %0 {offsets = [0, 30], sizes = [16, 1], strides = [1, 1]} : vector<16x64xbf16> to vector<16x1xbf16>
    %123 = vector.broadcast %122 : vector<16x1xbf16> to vector<16x128xbf16>
    %124 = arith.mulf %123, %1 : vector<16x128xbf16>
    %c0_34 = arith.constant 0 : index
    %c3840 = arith.constant 3840 : index
    %125 = vector.load %arg6[%c0_34, %c3840] : memref<16x8192xbf16, #tpu.memory_space<vmem>>, vector<16x128xbf16>
    tpu.vector_store %arg6[%c0_34, %c3840], %124 {strides = array<i32>} : memref<16x8192xbf16, #tpu.memory_space<vmem>>, vector<16x128xbf16>,
    %126 = vector.extract_strided_slice %0 {offsets = [0, 31], sizes = [16, 1], strides = [1, 1]} : vector<16x64xbf16> to vector<16x1xbf16>
    %127 = vector.broadcast %126 : vector<16x1xbf16> to vector<16x128xbf16>
    %128 = arith.mulf %127, %1 : vector<16x128xbf16>
    %c0_35 = arith.constant 0 : index
    %c3968 = arith.constant 3968 : index
    %129 = vector.load %arg6[%c0_35, %c3968] : memref<16x8192xbf16, #tpu.memory_space<vmem>>, vector<16x128xbf16>
    tpu.vector_store %arg6[%c0_35, %c3968], %128 {strides = array<i32>} : memref<16x8192xbf16, #tpu.memory_space<vmem>>, vector<16x128xbf16>,
    %130 = vector.extract_strided_slice %0 {offsets = [0, 32], sizes = [16, 1], strides = [1, 1]} : vector<16x64xbf16> to vector<16x1xbf16>
    %131 = vector.broadcast %130 : vector<16x1xbf16> to vector<16x128xbf16>
    %132 = arith.mulf %131, %1 : vector<16x128xbf16>
    %c0_36 = arith.constant 0 : index
    %c4096 = arith.constant 4096 : index
    %133 = vector.load %arg6[%c0_36, %c4096] : memref<16x8192xbf16, #tpu.memory_space<vmem>>, vector<16x128xbf16>
    tpu.vector_store %arg6[%c0_36, %c4096], %132 {strides = array<i32>} : memref<16x8192xbf16, #tpu.memory_space<vmem>>, vector<16x128xbf16>,
    %134 = vector.extract_strided_slice %0 {offsets = [0, 33], sizes = [16, 1], strides = [1, 1]} : vector<16x64xbf16> to vector<16x1xbf16>
    %135 = vector.broadcast %134 : vector<16x1xbf16> to vector<16x128xbf16>
    %136 = arith.mulf %135, %1 : vector<16x128xbf16>
    %c0_37 = arith.constant 0 : index
    %c4224 = arith.constant 4224 : index
    %137 = vector.load %arg6[%c0_37, %c4224] : memref<16x8192xbf16, #tpu.memory_space<vmem>>, vector<16x128xbf16>
    tpu.vector_store %arg6[%c0_37, %c4224], %136 {strides = array<i32>} : memref<16x8192xbf16, #tpu.memory_space<vmem>>, vector<16x128xbf16>,
    %138 = vector.extract_strided_slice %0 {offsets = [0, 34], sizes = [16, 1], strides = [1, 1]} : vector<16x64xbf16> to vector<16x1xbf16>
    %139 = vector.broadcast %138 : vector<16x1xbf16> to vector<16x128xbf16>
    %140 = arith.mulf %139, %1 : vector<16x128xbf16>
    %c0_38 = arith.constant 0 : index
    %c4352 = arith.constant 4352 : index
    %141 = vector.load %arg6[%c0_38, %c4352] : memref<16x8192xbf16, #tpu.memory_space<vmem>>, vector<16x128xbf16>
    tpu.vector_store %arg6[%c0_38, %c4352], %140 {strides = array<i32>} : memref<16x8192xbf16, #tpu.memory_space<vmem>>, vector<16x128xbf16>,
    %142 = vector.extract_strided_slice %0 {offsets = [0, 35], sizes = [16, 1], strides = [1, 1]} : vector<16x64xbf16> to vector<16x1xbf16>
    %143 = vector.broadcast %142 : vector<16x1xbf16> to vector<16x128xbf16>
    %144 = arith.mulf %143, %1 : vector<16x128xbf16>
    %c0_39 = arith.constant 0 : index
    %c4480 = arith.constant 4480 : index
    %145 = vector.load %arg6[%c0_39, %c4480] : memref<16x8192xbf16, #tpu.memory_space<vmem>>, vector<16x128xbf16>
    tpu.vector_store %arg6[%c0_39, %c4480], %144 {strides = array<i32>} : memref<16x8192xbf16, #tpu.memory_space<vmem>>, vector<16x128xbf16>,
    %146 = vector.extract_strided_slice %0 {offsets = [0, 36], sizes = [16, 1], strides = [1, 1]} : vector<16x64xbf16> to vector<16x1xbf16>
    %147 = vector.broadcast %146 : vector<16x1xbf16> to vector<16x128xbf16>
    %148 = arith.mulf %147, %1 : vector<16x128xbf16>
    %c0_40 = arith.constant 0 : index
    %c4608 = arith.constant 4608 : index
    %149 = vector.load %arg6[%c0_40, %c4608] : memref<16x8192xbf16, #tpu.memory_space<vmem>>, vector<16x128xbf16>
    tpu.vector_store %arg6[%c0_40, %c4608], %148 {strides = array<i32>} : memref<16x8192xbf16, #tpu.memory_space<vmem>>, vector<16x128xbf16>,
    %150 = vector.extract_strided_slice %0 {offsets = [0, 37], sizes = [16, 1], strides = [1, 1]} : vector<16x64xbf16> to vector<16x1xbf16>
    %151 = vector.broadcast %150 : vector<16x1xbf16> to vector<16x128xbf16>
    %152 = arith.mulf %151, %1 : vector<16x128xbf16>
    %c0_41 = arith.constant 0 : index
    %c4736 = arith.constant 4736 : index
    %153 = vector.load %arg6[%c0_41, %c4736] : memref<16x8192xbf16, #tpu.memory_space<vmem>>, vector<16x128xbf16>
    tpu.vector_store %arg6[%c0_41, %c4736], %152 {strides = array<i32>} : memref<16x8192xbf16, #tpu.memory_space<vmem>>, vector<16x128xbf16>,
    %154 = vector.extract_strided_slice %0 {offsets = [0, 38], sizes = [16, 1], strides = [1, 1]} : vector<16x64xbf16> to vector<16x1xbf16>
    %155 = vector.broadcast %154 : vector<16x1xbf16> to vector<16x128xbf16>
    %156 = arith.mulf %155, %1 : vector<16x128xbf16>
    %c0_42 = arith.constant 0 : index
    %c4864 = arith.constant 4864 : index
    %157 = vector.load %arg6[%c0_42, %c4864] : memref<16x8192xbf16, #tpu.memory_space<vmem>>, vector<16x128xbf16>
    tpu.vector_store %arg6[%c0_42, %c4864], %156 {strides = array<i32>} : memref<16x8192xbf16, #tpu.memory_space<vmem>>, vector<16x128xbf16>,
    %158 = vector.extract_strided_slice %0 {offsets = [0, 39], sizes = [16, 1], strides = [1, 1]} : vector<16x64xbf16> to vector<16x1xbf16>
    %159 = vector.broadcast %158 : vector<16x1xbf16> to vector<16x128xbf16>
    %160 = arith.mulf %159, %1 : vector<16x128xbf16>
    %c0_43 = arith.constant 0 : index
    %c4992 = arith.constant 4992 : index
    %161 = vector.load %arg6[%c0_43, %c4992] : memref<16x8192xbf16, #tpu.memory_space<vmem>>, vector<16x128xbf16>
    tpu.vector_store %arg6[%c0_43, %c4992], %160 {strides = array<i32>} : memref<16x8192xbf16, #tpu.memory_space<vmem>>, vector<16x128xbf16>,
    %162 = vector.extract_strided_slice %0 {offsets = [0, 40], sizes = [16, 1], strides = [1, 1]} : vector<16x64xbf16> to vector<16x1xbf16>
    %163 = vector.broadcast %162 : vector<16x1xbf16> to vector<16x128xbf16>
    %164 = arith.mulf %163, %1 : vector<16x128xbf16>
    %c0_44 = arith.constant 0 : index
    %c5120 = arith.constant 5120 : index
    %165 = vector.load %arg6[%c0_44, %c5120] : memref<16x8192xbf16, #tpu.memory_space<vmem>>, vector<16x128xbf16>
    tpu.vector_store %arg6[%c0_44, %c5120], %164 {strides = array<i32>} : memref<16x8192xbf16, #tpu.memory_space<vmem>>, vector<16x128xbf16>,
    %166 = vector.extract_strided_slice %0 {offsets = [0, 41], sizes = [16, 1], strides = [1, 1]} : vector<16x64xbf16> to vector<16x1xbf16>
    %167 = vector.broadcast %166 : vector<16x1xbf16> to vector<16x128xbf16>
    %168 = arith.mulf %167, %1 : vector<16x128xbf16>
    %c0_45 = arith.constant 0 : index
    %c5248 = arith.constant 5248 : index
    %169 = vector.load %arg6[%c0_45, %c5248] : memref<16x8192xbf16, #tpu.memory_space<vmem>>, vector<16x128xbf16>
    tpu.vector_store %arg6[%c0_45, %c5248], %168 {strides = array<i32>} : memref<16x8192xbf16, #tpu.memory_space<vmem>>, vector<16x128xbf16>,
    %170 = vector.extract_strided_slice %0 {offsets = [0, 42], sizes = [16, 1], strides = [1, 1]} : vector<16x64xbf16> to vector<16x1xbf16>
    %171 = vector.broadcast %170 : vector<16x1xbf16> to vector<16x128xbf16>
    %172 = arith.mulf %171, %1 : vector<16x128xbf16>
    %c0_46 = arith.constant 0 : index
    %c5376 = arith.constant 5376 : index
    %173 = vector.load %arg6[%c0_46, %c5376] : memref<16x8192xbf16, #tpu.memory_space<vmem>>, vector<16x128xbf16>
    tpu.vector_store %arg6[%c0_46, %c5376], %172 {strides = array<i32>} : memref<16x8192xbf16, #tpu.memory_space<vmem>>, vector<16x128xbf16>,
    %174 = vector.extract_strided_slice %0 {offsets = [0, 43], sizes = [16, 1], strides = [1, 1]} : vector<16x64xbf16> to vector<16x1xbf16>
    %175 = vector.broadcast %174 : vector<16x1xbf16> to vector<16x128xbf16>
    %176 = arith.mulf %175, %1 : vector<16x128xbf16>
    %c0_47 = arith.constant 0 : index
    %c5504 = arith.constant 5504 : index
    %177 = vector.load %arg6[%c0_47, %c5504] : memref<16x8192xbf16, #tpu.memory_space<vmem>>, vector<16x128xbf16>
    tpu.vector_store %arg6[%c0_47, %c5504], %176 {strides = array<i32>} : memref<16x8192xbf16, #tpu.memory_space<vmem>>, vector<16x128xbf16>,
    %178 = vector.extract_strided_slice %0 {offsets = [0, 44], sizes = [16, 1], strides = [1, 1]} : vector<16x64xbf16> to vector<16x1xbf16>
    %179 = vector.broadcast %178 : vector<16x1xbf16> to vector<16x128xbf16>
    %180 = arith.mulf %179, %1 : vector<16x128xbf16>
    %c0_48 = arith.constant 0 : index
    %c5632 = arith.constant 5632 : index
    %181 = vector.load %arg6[%c0_48, %c5632] : memref<16x8192xbf16, #tpu.memory_space<vmem>>, vector<16x128xbf16>
    tpu.vector_store %arg6[%c0_48, %c5632], %180 {strides = array<i32>} : memref<16x8192xbf16, #tpu.memory_space<vmem>>, vector<16x128xbf16>,
    %182 = vector.extract_strided_slice %0 {offsets = [0, 45], sizes = [16, 1], strides = [1, 1]} : vector<16x64xbf16> to vector<16x1xbf16>
    %183 = vector.broadcast %182 : vector<16x1xbf16> to vector<16x128xbf16>
    %184 = arith.mulf %183, %1 : vector<16x128xbf16>
    %c0_49 = arith.constant 0 : index
    %c5760 = arith.constant 5760 : index
    %185 = vector.load %arg6[%c0_49, %c5760] : memref<16x8192xbf16, #tpu.memory_space<vmem>>, vector<16x128xbf16>
    tpu.vector_store %arg6[%c0_49, %c5760], %184 {strides = array<i32>} : memref<16x8192xbf16, #tpu.memory_space<vmem>>, vector<16x128xbf16>,
    %186 = vector.extract_strided_slice %0 {offsets = [0, 46], sizes = [16, 1], strides = [1, 1]} : vector<16x64xbf16> to vector<16x1xbf16>
    %187 = vector.broadcast %186 : vector<16x1xbf16> to vector<16x128xbf16>
    %188 = arith.mulf %187, %1 : vector<16x128xbf16>
    %c0_50 = arith.constant 0 : index
    %c5888 = arith.constant 5888 : index
    %189 = vector.load %arg6[%c0_50, %c5888] : memref<16x8192xbf16, #tpu.memory_space<vmem>>, vector<16x128xbf16>
    tpu.vector_store %arg6[%c0_50, %c5888], %188 {strides = array<i32>} : memref<16x8192xbf16, #tpu.memory_space<vmem>>, vector<16x128xbf16>,
    %190 = vector.extract_strided_slice %0 {offsets = [0, 47], sizes = [16, 1], strides = [1, 1]} : vector<16x64xbf16> to vector<16x1xbf16>
    %191 = vector.broadcast %190 : vector<16x1xbf16> to vector<16x128xbf16>
    %192 = arith.mulf %191, %1 : vector<16x128xbf16>
    %c0_51 = arith.constant 0 : index
    %c6016 = arith.constant 6016 : index
    %193 = vector.load %arg6[%c0_51, %c6016] : memref<16x8192xbf16, #tpu.memory_space<vmem>>, vector<16x128xbf16>
    tpu.vector_store %arg6[%c0_51, %c6016], %192 {strides = array<i32>} : memref<16x8192xbf16, #tpu.memory_space<vmem>>, vector<16x128xbf16>,
    %194 = vector.extract_strided_slice %0 {offsets = [0, 48], sizes = [16, 1], strides = [1, 1]} : vector<16x64xbf16> to vector<16x1xbf16>
    %195 = vector.broadcast %194 : vector<16x1xbf16> to vector<16x128xbf16>
    %196 = arith.mulf %195, %1 : vector<16x128xbf16>
    %c0_52 = arith.constant 0 : index
    %c6144 = arith.constant 6144 : index
    %197 = vector.load %arg6[%c0_52, %c6144] : memref<16x8192xbf16, #tpu.memory_space<vmem>>, vector<16x128xbf16>
    tpu.vector_store %arg6[%c0_52, %c6144], %196 {strides = array<i32>} : memref<16x8192xbf16, #tpu.memory_space<vmem>>, vector<16x128xbf16>,
    %198 = vector.extract_strided_slice %0 {offsets = [0, 49], sizes = [16, 1], strides = [1, 1]} : vector<16x64xbf16> to vector<16x1xbf16>
    %199 = vector.broadcast %198 : vector<16x1xbf16> to vector<16x128xbf16>
    %200 = arith.mulf %199, %1 : vector<16x128xbf16>
    %c0_53 = arith.constant 0 : index
    %c6272 = arith.constant 6272 : index
    %201 = vector.load %arg6[%c0_53, %c6272] : memref<16x8192xbf16, #tpu.memory_space<vmem>>, vector<16x128xbf16>
    tpu.vector_store %arg6[%c0_53, %c6272], %200 {strides = array<i32>} : memref<16x8192xbf16, #tpu.memory_space<vmem>>, vector<16x128xbf16>,
    %202 = vector.extract_strided_slice %0 {offsets = [0, 50], sizes = [16, 1], strides = [1, 1]} : vector<16x64xbf16> to vector<16x1xbf16>
    %203 = vector.broadcast %202 : vector<16x1xbf16> to vector<16x128xbf16>
    %204 = arith.mulf %203, %1 : vector<16x128xbf16>
    %c0_54 = arith.constant 0 : index
    %c6400 = arith.constant 6400 : index
    %205 = vector.load %arg6[%c0_54, %c6400] : memref<16x8192xbf16, #tpu.memory_space<vmem>>, vector<16x128xbf16>
    tpu.vector_store %arg6[%c0_54, %c6400], %204 {strides = array<i32>} : memref<16x8192xbf16, #tpu.memory_space<vmem>>, vector<16x128xbf16>,
    %206 = vector.extract_strided_slice %0 {offsets = [0, 51], sizes = [16, 1], strides = [1, 1]} : vector<16x64xbf16> to vector<16x1xbf16>
    %207 = vector.broadcast %206 : vector<16x1xbf16> to vector<16x128xbf16>
    %208 = arith.mulf %207, %1 : vector<16x128xbf16>
    %c0_55 = arith.constant 0 : index
    %c6528 = arith.constant 6528 : index
    %209 = vector.load %arg6[%c0_55, %c6528] : memref<16x8192xbf16, #tpu.memory_space<vmem>>, vector<16x128xbf16>
    tpu.vector_store %arg6[%c0_55, %c6528], %208 {strides = array<i32>} : memref<16x8192xbf16, #tpu.memory_space<vmem>>, vector<16x128xbf16>,
    %210 = vector.extract_strided_slice %0 {offsets = [0, 52], sizes = [16, 1], strides = [1, 1]} : vector<16x64xbf16> to vector<16x1xbf16>
    %211 = vector.broadcast %210 : vector<16x1xbf16> to vector<16x128xbf16>
    %212 = arith.mulf %211, %1 : vector<16x128xbf16>
    %c0_56 = arith.constant 0 : index
    %c6656 = arith.constant 6656 : index
    %213 = vector.load %arg6[%c0_56, %c6656] : memref<16x8192xbf16, #tpu.memory_space<vmem>>, vector<16x128xbf16>
    tpu.vector_store %arg6[%c0_56, %c6656], %212 {strides = array<i32>} : memref<16x8192xbf16, #tpu.memory_space<vmem>>, vector<16x128xbf16>,
    %214 = vector.extract_strided_slice %0 {offsets = [0, 53], sizes = [16, 1], strides = [1, 1]} : vector<16x64xbf16> to vector<16x1xbf16>
    %215 = vector.broadcast %214 : vector<16x1xbf16> to vector<16x128xbf16>
    %216 = arith.mulf %215, %1 : vector<16x128xbf16>
    %c0_57 = arith.constant 0 : index
    %c6784 = arith.constant 6784 : index
    %217 = vector.load %arg6[%c0_57, %c6784] : memref<16x8192xbf16, #tpu.memory_space<vmem>>, vector<16x128xbf16>
    tpu.vector_store %arg6[%c0_57, %c6784], %216 {strides = array<i32>} : memref<16x8192xbf16, #tpu.memory_space<vmem>>, vector<16x128xbf16>,
    %218 = vector.extract_strided_slice %0 {offsets = [0, 54], sizes = [16, 1], strides = [1, 1]} : vector<16x64xbf16> to vector<16x1xbf16>
    %219 = vector.broadcast %218 : vector<16x1xbf16> to vector<16x128xbf16>
    %220 = arith.mulf %219, %1 : vector<16x128xbf16>
    %c0_58 = arith.constant 0 : index
    %c6912 = arith.constant 6912 : index
    %221 = vector.load %arg6[%c0_58, %c6912] : memref<16x8192xbf16, #tpu.memory_space<vmem>>, vector<16x128xbf16>
    tpu.vector_store %arg6[%c0_58, %c6912], %220 {strides = array<i32>} : memref<16x8192xbf16, #tpu.memory_space<vmem>>, vector<16x128xbf16>,
    %222 = vector.extract_strided_slice %0 {offsets = [0, 55], sizes = [16, 1], strides = [1, 1]} : vector<16x64xbf16> to vector<16x1xbf16>
    %223 = vector.broadcast %222 : vector<16x1xbf16> to vector<16x128xbf16>
    %224 = arith.mulf %223, %1 : vector<16x128xbf16>
    %c0_59 = arith.constant 0 : index
    %c7040 = arith.constant 7040 : index
    %225 = vector.load %arg6[%c0_59, %c7040] : memref<16x8192xbf16, #tpu.memory_space<vmem>>, vector<16x128xbf16>
    tpu.vector_store %arg6[%c0_59, %c7040], %224 {strides = array<i32>} : memref<16x8192xbf16, #tpu.memory_space<vmem>>, vector<16x128xbf16>,
    %226 = vector.extract_strided_slice %0 {offsets = [0, 56], sizes = [16, 1], strides = [1, 1]} : vector<16x64xbf16> to vector<16x1xbf16>
    %227 = vector.broadcast %226 : vector<16x1xbf16> to vector<16x128xbf16>
    %228 = arith.mulf %227, %1 : vector<16x128xbf16>
    %c0_60 = arith.constant 0 : index
    %c7168 = arith.constant 7168 : index
    %229 = vector.load %arg6[%c0_60, %c7168] : memref<16x8192xbf16, #tpu.memory_space<vmem>>, vector<16x128xbf16>
    tpu.vector_store %arg6[%c0_60, %c7168], %228 {strides = array<i32>} : memref<16x8192xbf16, #tpu.memory_space<vmem>>, vector<16x128xbf16>,
    %230 = vector.extract_strided_slice %0 {offsets = [0, 57], sizes = [16, 1], strides = [1, 1]} : vector<16x64xbf16> to vector<16x1xbf16>
    %231 = vector.broadcast %230 : vector<16x1xbf16> to vector<16x128xbf16>
    %232 = arith.mulf %231, %1 : vector<16x128xbf16>
    %c0_61 = arith.constant 0 : index
    %c7296 = arith.constant 7296 : index
    %233 = vector.load %arg6[%c0_61, %c7296] : memref<16x8192xbf16, #tpu.memory_space<vmem>>, vector<16x128xbf16>
    tpu.vector_store %arg6[%c0_61, %c7296], %232 {strides = array<i32>} : memref<16x8192xbf16, #tpu.memory_space<vmem>>, vector<16x128xbf16>,
    %234 = vector.extract_strided_slice %0 {offsets = [0, 58], sizes = [16, 1], strides = [1, 1]} : vector<16x64xbf16> to vector<16x1xbf16>
    %235 = vector.broadcast %234 : vector<16x1xbf16> to vector<16x128xbf16>
    %236 = arith.mulf %235, %1 : vector<16x128xbf16>
    %c0_62 = arith.constant 0 : index
    %c7424 = arith.constant 7424 : index
    %237 = vector.load %arg6[%c0_62, %c7424] : memref<16x8192xbf16, #tpu.memory_space<vmem>>, vector<16x128xbf16>
    tpu.vector_store %arg6[%c0_62, %c7424], %236 {strides = array<i32>} : memref<16x8192xbf16, #tpu.memory_space<vmem>>, vector<16x128xbf16>,
    %238 = vector.extract_strided_slice %0 {offsets = [0, 59], sizes = [16, 1], strides = [1, 1]} : vector<16x64xbf16> to vector<16x1xbf16>
    %239 = vector.broadcast %238 : vector<16x1xbf16> to vector<16x128xbf16>
    %240 = arith.mulf %239, %1 : vector<16x128xbf16>
    %c0_63 = arith.constant 0 : index
    %c7552 = arith.constant 7552 : index
    %241 = vector.load %arg6[%c0_63, %c7552] : memref<16x8192xbf16, #tpu.memory_space<vmem>>, vector<16x128xbf16>
    tpu.vector_store %arg6[%c0_63, %c7552], %240 {strides = array<i32>} : memref<16x8192xbf16, #tpu.memory_space<vmem>>, vector<16x128xbf16>,
    %242 = vector.extract_strided_slice %0 {offsets = [0, 60], sizes = [16, 1], strides = [1, 1]} : vector<16x64xbf16> to vector<16x1xbf16>
    %243 = vector.broadcast %242 : vector<16x1xbf16> to vector<16x128xbf16>
    %244 = arith.mulf %243, %1 : vector<16x128xbf16>
    %c0_64 = arith.constant 0 : index
    %c7680 = arith.constant 7680 : index
    %245 = vector.load %arg6[%c0_64, %c7680] : memref<16x8192xbf16, #tpu.memory_space<vmem>>, vector<16x128xbf16>
    tpu.vector_store %arg6[%c0_64, %c7680], %244 {strides = array<i32>} : memref<16x8192xbf16, #tpu.memory_space<vmem>>, vector<16x128xbf16>,
    %246 = vector.extract_strided_slice %0 {offsets = [0, 61], sizes = [16, 1], strides = [1, 1]} : vector<16x64xbf16> to vector<16x1xbf16>
    %247 = vector.broadcast %246 : vector<16x1xbf16> to vector<16x128xbf16>
    %248 = arith.mulf %247, %1 : vector<16x128xbf16>
    %c0_65 = arith.constant 0 : index
    %c7808 = arith.constant 7808 : index
    %249 = vector.load %arg6[%c0_65, %c7808] : memref<16x8192xbf16, #tpu.memory_space<vmem>>, vector<16x128xbf16>
    tpu.vector_store %arg6[%c0_65, %c7808], %248 {strides = array<i32>} : memref<16x8192xbf16, #tpu.memory_space<vmem>>, vector<16x128xbf16>,
    %250 = vector.extract_strided_slice %0 {offsets = [0, 62], sizes = [16, 1], strides = [1, 1]} : vector<16x64xbf16> to vector<16x1xbf16>
    %251 = vector.broadcast %250 : vector<16x1xbf16> to vector<16x128xbf16>
    %252 = arith.mulf %251, %1 : vector<16x128xbf16>
    %c0_66 = arith.constant 0 : index
    %c7936 = arith.constant 7936 : index
    %253 = vector.load %arg6[%c0_66, %c7936] : memref<16x8192xbf16, #tpu.memory_space<vmem>>, vector<16x128xbf16>
    tpu.vector_store %arg6[%c0_66, %c7936], %252 {strides = array<i32>} : memref<16x8192xbf16, #tpu.memory_space<vmem>>, vector<16x128xbf16>,
    %254 = vector.extract_strided_slice %0 {offsets = [0, 63], sizes = [16, 1], strides = [1, 1]} : vector<16x64xbf16> to vector<16x1xbf16>
    %255 = vector.broadcast %254 : vector<16x1xbf16> to vector<16x128xbf16>
    %256 = arith.mulf %255, %1 : vector<16x128xbf16>
    %c0_67 = arith.constant 0 : index
    %c8064 = arith.constant 8064 : index
    %257 = vector.load %arg6[%c0_67, %c8064] : memref<16x8192xbf16, #tpu.memory_space<vmem>>, vector<16x128xbf16>
    tpu.vector_store %arg6[%c0_67, %c8064], %256 {strides = array<i32>} : memref<16x8192xbf16, #tpu.memory_space<vmem>>, vector<16x128xbf16>,
    %c0_68 = arith.constant 0 : index
    %c0_69 = arith.constant 0 : index
    %258 = vector.load %arg6[%c0_68, %c0_69] : memref<16x8192xbf16, #tpu.memory_space<vmem>>, vector<16x8192xbf16>
    %c0_70 = arith.constant 0 : index
    %c0_71 = arith.constant 0 : index
    %259 = vector.load %arg3[%c0_70, %c0_71] : memref<8192x64xbf16, #tpu.memory_space<vmem>>, vector<8192x64xbf16>
    %cst = arith.constant dense<0.000000e+00> : vector<16x64xf32>
    %260 = tpu.matmul %258, %259, %cst {dimension_numbers = #tpu.dot_dimension_numbers<[1], [0], [0], [1], [0, 0, 1, 1], [], []>} : vector<16x8192xbf16>, vector<8192x64xbf16>, vector<16x64xf32> -> vector<16x64xf32>
    %c0_72 = arith.constant 0 : index
    %c0_73 = arith.constant 0 : index
    %261 = vector.load %arg4[%c0_72, %c0_73] : memref<64x64xbf16, #tpu.memory_space<vmem>>, vector<64x64xbf16>
    %cst_74 = arith.constant dense<0.000000e+00> : vector<16x64xf32>
    %262 = tpu.matmul %0, %261, %cst_74 {dimension_numbers = #tpu.dot_dimension_numbers<[1], [0], [0], [1], [0, 0, 1, 1], [], []>} : vector<16x64xbf16>, vector<64x64xbf16>, vector<16x64xf32> -> vector<16x64xf32>
    %263 = arith.addf %260, %262 : vector<16x64xf32>
    %c0_75 = arith.constant 0 : index
    %c0_76 = arith.constant 0 : index
    %264 = vector.load %arg5[%c0_75, %c0_76] : memref<16x64xf32, #tpu.memory_space<vmem>>, vector<16x64xf32>
    tpu.vector_store %arg5[%c0_75, %c0_76], %263 {strides = array<i32>} : memref<16x64xf32, #tpu.memory_space<vmem>>, vector<16x64xf32>,
    return
  }
  func.func @transform_0(%arg0: i32) -> (i32, i32) {
    %c0_i32 = arith.constant 0 : i32
    %c0_i32_0 = arith.constant 0 : i32
    return %arg0, %c0_i32 : i32, i32
  }
  func.func @transform_1(%arg0: i32) -> (i32, i32) {
    %c0_i32 = arith.constant 0 : i32
    %c0_i32_0 = arith.constant 0 : i32
    return %arg0, %c0_i32 : i32, i32
  }
  func.func @transform_2(%arg0: i32) -> (i32, i32) {
    %c0_i32 = arith.constant 0 : i32
    %c0_i32_0 = arith.constant 0 : i32
    %c0_i32_1 = arith.constant 0 : i32
    return %c0_i32, %c0_i32_0 : i32, i32
  }
  func.func @transform_3(%arg0: i32) -> (i32, i32) {
    %c0_i32 = arith.constant 0 : i32
    %c0_i32_0 = arith.constant 0 : i32
    %c0_i32_1 = arith.constant 0 : i32
    return %c0_i32, %c0_i32_0 : i32, i32
  }
  func.func @transform_4(%arg0: i32) -> (i32, i32) {
    %c0_i32 = arith.constant 0 : i32
    %c0_i32_0 = arith.constant 0 : i32
    return %arg0, %c0_i32 : i32, i32
  }
}

module attributes {stable_mosaic.version = 11 : i64} {
  func.func @_nnconv_update_kernel(%arg0: i32, %arg1: memref<16x64xf32, #tpu.memory_space<vmem>>, %arg2: memref<16x1xf32, #tpu.memory_space<vmem>>, %arg3: memref<16x64xbf16, #tpu.memory_space<vmem>>, %arg4: memref<64x64xbf16, #tpu.memory_space<vmem>>, %arg5: memref<1x64xf32, #tpu.memory_space<vmem>>, %arg6: memref<16x64xf32, #tpu.memory_space<vmem>>) attributes {dimension_semantics = [#tpu.dimension_semantics<parallel>], iteration_bounds = array<i64: 1>, scalar_prefetch = 0 : i64, scratch_operands = 0 : i64, tpu.core_type = #tpu.core_type<tc>, window_params = [{transform_indices = @transform_0, window_bounds = array<i64: 16, 64>}, {transform_indices = @transform_1, window_bounds = array<i64: 16, 1>}, {transform_indices = @transform_2, window_bounds = array<i64: 16, 64>}, {pipeline_mode = #tpu.pipeline_mode<synchronous>, transform_indices = @transform_3, window_bounds = array<i64: 64, 64>}, {pipeline_mode = #tpu.pipeline_mode<synchronous>, transform_indices = @transform_4, window_bounds = array<i64: 1, 64>}, {transform_indices = @transform_5, window_bounds = array<i64: 16, 64>}]} {
    %c0 = arith.constant 0 : index
    %c0_0 = arith.constant 0 : index
    %0 = vector.load %arg3[%c0, %c0_0] : memref<16x64xbf16, #tpu.memory_space<vmem>>, vector<16x64xbf16>
    %c0_1 = arith.constant 0 : index
    %c0_2 = arith.constant 0 : index
    %1 = vector.load %arg4[%c0_1, %c0_2] : memref<64x64xbf16, #tpu.memory_space<vmem>>, vector<64x64xbf16>
    %cst = arith.constant dense<0.000000e+00> : vector<16x64xf32>
    %2 = tpu.matmul %0, %1, %cst {dimension_numbers = #tpu.dot_dimension_numbers<[1], [0], [0], [1], [0, 0, 1, 1], [], []>} : vector<16x64xbf16>, vector<64x64xbf16>, vector<16x64xf32> -> vector<16x64xf32>
    %c0_3 = arith.constant 0 : index
    %c0_4 = arith.constant 0 : index
    %3 = vector.load %arg1[%c0_3, %c0_4] : memref<16x64xf32, #tpu.memory_space<vmem>>, vector<16x64xf32>
    %c0_5 = arith.constant 0 : index
    %c0_6 = arith.constant 0 : index
    %4 = vector.load %arg2[%c0_5, %c0_6] : memref<16x1xf32, #tpu.memory_space<vmem>>, vector<16x1xf32>
    %5 = vector.broadcast %4 : vector<16x1xf32> to vector<16x64xf32>
    %6 = arith.mulf %3, %5 : vector<16x64xf32>
    %7 = arith.addf %6, %2 : vector<16x64xf32>
    %c0_7 = arith.constant 0 : index
    %c0_8 = arith.constant 0 : index
    %8 = vector.load %arg5[%c0_7, %c0_8] : memref<1x64xf32, #tpu.memory_space<vmem>>, vector<1x64xf32>
    %9 = vector.broadcast %8 : vector<1x64xf32> to vector<16x64xf32>
    %10 = arith.addf %7, %9 : vector<16x64xf32>
    %cst_9 = arith.constant 0.000000e+00 : f32
    %11 = vector.broadcast %cst_9 : f32 to vector<16x64xf32>
    %12 = arith.maximumf %10, %11 : vector<16x64xf32>
    %c0_10 = arith.constant 0 : index
    %c0_11 = arith.constant 0 : index
    %13 = vector.load %arg6[%c0_10, %c0_11] : memref<16x64xf32, #tpu.memory_space<vmem>>, vector<16x64xf32>
    tpu.vector_store %arg6[%c0_10, %c0_11], %12 {strides = array<i32>} : memref<16x64xf32, #tpu.memory_space<vmem>>, vector<16x64xf32>,
    return
  }
  func.func @transform_0(%arg0: i32) -> (i32, i32) {
    %c0_i32 = arith.constant 0 : i32
    %c0_i32_0 = arith.constant 0 : i32
    return %arg0, %c0_i32 : i32, i32
  }
  func.func @transform_1(%arg0: i32) -> (i32, i32) {
    %c0_i32 = arith.constant 0 : i32
    %c0_i32_0 = arith.constant 0 : i32
    return %arg0, %c0_i32 : i32, i32
  }
  func.func @transform_2(%arg0: i32) -> (i32, i32) {
    %c0_i32 = arith.constant 0 : i32
    %c0_i32_0 = arith.constant 0 : i32
    return %arg0, %c0_i32 : i32, i32
  }
  func.func @transform_3(%arg0: i32) -> (i32, i32) {
    %c0_i32 = arith.constant 0 : i32
    %c0_i32_0 = arith.constant 0 : i32
    %c0_i32_1 = arith.constant 0 : i32
    return %c0_i32, %c0_i32_0 : i32, i32
  }
  func.func @transform_4(%arg0: i32) -> (i32, i32) {
    %c0_i32 = arith.constant 0 : i32
    %c0_i32_0 = arith.constant 0 : i32
    %c0_i32_1 = arith.constant 0 : i32
    return %c0_i32, %c0_i32_0 : i32, i32
  }
  func.func @transform_5(%arg0: i32) -> (i32, i32) {
    %c0_i32 = arith.constant 0 : i32
    %c0_i32_0 = arith.constant 0 : i32
    return %arg0, %c0_i32 : i32, i32
  }
}

</mosaic_0001>

<bundles_post_ra>
// kernel: net_forward.8
= control target key start
LH: loop header
LB: loop body
LE: loop exit
PB: predicated region body
PF: predicated region fallthrough
CT: control target
= control target key end

     0   :  { %vm32_vm0 = vcmask 1042432   ;;  %vm25_vm1 = vcmask 89088   ;;  %vm113_vm2 = vcmask 523264   ;;  %s176_s1 = inlined_call_operand.vmem [shape: f32[11,64], index: 1, kind: input, shape index: {}]   ;;  %s177_s0 = inlined_call_operand.vmem [shape: f32[16,11], index: 0, kind: input, shape index: {}]   ;;  %s178_s2 = inlined_call_operand.vmem [shape: f32[1,64], index: 2, kind: input, shape index: {}]   ;;  %s179_s3 = inlined_call_operand.vmem [shape: f32[16,64], index: 3, kind: output, shape index: {}]  }
   0x1   :  { %v17_v0 = vld [vmem:[%s176_s1 + $0x8] sm:$0x7]  ;;  %v16_v1 = vld [vmem:[%s176_s1] sm:$0xff] }
   0x2   :  { %v14_v2 = vld [vmem:[%s177_s0] sm:$0xff]  ;;  %128 = vmatprep.subr.msk.mxu0 %vm32_vm0, %v17_v0  ;;  %v15_v3 = vld [vmem:[%s177_s0 + $0x8] sm:$0xff] }
   0x3   :  { %132 = vmatprep.mubr.msk.f32.mxu0 %vm25_vm1, %v14_v2  ;;  %129 = vmatpush3.msk.msra.mxu0 %vm32_vm0, %v17_v0  ;;  %v120_v4 = vld [vmem:[%s178_s2] ss:$0 sm:$0xff] }
   0x4   :  { %130 = vmatprep.subr.mxu0 %v16_v1 }
   0x5   :  { %131 = vmatpush3.msra.mxu0 %v16_v1 }
   0x6   :  { %133 = vmatmul.mubr.msk.f32.vlgmr.msra.gmra.mxu0 %vm25_vm1, %v15_v3 }
  0xc6   :  { %v134_v5 = vpop.f32.mrf.mxu0 }
  0xc7   :  { %v108_v6 = vadd.f32 %v134_v5, %v120_v4 }
  0xc8   :  { %v102_v7 = vpop.f32.mrf.mxu0 }
  0xc9   :  { %v112_v8 = vmax.f32 %v108_v6, 0.0  ;;  %v103_v9 = vadd.f32 %v120_v4, %v102_v7 }
  0xcb   :  { %115 = vst.msk [vmem:[%s179_s3 + $0x8] sm:$0xff] %vm113_vm2, %v112_v8  ;;  %v111_v10 = vmax.f32 %v103_v9, 0.0 }
  0xcd   :  { %114 = vst.msk [vmem:[%s179_s3] sm:$0xff] %vm113_vm2, %v111_v10 }

// kernel: net_forward.9
= control target key start
LH: loop header
LB: loop body
LE: loop exit
PB: predicated region body
PF: predicated region fallthrough
CT: control target
= control target key end

     0   :  { %s406_s12 = smov 0   ;;  %s429_s0 = inlined_call_operand.vmem [shape: f32[32,4], index: 0, kind: input, shape index: {}]   ;;  %s430_s1 = inlined_call_operand.vmem [shape: f32[4,128], index: 1, kind: input, shape index: {}]   ;;  %s431_s2 = inlined_call_operand.vmem [shape: f32[1,128], index: 2, kind: input, shape index: {}]   ;;  %s432_s3 = inlined_call_operand.vmem [shape: bf16[32,128], index: 3, kind: output, shape index: {}]  }
   0x1 LB: > { %s338_s13 = sadd.s32 4294967295, %s384_s12   ;;  %p342_p0 = scmp.ge.s32.totalorder %s384_s12, 1  ;;  %s384_s12 = sphi %s406_s12, %s13_s12  }
   0x2   : > { %p138_p1 = scmp.lt.s32.totalorder %s384_s12, 3 }
   0x4   : > { %p139_p2 = pnand %p342_p0, %p138_p1 }
   0x5   : > { %s343_s16 = sshll.u32 (!%p139_p2), %s338_s13, 1 }
   0x6   : > { %142 = sbr.rel (%p139_p2) target bundleno = 218 (0xda), region = 32  ;;  %p163_p3 = scmp.lt.s32.totalorder (!%p139_p2), %s343_s16, 3 }
   0xb   : > { %v176_v0 = vld [vmem:[%s430_s1] sm:$0xf]  ;;  %vm191_vm0 = vcmask 1043456   ;;  %s434_s16 = smov (!%p163_p3, %s343_s16), 3  ;;  %vm184_vm1 = vcmask 31744  }
   0xc   : > { %365 = vmatprep.subr.msk.mxu0 %vm191_vm0, %v176_v0  ;;  %s344_s17 = sshll.u32 %s434_s16, 3  ;;  %v347_v3 = vld [vmem:[%s431_s2] ss:$0 sm:$0xff]  ;;  %s346_s23 = sshll.u32 %s434_s16, 2 }
   0xd   : > { %366 = vmatpush3.msk.msra.mxu0 %vm191_vm0, %v176_v0  ;;  %s166_s20 = scalar_lea.vmem %s429_s0, %s344_s17  ;;  %s172_s26 = scalar_lea.vmem %s432_s3, %s346_s23 }
   0xe   : > { %v174_v1 = vld [vmem:[%s166_s20] sm:$0xff]  ;;  %v175_v2 = vld [vmem:[%s166_s20 + $0x8] sm:$0xff] }
   0xf   : > { %367 = vmatprep.mubr.msk.f32.mxu0 %vm184_vm1, %v174_v1 }
  0x10   : > { %368 = vmatmul.mubr.msk.f32.vlgmr.msra.gmra.mxu0 %vm184_vm1, %v175_v2 }
  0xd0   : > { %v369_v4 = vpop.f32.mrf.mxu0 }
  0xd1   : > { %v267_v5 = vadd.f32 %v369_v4, %v347_v3 }
  0xd2   : > { %v261_v6 = vpop.f32.mrf.mxu0 }
  0xd3   : > { %v262_v7 = vadd.f32 %v347_v3, %v261_v6  ;;  %v271_v8 = vmax.f32 %v267_v5, 0.0 }
  0xd5   : > { %v270_v9 = vmax.f32 %v262_v7, 0.0 }
  0xd7   : > { %v360_v10 = vpack.c.bf16 %v271_v8, %v270_v9 }
  0xd9   : > { %361 = vst [vmem:[%s172_s26] sm:$0xff] %v360_v10  }
  0xda PF: > { %s13_s12 = sadd.s32 1, %s384_s12  }
  0xdb   : > { %p10_p4 = scmp.ge.s32.totalorder %s13_s12, 4  }
  0xdd   :  { %12 = sbr.rel (!%p10_p4) target bundleno = 1 (0x1), region = 62 }

// kernel: net_forward.11
= control target key start
LH: loop header
LB: loop body
LE: loop exit
PB: predicated region body
PF: predicated region fallthrough
CT: control target
= control target key end

     0   :  { %v173_v0 = vmov 0.0   ;;  %vm174_vm0 = vmmov 0   ;;  %v175_v2 = vmov 0   ;;  %vm60_vm1 = vcmask 523264   ;;  %s245_s3 = inlined_call_operand.vmem [shape: bf16[64,64], index: 3, kind: input, shape index: {}]   ;;  %s246_s1 = inlined_call_operand.vmem [shape: f32[16,1], index: 1, kind: input, shape index: {}]   ;;  %s247_s2 = inlined_call_operand.vmem [shape: bf16[16,64], index: 2, kind: input, shape index: {}]   ;;  %s248_s0 = inlined_call_operand.vmem [shape: f32[16,64], index: 0, kind: input, shape index: {}]   ;;  %s249_s4 = inlined_call_operand.vmem [shape: f32[1,64], index: 4, kind: input, shape index: {}]   ;;  %s250_s5 = inlined_call_operand.vmem [shape: f32[16,64], index: 5, kind: output, shape index: {}]  }
   0x1   :  { %152 = vmatprep.subr.bf16.mxu0 %v173_v0  ;;  %v168_v1 = vld [vmem:[%s245_s3 + $0x18] sm:$0xff]   ;;  %160 = vmatprep.mubr.msk.bf16.mxu0 %vm174_vm0, %v173_v0  ;;  %v169_v3 = vld [vmem:[%s245_s3 + $0x10] sm:$0xff]   ;;  %v107_v4 = vld [vmem:[%s246_s1] sm:$0xff] }
   0x2   :  { %167 = vset.pattern.permute.xlu0 %v175_v2  ;;  %153 = vmatpush3.bf16.msra.mxu0 %v168_v1  ;;  %v170_v5 = vld [vmem:[%s245_s3 + $0x8] sm:$0xff]   ;;  %v171_v7 = vld [vmem:[%s245_s3] sm:$0xff]  }
   0x3   :  { %154 = vmatprep.subr.bf16.mxu0 %v173_v0  ;;  %111 = vperm.xlu0 %167, %v107_v4   ;;  %v108_v6 = vld [vmem:[%s246_s1 + $0x8] sm:$0xff]  ;;  %v172_v8 = vld [vmem:[%s247_s2] sm:$0xff]  }
   0x4   :  { %v105_v10 = vld [vmem:[%s248_s0] sm:$0xff]  ;;  %v106_v13 = vld [vmem:[%s248_s0 + $0x8] sm:$0xff] }
   0x5   :  { %v146_v15 = vld [vmem:[%s249_s4] ss:$0 sm:$0xff] }
   0x6   :  { %155 = vmatpush3.bf16.msra.mxu0 %v169_v3 }
   0x7   :  { %156 = vmatprep.subr.bf16.mxu0 %v173_v0  ;;  %116 = vperm.xlu0 %167, %v108_v6  }
   0xa   :  { %157 = vmatpush3.bf16.msra.mxu0 %v170_v5 }
   0xb   :  { %158 = vmatprep.subr.bf16.mxu0 %v173_v0 }
   0xe   :  { %159 = vmatpush3.bf16.msra.mxu0 %v171_v7 }
  0x11   :  { %161 = vmatmul.mubr.msk.bf16.vlgmr.msra.gmra.mxu0 %vm60_vm1, %v172_v8 }
  0x7e   :  { %v112_v9 = vpop.permute.xlu0 %111 }
  0x7f   :  { %v119_v11 = vmul.f32 %v112_v9, %v105_v10 }
  0x82   :  { %v117_v12 = vpop.permute.xlu0 %116 }
  0x83   :  { %v120_v18 = vmul.f32 %v117_v12, %v106_v13 }
  0xd1   :  { %v98_v14 = vpop.f32.mrf.mxu0 }
  0xd2   :  { %v121_v16 = vadd.f32 %v119_v11, %v98_v14 }
  0xd3   :  { %v162_v17 = vpop.f32.mrf.mxu0 }
  0xd4   :  { %v130_v19 = vadd.f32 %v146_v15, %v121_v16 }
  0xd5   :  { %v101_v20 = vpop.f32.mrf.mxu0 }
  0xd6   :  { %v132_v21 = vmax.f32 %v130_v19, 0.0  ;;  %v122_v22 = vadd.f32 %v120_v18, %v101_v20 }
  0xd7   :  { %v163_v23 = vpop.f32.mrf.mxu0 }
  0xd8   :  { %134 = vst.msk [vmem:[%s250_s5] sm:$0xff] %vm60_vm1, %v132_v21  ;;  %v131_v24 = vadd.f32 %v146_v15, %v122_v22 }
  0xda   :  { %v133_v25 = vmax.f32 %v131_v24, 0.0 }
  0xdc   :  { %135 = vst.msk [vmem:[%s250_s5 + $0x8] sm:$0xff] %vm60_vm1, %v133_v25 }

// kernel: net_forward.10
= control target key start
LH: loop header
LB: loop body
LE: loop exit
PB: predicated region body
PF: predicated region fallthrough
CT: control target
= control target key end

     0   :  { %s9968_s15 = smov 0   ;;  %s12599_s0 = inlined_call_operand.vmem [shape: bf16[32,64], index: 0, kind: input, shape index: {}]   ;;  %s12600_s1 = inlined_call_operand.vmem [shape: bf16[32,128], index: 1, kind: input, shape index: {}]   ;;  %s12601_s2 = inlined_call_operand.vmem [shape: bf16[8192,64], index: 2, kind: input, shape index: {}]   ;;  %s12602_s3 = inlined_call_operand.vmem [shape: bf16[64,64], index: 3, kind: input, shape index: {}]   ;;  %s12603_s4 = inlined_call_operand.vmem [shape: f32[32,64], index: 4, kind: output, shape index: {}]  }
   0x1 LB: > { %s7838_s16 = sadd.s32 4294967295, %s9874_s15   ;;  %p7842_p0 = scmp.ge.s32.totalorder %s9874_s15, 1  ;;  %s9874_s15 = sphi %s9968_s15, %s14_s15  }
   0x2   : > { %p174_p1 = scmp.lt.s32.totalorder %s9874_s15, 3 }
   0x4   : > { %p175_p2 = pnand %p7842_p0, %p174_p1 }
   0x6   : > { %178 = sbr.rel (%p175_p2) target bundleno = 856 (0x358), region = 36 }
   0xb   : > { %s7843_s17 = sshll.u32 %s7838_s16, 1  ;;  %v9876_v0 = vmov 1   ;;  %v9877_v1 = vmov 0   ;;  %v9335_v2 = vld [vmem:[%s12602_s3 + $0x18] sm:$0xff]   ;;  %v9878_v3 = vmov 0.0   ;;  %v9336_v4 = vld [vmem:[%s12602_s3 + $0x10] sm:$0xff]  }
   0xc   : > { %9230 = vset.pattern.permute.xlu1 %v9876_v0  ;;  %9229 = vset.pattern.permute.xlu0 %v9877_v1  ;;  %p206_p3 = scmp.lt.s32.totalorder %s7843_s17, 3  ;;  %v9338_v5 = vld [vmem:[%s12601_s2 + $0x78] sm:$0xff]   ;;  %v9337_v7 = vld [vmem:[%s12602_s3 + $0x8] sm:$0xff]   ;;  %v9341_v10 = vld [vmem:[%s12601_s2 + $0x70] sm:$0xff]   ;;  %vm9879_vm0 = vmmov 0   ;;  %v9880_v16 = vmov 2  }
   0xd   : > { %9142 = vmatprep.subr.bf16.mxu0 %v9878_v3  ;;  %v9339_v8 = vld [vmem:[%s12601_s2 + $0x38] sm:$0xff]   ;;  %8438 = vmatprep.subr.bf16.mxu1 %v9338_v5  ;;  %v9343_v11 = vld [vmem:[%s12601_s2 + $0x30] sm:$0xff]   ;;  %v9344_v12 = vld [vmem:[%s12601_s2 + $0x68] sm:$0xff]   ;;  %vm3019_vm1 = vcmask 523264   ;;  %v9881_v22 = vmov 3   ;;  %v9882_v28 = vmov 4  }
   0xe   : > { %s12677_s17 = smov (!%p206_p3, %s7843_s17), 3  ;;  %9143 = vmatpush3.bf16.msra.mxu0 %v9335_v2  ;;  %8439 = vmatpush3.bf16.msra.mxu1 %v9339_v8  ;;  %v9340_v13 = vld [vmem:[%s12602_s3] sm:$0xff]   ;;  %v9345_v14 = vld [vmem:[%s12601_s2 + $0x28] sm:$0xff]   ;;  %v9346_v15 = vld [vmem:[%s12601_s2 + $0xf8] sm:$0xff]   ;;  %v9883_v29 = vmov 5   ;;  %v9884_v34 = vmov 6   ;;  %v236_v8 = vlaneseq }
   0xf   : > { %s7844_s20 = sshll.u32 %s12677_s17, 2  ;;  %9144 = vmatprep.subr.bf16.mxu0 %v9878_v3  ;;  %9150 = vmatprep.mubr.msk.bf16.mxu0 %vm9879_vm0, %v9878_v3  ;;  %v9348_v17 = vld [vmem:[%s12601_s2 + $0x60] sm:$0xff]   ;;  %v9347_v18 = vld [vmem:[%s12601_s2 + $0xb8] sm:$0xff]   ;;  %v9350_v21 = vld [vmem:[%s12601_s2 + $0xf0] sm:$0xff]   ;;  %v9885_v39 = vmov 8   ;;  %v9886_v44 = vmov 9  }
  0x10   : > { %s9990_s25 = scalar_lea.vmem %s12599_s0, %s7844_s20  ;;  %8440 = vmatprep.subr.bf16.mxu1 %v9341_v10  ;;  %v9349_v20 = vld [vmem:[%s12601_s2 + $0x20] sm:$0xff]   ;;  %v9352_v23 = vld [vmem:[%s12601_s2 + $0x58] sm:$0xff]   ;;  %v9351_v24 = vld [vmem:[%s12601_s2 + $0xb0] sm:$0xff]   ;;  %v9887_v47 = vmov 7   ;;  %v9888_v48 = vmov 11   ;;  %v9889_v51 = vmov 12   ;;  %s10172_s8 = scalar_lea.vmem %s12600_s1, %s7844_s20 }
  0x11   : > { %v9996_v6 = vld [vmem:[%s9990_s25] sm:$0xf]  ;;  %v10007_v9 = vld [vmem:[%s9990_s25 + $0x4] sm:$0xf]  ;;  %v9353_v25 = vld [vmem:[%s12601_s2 + $0x18] sm:$0xff]   ;;  %v9890_v54 = vmov 14  }
  0x12   : > { %257 = vperm.xlu1 %9230, %v9996_v6   ;;  %230 = vperm.xlu0 %9229, %v9996_v6   ;;  %v7849_v19 = vcombine.low %v9996_v6, %v10007_v9  ;;  %v9354_v26 = vld [vmem:[%s12601_s2 + $0xe8] sm:$0xff]   ;;  %v9356_v27 = vld [vmem:[%s12601_s2 + $0x50] sm:$0xff]   ;;  %v9358_v32 = vld [vmem:[%s12601_s2 + $0xe0] sm:$0xff]   ;;  %v9891_v55 = vmov 15   ;;  %v9892_v56 = vmov 10   ;;  %v9893_v57 = vmov 17  }
  0x13   : > { %9145 = vmatpush3.bf16.msra.mxu0 %v9336_v4  ;;  %8441 = vmatpush3.bf16.msra.mxu1 %v9343_v11  ;;  %v9355_v30 = vld [vmem:[%s12601_s2 + $0xa8] sm:$0xff]   ;;  %v9357_v31 = vld [vmem:[%s12601_s2 + $0x10] sm:$0xff]   ;;  %v9359_v35 = vld [vmem:[%s12601_s2 + $0xa0] sm:$0xff]   ;;  %v9894_v58 = vmov 18   ;;  %v9895_v59 = vmov 20   ;;  %v9896_v60 = vmov 21  }
  0x14   : > { %9146 = vmatprep.subr.bf16.mxu0 %v9878_v3  ;;  %8442 = vmatprep.subr.bf16.mxu1 %v9344_v12  ;;  %v9360_v33 = vld [vmem:[%s12601_s2 + $0x48] sm:$0xff]   ;;  %v9362_v37 = vld [vmem:[%s12601_s2 + $0xd8] sm:$0xff]   ;;  %v9364_v38 = vld [vmem:[%s12601_s2 + $0x40] sm:$0xff]   ;;  %v9897_v61 = vmov 13   ;;  %v9898_v62 = vmov 23   ;;  %v9899_v63 = vmov 24  }
  0x15   : > { %v9361_v36 = vld [vmem:[%s12601_s2 + $0x8] sm:$0xff]   ;;  %v9363_v40 = vld [vmem:[%s12601_s2 + $0x98] sm:$0xff]   ;;  %v9365_v41 = vld [vmem:[%s12601_s2] sm:$0xff]   ;;  %v9900_v0 = vmov 26   ;;  %v9901_v1 = vmov 27   ;;  %v9902_v2 = vmov 16  }
  0x16   : > { %268 = vperm.xlu1 %9230, %v10007_v9   ;;  %242 = vperm.xlu0 %9229, %v10007_v9   ;;  %v9366_v42 = vld [vmem:[%s12601_s2 + $0xd0] sm:$0xff]   ;;  %v9368_v43 = vld [vmem:[%s12601_s2 + $0x178] sm:$0xff]   ;;  %v9370_v46 = vld [vmem:[%s12601_s2 + $0xc8] sm:$0xff]   ;;  %v9904_v4 = vmov 30   ;;  %v9905_v5 = vmov 839922192  }
  0x17   : > { %9147 = vmatpush3.bf16.msra.mxu0 %v9337_v7  ;;  %8443 = vmatpush3.bf16.msra.mxu1 %v9345_v14  ;;  %v9367_v45 = vld [vmem:[%s12601_s2 + $0x90] sm:$0xff]   ;;  %v9371_v49 = vld [vmem:[%s12601_s2 + $0x88] sm:$0xff]   ;;  %v9374_v50 = vld [vmem:[%s12601_s2 + $0xc0] sm:$0xff]   ;;  %v234_v7 = vunpack.c.l.s4 %v9905_v5  ;;  %v9906_v10 = vmov 19   ;;  %v9907_v11 = vmov 32   ;;  %v9908_v14 = vmov 33  }
  0x18   : > { %9148 = vmatprep.subr.bf16.mxu0 %v9878_v3  ;;  %8444 = vmatprep.subr.bf16.mxu1 %v9348_v17  ;;  %v9375_v52 = vld [vmem:[%s12601_s2 + $0x80] sm:$0xff]   ;;  %v9378_v53 = vld [vmem:[%s12601_s2 + $0x1f8] sm:$0xff]   ;;  %v9903_v3 = vmov 29  }
  0x19   : > { %v235_v12 = vunpack.c.0.s8 %v234_v7 }
  0x1a   : > { %9232 = vset.pattern.permute.xlu1 %v9880_v16  ;;  %9231 = vset.pattern.permute.xlu0 %v9880_v16  ;;  %v10178_v16 = vld [vmem:[%s10172_s8] sm:$0xf] }
  0x1b   : > { %294 = vperm.xlu1 %9232, %v10007_v9   ;;  %283 = vperm.xlu0 %9231, %v9996_v6  }
  0x1c   : > { %9149 = vmatpush3.bf16.msra.mxu0 %v9340_v13  ;;  %8445 = vmatpush3.bf16.msra.mxu1 %v9349_v20  ;;  %v237_v13 = vshrl.u32 %v236_v8, 7 }
  0x1d   : > { %8460 = vmatprep.subr.bf16.mxu0 %v9346_v15  ;;  %8446 = vmatprep.subr.bf16.mxu1 %v9352_v23  ;;  %v10186_v23 = vld [vmem:[%s10172_s8 + $0x4] sm:$0xf] }
  0x1e   : > { %v10174_v15 = vsub.s32 %v235_v12, %v237_v13 }
  0x1f   : > { %9233 = vset.pattern.permute.xlu1 %v9881_v22  ;;  %9234 = vset.pattern.permute.xlu0 %v9881_v22 }
  0x20   : > { %309 = vperm.xlu1 %9233, %v9996_v6   ;;  %320 = vperm.xlu0 %9234, %v10007_v9  }
  0x21   : > { %9151 = vmatmul.mubr.msk.bf16.vlgmr.msra.gmra.mxu0 %vm3019_vm1, %v7849_v19  ;;  %8447 = vmatpush3.bf16.msra.mxu1 %v9353_v25 }
  0x22   : > { %8461 = vmatpush3.bf16.msra.mxu0 %v9347_v18  ;;  %8448 = vmatprep.subr.bf16.mxu1 %v9356_v27 }
  0x23   : > { %8462 = vmatprep.subr.bf16.mxu0 %v9350_v21 }
  0x24   : > { %9235 = vset.pattern.permute.xlu1 %v9882_v28  ;;  %9236 = vset.pattern.permute.xlu0 %v9883_v29 }
  0x25   : > { %335 = vperm.xlu1 %9235, %v9996_v6   ;;  %361 = vperm.xlu0 %9236, %v9996_v6  }
  0x26   : > { %8463 = vmatpush3.bf16.msra.mxu0 %v9351_v24  ;;  %8449 = vmatpush3.bf16.msra.mxu1 %v9357_v31 }
  0x27   : > { %8464 = vmatprep.subr.bf16.mxu0 %v9354_v26  ;;  %8450 = vmatprep.subr.bf16.mxu1 %v9360_v33 }
  0x29   : > { %346 = vperm.xlu1 %9235, %v10007_v9   ;;  %9239 = vset.pattern.permute.xlu0 %v9884_v34 }
  0x2a   : > { %398 = vperm.xlu0 %9239, %v10007_v9   ;;  %8465 = vmatpush3.bf16.msra.mxu0 %v9355_v30 }
  0x2b   : > { %8466 = vmatprep.subr.bf16.mxu0 %v9358_v32  ;;  %8451 = vmatpush3.bf16.msra.mxu1 %v9361_v36  ;;  %v9909_v32 = vmov 22  }
  0x2c   : > { %8452 = vmatprep.subr.bf16.mxu1 %v9364_v38 }
  0x2d   : > { %9237 = vset.pattern.permute.xlu1 %v9883_v29 }
  0x2e   : > { %372 = vperm.xlu1 %9237, %v10007_v9   ;;  %9241 = vset.pattern.permute.xlu0 %v9885_v39 }
  0x2f   : > { %439 = vperm.xlu0 %9241, %v9996_v6   ;;  %8467 = vmatpush3.bf16.msra.mxu0 %v9359_v35  ;;  %v9910_v35 = vmov 35  }
  0x30   : > { %8468 = vmatprep.subr.bf16.mxu0 %v9362_v37  ;;  %8453 = vmatpush3.bf16.msra.mxu1 %v9365_v41 }
  0x31   : > { %8482 = vmatprep.subr.bf16.mxu1 %v9368_v43 }
  0x32   : > { %9238 = vset.pattern.permute.xlu1 %v9884_v34 }
  0x33   : > { %387 = vperm.xlu1 %9238, %v9996_v6   ;;  %9244 = vset.pattern.permute.xlu0 %v9886_v44 }
  0x34   : > { %476 = vperm.xlu0 %9244, %v10007_v9   ;;  %8469 = vmatpush3.bf16.msra.mxu0 %v9363_v40 }
  0x35   : > { %8470 = vmatprep.subr.bf16.mxu0 %v9366_v42 }
  0x37   : > { %9240 = vset.pattern.permute.xlu1 %v9887_v47  ;;  %v9369_v47 = vld [vmem:[%s12601_s2 + $0x138] sm:$0xff]  }
  0x38   : > { %413 = vperm.xlu1 %9240, %v9996_v6   ;;  %9246 = vset.pattern.permute.xlu0 %v9888_v48 }
  0x39   : > { %517 = vperm.xlu0 %9246, %v9996_v6   ;;  %8471 = vmatpush3.bf16.msra.mxu0 %v9367_v45 }
  0x3a   : > { %8472 = vmatprep.subr.bf16.mxu0 %v9370_v46 }
  0x3c   : > { %424 = vperm.xlu1 %9240, %v10007_v9  }
  0x3d   : > { %9249 = vset.pattern.permute.xlu0 %v9889_v51  ;;  %8473 = vmatpush3.bf16.msra.mxu0 %v9371_v49 }
  0x3e   : > { %554 = vperm.xlu0 %9249, %v10007_v9   ;;  %8474 = vmatprep.subr.bf16.mxu0 %v9374_v50  ;;  %v10214_v50 = vld [vmem:[%s9990_s25 + $0x4] sm:$0xf] }
  0x40   : > { %9242 = vset.pattern.permute.xlu1 %v9885_v39 }
  0x41   : > { %450 = vperm.xlu1 %9242, %v10007_v9   ;;  %8475 = vmatpush3.bf16.msra.mxu0 %v9375_v52 }
  0x42   : > { %9251 = vset.pattern.permute.xlu0 %v9890_v54  ;;  %8504 = vmatprep.subr.bf16.mxu0 %v9378_v53  ;;  %v9373_v53 = vld [vmem:[%s12601_s2 + $0x130] sm:$0xff]  }
  0x43   : > { %595 = vperm.xlu0 %9251, %v9996_v6  }
  0x45   : > { %9243 = vset.pattern.permute.xlu1 %v9886_v44 }
  0x46   : > { %465 = vperm.xlu1 %9243, %v9996_v6  }
  0x47   : > { %9254 = vset.pattern.permute.xlu0 %v9891_v55 }
  0x48   : > { %632 = vperm.xlu0 %9254, %v10007_v9  }
  0x4a   : > { %9245 = vset.pattern.permute.xlu1 %v9892_v56  ;;  %v9376_v56 = vld [vmem:[%s12601_s2 + $0x168] sm:$0xff]  }
  0x4b   : > { %491 = vperm.xlu1 %9245, %v9996_v6  }
  0x4c   : > { %9256 = vset.pattern.permute.xlu0 %v9893_v57 }
  0x4d   : > { %673 = vperm.xlu0 %9256, %v9996_v6  }
  0x4f   : > { %502 = vperm.xlu1 %9245, %v10007_v9  }
  0x51   : > { %9259 = vset.pattern.permute.xlu0 %v9894_v58 }
  0x52   : > { %710 = vperm.xlu0 %9259, %v10007_v9  }
  0x53   : > { %9247 = vset.pattern.permute.xlu1 %v9888_v48 }
  0x54   : > { %528 = vperm.xlu1 %9247, %v10007_v9  }
  0x56   : > { %9261 = vset.pattern.permute.xlu0 %v9895_v59 }
  0x57   : > { %751 = vperm.xlu0 %9261, %v9996_v6  }
  0x58   : > { %9248 = vset.pattern.permute.xlu1 %v9889_v51 }
  0x59   : > { %543 = vperm.xlu1 %9248, %v9996_v6  }
  0x5b   : > { %9264 = vset.pattern.permute.xlu0 %v9896_v60 }
  0x5c   : > { %788 = vperm.xlu0 %9264, %v10007_v9  }
  0x5d   : > { %9250 = vset.pattern.permute.xlu1 %v9897_v61 }
  0x5e   : > { %569 = vperm.xlu1 %9250, %v9996_v6  }
  0x60   : > { %9266 = vset.pattern.permute.xlu0 %v9898_v62 }
  0x61   : > { %829 = vperm.xlu0 %9266, %v9996_v6  }
  0x62   : > { %580 = vperm.xlu1 %9250, %v10007_v9  }
  0x65   : > { %9269 = vset.pattern.permute.xlu0 %v9899_v63 }
  0x66   : > { %9252 = vset.pattern.permute.xlu1 %v9890_v54  ;;  %866 = vperm.xlu0 %9269, %v10007_v9  }
  0x67   : > { %606 = vperm.xlu1 %9252, %v10007_v9  }
  0x6a   : > { %9271 = vset.pattern.permute.xlu0 %v9900_v0 }
  0x6b   : > { %9253 = vset.pattern.permute.xlu1 %v9891_v55  ;;  %907 = vperm.xlu0 %9271, %v9996_v6  }
  0x6c   : > { %621 = vperm.xlu1 %9253, %v9996_v6  }
  0x6f   : > { %9274 = vset.pattern.permute.xlu0 %v9901_v1 }
  0x70   : > { %9255 = vset.pattern.permute.xlu1 %v9902_v2  ;;  %944 = vperm.xlu0 %9274, %v10007_v9  }
  0x71   : > { %647 = vperm.xlu1 %9255, %v9996_v6  }
  0x74   : > { %9276 = vset.pattern.permute.xlu0 %v9903_v3 }
  0x75   : > { %658 = vperm.xlu1 %9255, %v10007_v9   ;;  %985 = vperm.xlu0 %9276, %v9996_v6  }
  0x79   : > { %9257 = vset.pattern.permute.xlu1 %v9893_v57  ;;  %9279 = vset.pattern.permute.xlu0 %v9904_v4  ;;  %v9911_v57 = vmov 36  }
  0x7a   : > { %684 = vperm.xlu1 %9257, %v10007_v9   ;;  %1022 = vperm.xlu0 %9279, %v10007_v9  }
  0x7e   : > { %9258 = vset.pattern.permute.xlu1 %v9894_v58  ;;  %9281 = vset.pattern.permute.xlu0 %v9907_v11 }
  0x7f   : > { %699 = vperm.xlu1 %9258, %v9996_v6   ;;  %1063 = vperm.xlu0 %9281, %v9996_v6  }
  0x83   : > { %9260 = vset.pattern.permute.xlu1 %v9906_v10  ;;  %9284 = vset.pattern.permute.xlu0 %v9908_v14  ;;  %v9380_v10 = vld [vmem:[%s12601_s2 + $0x160] sm:$0xff]  }
  0x84   : > { %725 = vperm.xlu1 %9260, %v9996_v6   ;;  %1100 = vperm.xlu0 %9284, %v10007_v9  }
  0x88   : > { %736 = vperm.xlu1 %9260, %v10007_v9   ;;  %9286 = vset.pattern.permute.xlu0 %v9910_v35 }
  0x89   : > { %1141 = vperm.xlu0 %9286, %v9996_v6  }
  0x8c   : > { %9262 = vset.pattern.permute.xlu1 %v9895_v59 }
  0x8d   : > { %v258_v17 = vpop.permute.xlu1 %257  ;;  %v231_v18 = vpop.permute.xlu0 %230  ;;  %762 = vperm.xlu1 %9262, %v10007_v9   ;;  %9289 = vset.pattern.permute.xlu0 %v9911_v57 }
  0x8e   : > { %v266_v19 = vrot.slane %v258_v17, %v10174_v15  ;;  %v239_v20 = vrot.slane %v231_v18, %v10174_v15  ;;  %1178 = vperm.xlu0 %9289, %v10214_v50   ;;  %v9381_v17 = vld [vmem:[%s12601_s2 + $0x120] sm:$0xff]  }
  0x90   : > { %v278_v21 = vmul.bf16 %v266_v19, %v10178_v16  ;;  %v252_v22 = vmul.bf16 %v239_v20, %v10178_v16  ;;  %v9382_v20 = vld [vmem:[%s12601_s2 + $0x1f0] sm:$0xff]  }
  0x91   : > { %v269_v24 = vpop.permute.xlu1 %268  ;;  %v243_v25 = vpop.permute.xlu0 %242  ;;  %9263 = vset.pattern.permute.xlu1 %v9896_v60  ;;  %v9377_v60 = vld [vmem:[%s12601_s2 + $0x128] sm:$0xff]  }
  0x92   : > { %280 = vst [vmem:[#allocation2 + $0x4] sm:$0xf] %v278_v21  ;;  %254 = vst [vmem:[#allocation2] sm:$0xf] %v252_v22  ;;  %v277_v26 = vrot.slane %v269_v24, %v10174_v15  ;;  %v251_v27 = vrot.slane %v243_v25, %v10174_v15  ;;  %777 = vperm.xlu1 %9263, %v9996_v6   ;;  %v9912_v21 = vmov 25   ;;  %v9383_v24 = vld [vmem:[%s12601_s2 + $0x1b0] sm:$0xff]  }
  0x94   : > { %v279_v28 = vmul.bf16 %v277_v26, %v10186_v23  ;;  %v253_v29 = vmul.bf16 %v251_v27, %v10186_v23  ;;  %v9384_v26 = vld [vmem:[%s12601_s2 + $0x158] sm:$0xff]  }
  0x96   : > { %281 = vst [vmem:[#allocation2 + $0x104] sm:$0xf] %v279_v28  ;;  %255 = vst [vmem:[#allocation2 + $0x100] sm:$0xf] %v253_v29  ;;  %v295_v30 = vpop.permute.xlu1 %294  ;;  %v284_v31 = vpop.permute.xlu0 %283  ;;  %9265 = vset.pattern.permute.xlu1 %v9909_v32  ;;  %v9385_v29 = vld [vmem:[%s12601_s2 + $0x118] sm:$0xff]  }
  0x97   : > { %v303_v33 = vrot.slane %v295_v30, %v10174_v15  ;;  %v292_v34 = vrot.slane %v284_v31, %v10174_v15  ;;  %803 = vperm.xlu1 %9265, %v9996_v6   ;;  %v9386_v30 = vld [vmem:[%s12601_s2 + $0x1e8] sm:$0xff]  }
  0x99   : > { %v305_v36 = vmul.bf16 %v303_v33, %v10186_v23  ;;  %v304_v37 = vmul.bf16 %v292_v34, %v10178_v16  ;;  %v1894_v42 = vld [vmem:[#allocation2] sm:$0xff]  ;;  %v9387_v33 = vld [vmem:[%s12601_s2 + $0x1a8] sm:$0xff]  }
  0x9b   : > { %307 = vst [vmem:[#allocation2 + $0x108] sm:$0xf] %v305_v36  ;;  %306 = vst [vmem:[#allocation2 + $0x8] sm:$0xf] %v304_v37  ;;  %v310_v38 = vpop.permute.xlu1 %309  ;;  %v321_v39 = vpop.permute.xlu0 %320  ;;  %814 = vperm.xlu1 %9265, %v10007_v9   ;;  %v9372_v9 = vld [vmem:[%s12601_s2 + $0x170] sm:$0xff]  }
  0x9c   : > { %v318_v40 = vrot.slane %v310_v38, %v10174_v15  ;;  %v329_v41 = vrot.slane %v321_v39, %v10174_v15  ;;  %v9388_v36 = vld [vmem:[%s12601_s2 + $0x150] sm:$0xff]  }
  0x9d   : > { %v1926_v43 = vld [vmem:[#allocation2 + $0x100] sm:$0xff]  ;;  %v9389_v38 = vld [vmem:[%s12601_s2 + $0x110] sm:$0xff]  }
  0x9e   : > { %v330_v44 = vmul.bf16 %v318_v40, %v10178_v16  ;;  %v331_v6 = vmul.bf16 %v329_v41, %v10186_v23  ;;  %v7855_v45 = vcombine.low %v1894_v42, %v1926_v43  ;;  %v7856_v46 = vcombine.high %v1894_v42, %v1926_v43  ;;  %v9390_v41 = vld [vmem:[%s12601_s2 + $0x1e0] sm:$0xff]  }
  0x9f   : > { %9267 = vset.pattern.permute.xlu1 %v9898_v62  ;;  %v10235_v62 = vld [vmem:[%s9990_s25] sm:$0xf] }
  0xa0   : > { %332 = vst [vmem:[#allocation2 + $0xc] sm:$0xf] %v330_v44  ;;  %333 = vst [vmem:[#allocation2 + $0x10c] sm:$0xf] %v331_v6  ;;  %v336_v48 = vpop.permute.xlu1 %335  ;;  %6488 = vmatprep.mubr.bf16.mxu1 %v7856_v46  ;;  %v362_v49 = vpop.permute.xlu0 %361  ;;  %840 = vperm.xlu1 %9267, %v10214_v50   ;;  %v9391_v42 = vld [vmem:[%s12601_s2 + $0x1a0] sm:$0xff]   ;;  %v9392_v6 = vld [vmem:[%s12601_s2 + $0x148] sm:$0xff]  }
  0xa1   : > { %v344_v51 = vrot.slane %v336_v48, %v10174_v15  ;;  %6489 = vmatmul.mubr.bf16.vlgmr.msra.gmra.mxu1 %v7855_v45  ;;  %v370_v52 = vrot.slane %v362_v49, %v10174_v15  ;;  %v9394_v46 = vld [vmem:[%s12601_s2 + $0x1d8] sm:$0xff]  }
  0xa2   : > { %8483 = vmatpush3.bf16.msra.mxu1 %v9369_v47 }
  0xa3   : > { %v356_v54 = vmul.bf16 %v344_v51, %v10178_v16  ;;  %8484 = vmatprep.subr.bf16.mxu1 %v9372_v9  ;;  %v382_v55 = vmul.bf16 %v370_v52, %v10178_v16 }
  0xa4   : > { %v347_v58 = vpop.permute.xlu1 %346  ;;  %9268 = vset.pattern.permute.xlu1 %v9899_v63  ;;  %v9379_v63 = vld [vmem:[%s12601_s2 + $0x1b8] sm:$0xff]  }
  0xa5   : > { %358 = vst [vmem:[#allocation2 + $0x10] sm:$0xf] %v356_v54  ;;  %v355_v59 = vrot.slane %v347_v58, %v10174_v15  ;;  %384 = vst [vmem:[#allocation2 + $0x14] sm:$0xf] %v382_v55  ;;  %v399_v61 = vpop.permute.xlu0 %398  ;;  %855 = vperm.xlu1 %9268, %v10235_v62   ;;  %v9913_v54 = vmov 38  }
  0xa6   : > { %8485 = vmatpush3.bf16.msra.mxu1 %v9373_v53  ;;  %v407_v2 = vrot.slane %v399_v61, %v10174_v15  ;;  %v9393_v53 = vld [vmem:[%s12601_s2 + $0x108] sm:$0xff]   ;;  %9291 = vset.pattern.permute.xlu0 %v9913_v54 }
  0xa7   : > { %v357_v5 = vmul.bf16 %v355_v59, %v10186_v23  ;;  %8486 = vmatprep.subr.bf16.mxu1 %v9376_v56  ;;  %v1895_v7 = vld [vmem:[#allocation2 + $0x8] sm:$0xff]  ;;  %1219 = vperm.xlu0 %9291, %v10235_v62   ;;  %v9395_v59 = vld [vmem:[%s12601_s2 + $0x198] sm:$0xff]  }
  0xa8   : > { %v1927_v8 = vld [vmem:[#allocation2 + $0x108] sm:$0xff]  ;;  %v409_v18 = vmul.bf16 %v407_v2, %v10186_v23  ;;  %v9397_v2 = vld [vmem:[%s12601_s2 + $0x100] sm:$0xff]  }
  0xa9   : > { %v7857_v12 = vcombine.low %v1895_v7, %v1927_v8  ;;  %v7858_v13 = vcombine.high %v1895_v7, %v1927_v8  ;;  %359 = vst [vmem:[#allocation2 + $0x110] sm:$0xf] %v357_v5  ;;  %v373_v19 = vpop.permute.xlu1 %372  ;;  %9270 = vset.pattern.permute.xlu1 %v9912_v21  ;;  %v9400_v7 = vld [vmem:[%s12601_s2 + $0x278] sm:$0xff]   ;;  %v9914_v8 = vmov 39  }
  0xaa   : > { %v381_v22 = vrot.slane %v373_v19, %v10174_v15  ;;  %8487 = vmatpush3.bf16.msra.mxu1 %v9377_v60  ;;  %411 = vst [vmem:[#allocation2 + $0x118] sm:$0xf] %v409_v18  ;;  %v440_v25 = vpop.permute.xlu0 %439  ;;  %881 = vperm.xlu1 %9270, %v10235_v62   ;;  %v9398_v60 = vld [vmem:[%s12601_s2 + $0x1d0] sm:$0xff]   ;;  %v9401_v18 = vld [vmem:[%s12601_s2 + $0x238] sm:$0xff]   ;;  %v9915_v19 = vmov 28  }
  0xab   : > { %6529 = vmatprep.mubr.bf16.mxu0 %v7858_v13  ;;  %8488 = vmatprep.subr.bf16.mxu1 %v9380_v10  ;;  %v448_v27 = vrot.slane %v440_v25, %v10174_v15  ;;  %v9404_v25 = vld [vmem:[%s12601_s2 + $0x270] sm:$0xff]  }
  0xac   : > { %6530 = vmatmul.mubr.bf16.vlgmr.msra.gmra.mxu0 %v7857_v12  ;;  %v383_v28 = vmul.bf16 %v381_v22, %v10186_v23  ;;  %v1896_v9 = vld [vmem:[#allocation2 + $0x10] sm:$0xff]  ;;  %9294 = vset.pattern.permute.xlu0 %v9914_v8 }
  0xad   : > { %8505 = vmatpush3.bf16.msra.mxu0 %v9379_v63  ;;  %v460_v31 = vmul.bf16 %v448_v27, %v10178_v16  ;;  %1256 = vperm.xlu0 %9294, %v10214_v50   ;;  %v9405_v27 = vld [vmem:[%s12601_s2 + $0x230] sm:$0xff]  }
  0xae   : > { %8506 = vmatprep.subr.bf16.mxu0 %v9382_v20  ;;  %385 = vst [vmem:[#allocation2 + $0x114] sm:$0xf] %v383_v28  ;;  %8489 = vmatpush3.bf16.msra.mxu1 %v9381_v17  ;;  %v388_v32 = vpop.permute.xlu1 %387  ;;  %v9402_v17 = vld [vmem:[%s12601_s2 + $0x1c8] sm:$0xff]   ;;  %v9406_v28 = vld [vmem:[%s12601_s2 + $0x1c0] sm:$0xff]  }
  0xaf   : > { %v396_v34 = vrot.slane %v388_v32, %v10174_v15  ;;  %8490 = vmatprep.subr.bf16.mxu1 %v9384_v26  ;;  %462 = vst [vmem:[#allocation2 + $0x20] sm:$0xf] %v460_v31  ;;  %v477_v37 = vpop.permute.xlu0 %476  ;;  %892 = vperm.xlu1 %9270, %v10214_v50  }
  0xb0   : > { %v485_v39 = vrot.slane %v477_v37, %v10174_v15 }
  0xb1   : > { %8507 = vmatpush3.bf16.msra.mxu0 %v9383_v24  ;;  %v408_v40 = vmul.bf16 %v396_v34, %v10178_v16  ;;  %v9403_v24 = vld [vmem:[%s12601_s2 + $0x188] sm:$0xff]  }
  0xb2   : > { %8508 = vmatprep.subr.bf16.mxu0 %v9386_v30  ;;  %8491 = vmatpush3.bf16.msra.mxu1 %v9385_v29  ;;  %v487_v43 = vmul.bf16 %v485_v39, %v10186_v23  ;;  %v9408_v30 = vld [vmem:[%s12601_s2 + $0x268] sm:$0xff]   ;;  %v9407_v39 = vld [vmem:[%s12601_s2 + $0x180] sm:$0xff]  }
  0xb3   : > { %410 = vst [vmem:[#allocation2 + $0x18] sm:$0xf] %v408_v40  ;;  %v414_v44 = vpop.permute.xlu1 %413  ;;  %8492 = vmatprep.subr.bf16.mxu1 %v9388_v36  ;;  %9272 = vset.pattern.permute.xlu1 %v9900_v0  ;;  %v9396_v0 = vld [vmem:[%s12601_s2 + $0x140] sm:$0xff]  }
  0xb4   : > { %v422_v45 = vrot.slane %v414_v44, %v10174_v15  ;;  %489 = vst [vmem:[#allocation2 + $0x124] sm:$0xf] %v487_v43  ;;  %v518_v47 = vpop.permute.xlu0 %517  ;;  %918 = vperm.xlu1 %9272, %v10214_v50  }
  0xb5   : > { %8509 = vmatpush3.bf16.msra.mxu0 %v9387_v33  ;;  %v1928_v48 = vld [vmem:[#allocation2 + $0x110] sm:$0xff]  ;;  %v526_v49 = vrot.slane %v518_v47, %v10174_v15  ;;  %v9413_v47 = vld [vmem:[%s12601_s2 + $0x220] sm:$0xff]  }
  0xb6   : > { %8510 = vmatprep.subr.bf16.mxu0 %v9390_v41  ;;  %v434_v51 = vmul.bf16 %v422_v45, %v10178_v16  ;;  %8493 = vmatpush3.bf16.msra.mxu1 %v9389_v38  ;;  %v7860_v52 = vcombine.high %v1896_v9, %v1928_v48  ;;  %v7859_v21 = vcombine.low %v1896_v9, %v1928_v48  ;;  %v9410_v41 = vld [vmem:[%s12601_s2 + $0x2f8] sm:$0xff]   ;;  %v9412_v45 = vld [vmem:[%s12601_s2 + $0x260] sm:$0xff]  }
  0xb7   : > { %v425_v55 = vpop.permute.xlu1 %424  ;;  %8494 = vmatprep.subr.bf16.mxu1 %v9392_v6  ;;  %v538_v56 = vmul.bf16 %v526_v49, %v10178_v16 }
  0xb8   : > { %436 = vst [vmem:[#allocation2 + $0x1c] sm:$0xf] %v434_v51  ;;  %v433_v58 = vrot.slane %v425_v55, %v10174_v15  ;;  %6570 = vmatprep.mubr.bf16.mxu1 %v7860_v52  ;;  %9273 = vset.pattern.permute.xlu1 %v9901_v1  ;;  %v9399_v1 = vld [vmem:[%s12601_s2 + $0x190] sm:$0xff]   ;;  %v9916_v52 = vmov 41  }
  0xb9   : > { %8511 = vmatpush3.bf16.msra.mxu0 %v9391_v42  ;;  %540 = vst [vmem:[#allocation2 + $0x2c] sm:$0xf] %v538_v56  ;;  %v555_v61 = vpop.permute.xlu0 %554  ;;  %933 = vperm.xlu1 %9273, %v10235_v62   ;;  %v9409_v42 = vld [vmem:[%s12601_s2 + $0x228] sm:$0xff]   ;;  %v9415_v55 = vld [vmem:[%s12601_s2 + $0x2b0] sm:$0xff]  }
  0xba   : > { %8512 = vmatprep.subr.bf16.mxu0 %v9394_v46  ;;  %v435_v63 = vmul.bf16 %v433_v58, %v10186_v23  ;;  %8495 = vmatpush3.bf16.msra.mxu1 %v9393_v53  ;;  %v563_v5 = vrot.slane %v555_v61, %v10174_v15  ;;  %v9411_v46 = vld [vmem:[%s12601_s2 + $0x2b8] sm:$0xff]  }
  0xbb   : > { %8496 = vmatprep.subr.bf16.mxu1 %v9396_v0  ;;  %9296 = vset.pattern.permute.xlu0 %v9916_v52  ;;  %v9416_v0 = vld [vmem:[%s12601_s2 + $0x258] sm:$0xff]  }
  0xbc   : > { %437 = vst [vmem:[#allocation2 + $0x11c] sm:$0xf] %v435_v63  ;;  %v451_v10 = vpop.permute.xlu1 %450  ;;  %v565_v12 = vmul.bf16 %v563_v5, %v10186_v23  ;;  %1297 = vperm.xlu0 %9296, %v10235_v62   ;;  %v9418_v63 = vld [vmem:[%s12601_s2 + $0x2e8] sm:$0xff]  }
  0xbd   : > { %8513 = vmatpush3.bf16.msra.mxu0 %v9395_v59  ;;  %v459_v13 = vrot.slane %v451_v10, %v10174_v15  ;;  %9275 = vset.pattern.permute.xlu1 %v9915_v19  ;;  %v9917_v10 = vmov 42  }
  0xbe   : > { %8514 = vmatprep.subr.bf16.mxu0 %v9398_v60  ;;  %8497 = vmatpush3.bf16.msra.mxu1 %v9397_v2  ;;  %567 = vst [vmem:[#allocation2 + $0x130] sm:$0xf] %v565_v12  ;;  %v596_v20 = vpop.permute.xlu0 %595  ;;  %v9417_v60 = vld [vmem:[%s12601_s2 + $0x218] sm:$0xff]  }
  0xbf   : > { %8526 = vmatprep.subr.bf16.mxu1 %v9400_v7  ;;  %v461_v22 = vmul.bf16 %v459_v13, %v10186_v23  ;;  %959 = vperm.xlu1 %9275, %v10235_v62   ;;  %v604_v26 = vrot.slane %v596_v20, %v10174_v15  ;;  %v1897_v33 = vld [vmem:[#allocation2 + $0x18] sm:$0xff]  ;;  %v9419_v7 = vld [vmem:[%s12601_s2 + $0x2a8] sm:$0xff]   ;;  %v9420_v13 = vld [vmem:[%s12601_s2 + $0x250] sm:$0xff]  }
  0xc0   : > { %9299 = vset.pattern.permute.xlu0 %v9917_v10  ;;  %v9422_v20 = vld [vmem:[%s12601_s2 + $0x2e0] sm:$0xff]  }
  0xc1   : > { %8515 = vmatpush3.bf16.msra.mxu0 %v9399_v1  ;;  %6571 = vmatmul.mubr.bf16.vlgmr.msra.gmra.mxu1 %v7859_v21  ;;  %463 = vst [vmem:[#allocation2 + $0x120] sm:$0xf] %v461_v22  ;;  %v466_v29 = vpop.permute.xlu1 %465  ;;  %v616_v31 = vmul.bf16 %v604_v26, %v10178_v16  ;;  %v9918_v21 = vmov 31   ;;  %v9424_v26 = vld [vmem:[%s12601_s2 + $0x248] sm:$0xff]  }
  0xc2   : > { %8516 = vmatprep.subr.bf16.mxu0 %v9402_v17  ;;  %8527 = vmatpush3.bf16.msra.mxu1 %v9401_v18  ;;  %v474_v32 = vrot.slane %v466_v29, %v10174_v15  ;;  %v9421_v18 = vld [vmem:[%s12601_s2 + $0x210] sm:$0xff]  }
  0xc3   : > { %8528 = vmatprep.subr.bf16.mxu1 %v9404_v25  ;;  %v1929_v34 = vld [vmem:[#allocation2 + $0x118] sm:$0xff]  ;;  %970 = vperm.xlu1 %9275, %v10214_v50   ;;  %618 = vst [vmem:[#allocation2 + $0x38] sm:$0xf] %v616_v31  ;;  %v633_v36 = vpop.permute.xlu0 %632 }
  0xc4   : > { %v486_v37 = vmul.bf16 %v474_v32, %v10178_v16  ;;  %v7862_v38 = vcombine.high %v1897_v33, %v1929_v34  ;;  %v641_v40 = vrot.slane %v633_v36, %v10174_v15  ;;  %v7861_v48 = vcombine.low %v1897_v33, %v1929_v34  ;;  %1334 = vperm.xlu0 %9299, %v10214_v50   ;;  %v9427_v33 = vld [vmem:[%s12601_s2 + $0x298] sm:$0xff]   ;;  %v9428_v34 = vld [vmem:[%s12601_s2 + $0x240] sm:$0xff]  }
  0xc5   : > { %8517 = vmatpush3.bf16.msra.mxu0 %v9403_v24  ;;  %v9423_v24 = vld [vmem:[%s12601_s2 + $0x2a0] sm:$0xff]  }
  0xc6   : > { %8518 = vmatprep.subr.bf16.mxu0 %v9406_v28  ;;  %8529 = vmatpush3.bf16.msra.mxu1 %v9405_v27  ;;  %488 = vst [vmem:[#allocation2 + $0x24] sm:$0xf] %v486_v37  ;;  %v492_v43 = vpop.permute.xlu1 %491  ;;  %v643_v44 = vmul.bf16 %v641_v40, %v10186_v23  ;;  %v9425_v28 = vld [vmem:[%s12601_s2 + $0x208] sm:$0xff]  }
  0xc7   : > { %6611 = vmatprep.mubr.bf16.mxu0 %v7862_v38  ;;  %8530 = vmatprep.subr.bf16.mxu1 %v9408_v30  ;;  %v500_v6 = vrot.slane %v492_v43, %v10174_v15  ;;  %v9426_v30 = vld [vmem:[%s12601_s2 + $0x2d8] sm:$0xff]   ;;  %v9430_v38 = vld [vmem:[%s12601_s2 + $0x2d0] sm:$0xff]  }
  0xc8   : > { %9277 = vset.pattern.permute.xlu1 %v9903_v3  ;;  %645 = vst [vmem:[#allocation2 + $0x13c] sm:$0xf] %v643_v44  ;;  %v674_v9 = vpop.permute.xlu0 %673  ;;  %v9414_v3 = vld [vmem:[%s12601_s2 + $0x2f0] sm:$0xff]   ;;  %v10399_v58 = vld [vmem:[#allocation2 + $0x120] sm:$0xff] }
  0xc9   : > { %8519 = vmatpush3.bf16.msra.mxu0 %v9407_v39  ;;  %996 = vperm.xlu1 %9277, %v10214_v50   ;;  %v512_v49 = vmul.bf16 %v500_v6, %v10178_v16  ;;  %v682_v51 = vrot.slane %v674_v9, %v10174_v15  ;;  %v9432_v6 = vld [vmem:[%s12601_s2 + $0x378] sm:$0xff]  }
  0xca   : > { %8548 = vmatprep.subr.bf16.mxu0 %v9410_v41  ;;  %8531 = vmatpush3.bf16.msra.mxu1 %v9409_v42  ;;  %v503_v53 = vpop.permute.xlu1 %502  ;;  %v9429_v42 = vld [vmem:[%s12601_s2 + $0x200] sm:$0xff]  }
  0xcb   : > { %514 = vst [vmem:[#allocation2 + $0x28] sm:$0xf] %v512_v49  ;;  %8532 = vmatprep.subr.bf16.mxu1 %v9412_v45  ;;  %v511_v56 = vrot.slane %v503_v53, %v10174_v15  ;;  %v694_v59 = vmul.bf16 %v682_v51, %v10178_v16  ;;  %v9433_v51 = vld [vmem:[%s12601_s2 + $0x338] sm:$0xff]  }
  0xcc   : > { %6612 = vmatmul.mubr.bf16.vlgmr.msra.gmra.mxu0 %v7861_v48  ;;  %v9434_v48 = vld [vmem:[%s12601_s2 + $0x2c8] sm:$0xff]  }
  0xcd   : > { %8549 = vmatpush3.bf16.msra.mxu0 %v9411_v46  ;;  %9278 = vset.pattern.permute.xlu1 %v9904_v4  ;;  %v513_v61 = vmul.bf16 %v511_v56, %v10186_v23  ;;  %v10410_v2 = vld [vmem:[#allocation2 + $0x20] sm:$0xff]  ;;  %696 = vst [vmem:[#allocation2 + $0x44] sm:$0xf] %v694_v59  ;;  %v711_v5 = vpop.permute.xlu0 %710  ;;  %v9431_v46 = vld [vmem:[%s12601_s2 + $0x290] sm:$0xff]   ;;  %v9435_v59 = vld [vmem:[%s12601_s2 + $0x288] sm:$0xff]  }
  0xce   : > { %8550 = vmatprep.subr.bf16.mxu0 %v9414_v3  ;;  %1011 = vperm.xlu1 %9278, %v10235_v62   ;;  %v7864_v4 = vcombine.high %v10410_v2, %v10399_v58  ;;  %v719_v1 = vrot.slane %v711_v5, %v10174_v15 }
  0xcf   : > { %8533 = vmatpush3.bf16.msra.mxu1 %v9413_v47  ;;  %515 = vst [vmem:[#allocation2 + $0x128] sm:$0xf] %v513_v61  ;;  %v529_v12 = vpop.permute.xlu1 %528 }
  0xd0   : > { %8534 = vmatprep.subr.bf16.mxu1 %v9416_v0  ;;  %v537_v17 = vrot.slane %v529_v12, %v10174_v15  ;;  %6652 = vmatprep.mubr.bf16.mxu1 %v7864_v4  ;;  %v721_v19 = vmul.bf16 %v719_v1, %v10186_v23  ;;  %v9436_v0 = vld [vmem:[%s12601_s2 + $0x370] sm:$0xff]   ;;  %v9919_v4 = vmov 44   ;;  %v9439_v1 = vld [vmem:[%s12601_s2 + $0x280] sm:$0xff]   ;;  %v9920_v12 = vmov 34  }
  0xd1   : > { %8551 = vmatpush3.bf16.msra.mxu0 %v9415_v55  ;;  %v7863_v55 = vcombine.low %v10410_v2, %v10399_v58  ;;  %v9438_v58 = vld [vmem:[%s12601_s2 + $0x2c0] sm:$0xff]   ;;  %v9440_v2 = vld [vmem:[%s12601_s2 + $0x368] sm:$0xff]   ;;  %9301 = vset.pattern.permute.xlu0 %v9919_v4 }
  0xd2   : > { %8552 = vmatprep.subr.bf16.mxu0 %v9418_v63  ;;  %9280 = vset.pattern.permute.xlu1 %v9918_v21  ;;  %v539_v22 = vmul.bf16 %v537_v17, %v10186_v23  ;;  %723 = vst [vmem:[#allocation2 + $0x148] sm:$0xf] %v721_v19  ;;  %v752_v25 = vpop.permute.xlu0 %751  ;;  %v10461_v40 = vld [vmem:[#allocation2 + $0x28] sm:$0xff]  ;;  %v9442_v19 = vld [vmem:[%s12601_s2 + $0x3f8] sm:$0xff]  }
  0xd3   : > { %8535 = vmatpush3.bf16.msra.mxu1 %v9417_v60  ;;  %1037 = vperm.xlu1 %9280, %v10235_v62   ;;  %v760_v27 = vrot.slane %v752_v25, %v10174_v15 }
  0xd4   : > { %8536 = vmatprep.subr.bf16.mxu1 %v9420_v13  ;;  %541 = vst [vmem:[#allocation2 + $0x12c] sm:$0xf] %v539_v22  ;;  %v544_v29 = vpop.permute.xlu1 %543  ;;  %v10519_v13 = vld [vmem:[%s10172_s8 + $0x4] sm:$0xf]  ;;  %v9443_v22 = vld [vmem:[%s12601_s2 + $0x3b8] sm:$0xff]   ;;  %1375 = vperm.xlu0 %9301, %v10235_v62  }
  0xd5   : > { %8553 = vmatpush3.bf16.msra.mxu0 %v9419_v7  ;;  %v552_v31 = vrot.slane %v544_v29, %v10174_v15  ;;  %v772_v32 = vmul.bf16 %v760_v27, %v10178_v16 }
  0xd6   : > { %8554 = vmatprep.subr.bf16.mxu0 %v9422_v20 }
  0xd7   : > { %8537 = vmatpush3.bf16.msra.mxu1 %v9421_v18  ;;  %1048 = vperm.xlu1 %9280, %v10214_v50   ;;  %v564_v36 = vmul.bf16 %v552_v31, %v10178_v16  ;;  %774 = vst [vmem:[#allocation2 + $0x50] sm:$0xf] %v772_v32  ;;  %v789_v37 = vpop.permute.xlu0 %788  ;;  %v9441_v18 = vld [vmem:[%s12601_s2 + $0x328] sm:$0xff]  }
  0xd8   : > { %8538 = vmatprep.subr.bf16.mxu1 %v9424_v26  ;;  %v797_v39 = vrot.slane %v789_v37, %v10174_v15 }
  0xd9   : > { %8555 = vmatpush3.bf16.msra.mxu0 %v9423_v24  ;;  %566 = vst [vmem:[#allocation2 + $0x30] sm:$0xf] %v564_v36  ;;  %v570_v41 = vpop.permute.xlu1 %569  ;;  %v9444_v24 = vld [vmem:[%s12601_s2 + $0x360] sm:$0xff]  }
  0xda   : > { %8556 = vmatprep.subr.bf16.mxu0 %v9426_v30  ;;  %v578_v43 = vrot.slane %v570_v41, %v10174_v15  ;;  %v799_v44 = vmul.bf16 %v797_v39, %v10186_v23  ;;  %v9446_v30 = vld [vmem:[%s12601_s2 + $0x3f0] sm:$0xff]   ;;  %v9445_v36 = vld [vmem:[%s12601_s2 + $0x320] sm:$0xff]   ;;  %v9921_v39 = vmov 45  }
  0xdb   : > { %8539 = vmatpush3.bf16.msra.mxu1 %v9425_v28  ;;  %9282 = vset.pattern.permute.xlu1 %v9907_v11  ;;  %v10472_v45 = vld [vmem:[#allocation2 + $0x128] sm:$0xff]  ;;  %v9447_v41 = vld [vmem:[%s12601_s2 + $0x3b0] sm:$0xff]  }
  0xdc   : > { %8540 = vmatprep.subr.bf16.mxu1 %v9428_v34  ;;  %1074 = vperm.xlu1 %9282, %v10214_v50   ;;  %v7866_v47 = vcombine.high %v10461_v40, %v10472_v45  ;;  %v590_v11 = vmul.bf16 %v578_v43, %v10178_v16  ;;  %801 = vst [vmem:[#allocation2 + $0x154] sm:$0xf] %v799_v44  ;;  %v830_v9 = vpop.permute.xlu0 %829  ;;  %v9450_v44 = vld [vmem:[%s12601_s2 + $0x3e8] sm:$0xff]  }
  0xdd   : > { %8557 = vmatpush3.bf16.msra.mxu0 %v9427_v33  ;;  %v581_v49 = vpop.permute.xlu1 %580  ;;  %v838_v3 = vrot.slane %v830_v9, %v10174_v15  ;;  %v7865_v32 = vcombine.low %v10461_v40, %v10472_v45  ;;  %v10552_v33 = vld [vmem:[%s10172_s8] sm:$0xf]  ;;  %9304 = vset.pattern.permute.xlu0 %v9921_v39  ;;  %v9449_v45 = vld [vmem:[%s12601_s2 + $0x318] sm:$0xff]  }
  0xde   : > { %8558 = vmatprep.subr.bf16.mxu0 %v9430_v38  ;;  %6693 = vmatprep.mubr.bf16.mxu0 %v7866_v47  ;;  %592 = vst [vmem:[#allocation2 + $0x34] sm:$0xf] %v590_v11  ;;  %v589_v53 = vrot.slane %v581_v49, %v10174_v15  ;;  %v10581_v47 = vld [vmem:[%s9990_s25 + $0x4] sm:$0xf] }
  0xdf   : > { %8541 = vmatpush3.bf16.msra.mxu1 %v9429_v42  ;;  %v850_v56 = vmul.bf16 %v838_v3, %v10178_v16  ;;  %v9437_v16 = vld [vmem:[%s12601_s2 + $0x330] sm:$0xff]   ;;  %1412 = vperm.xlu0 %9304, %v10581_v47   ;;  %v9454_v49 = vld [vmem:[%s12601_s2 + $0x3e0] sm:$0xff]  }
  0xe0   : > { %8570 = vmatprep.subr.bf16.mxu1 %v9432_v6  ;;  %9283 = vset.pattern.permute.xlu1 %v9908_v14  ;;  %v591_v60 = vmul.bf16 %v589_v53, %v10186_v23 }
  0xe1   : > { %8559 = vmatpush3.bf16.msra.mxu0 %v9431_v46  ;;  %1089 = vperm.xlu1 %9283, %v10235_v62   ;;  %852 = vst [vmem:[#allocation2 + $0x5c] sm:$0xf] %v850_v56  ;;  %v10504_v61 = vpop.f32.mrf.mxu0  ;;  %v867_v14 = vpop.permute.xlu0 %866  ;;  %v9451_v46 = vld [vmem:[%s12601_s2 + $0x3a8] sm:$0xff]   ;;  %v9455_v56 = vld [vmem:[%s12601_s2 + $0x3a0] sm:$0xff]  }
  0xe2   : > { %6653 = vmatmul.mubr.bf16.vlgmr.msra.gmra.mxu1 %v7863_v55  ;;  %8560 = vmatprep.subr.bf16.mxu0 %v9434_v48  ;;  %593 = vst [vmem:[#allocation2 + $0x134] sm:$0xf] %v591_v60  ;;  %v607_v23 = vpop.permute.xlu1 %606  ;;  %v875_v63 = vrot.slane %v867_v14, %v10174_v15  ;;  %v9453_v48 = vld [vmem:[%s12601_s2 + $0x310] sm:$0xff]   ;;  %v10611_v14 = vld [vmem:[%s9990_s25] sm:$0xf] }
  0xe3   : > { %8571 = vmatpush3.bf16.msra.mxu1 %v9433_v51  ;;  %v615_v5 = vrot.slane %v607_v23, %v10174_v15  ;;  %v9152_v7 = vpop.f32.mrf.mxu0 }
  0xe4   : > { %8572 = vmatprep.subr.bf16.mxu1 %v9436_v0  ;;  %v877_v17 = vmul.bf16 %v10519_v13, %v875_v63  ;;  %v9458_v63 = vld [vmem:[%s12601_s2 + $0x3d8] sm:$0xff]  }
  0xe5   : > { %8561 = vmatpush3.bf16.msra.mxu0 %v9435_v59  ;;  %9285 = vset.pattern.permute.xlu1 %v9920_v12  ;;  %v617_v20 = vmul.bf16 %v10519_v13, %v615_v5  ;;  %v10530_v21 = vpop.f32.mrf.mxu0  ;;  %v10539_v27 = vld [vmem:[#allocation2 + $0x30] sm:$0xff]  ;;  %v9456_v59 = vld [vmem:[%s12601_s2 + $0x348] sm:$0xff]   ;;  %v9459_v7 = vld [vmem:[%s12601_s2 + $0x398] sm:$0xff]  }
  0xe6   : > { %8562 = vmatprep.subr.bf16.mxu0 %v9438_v58  ;;  %1115 = vperm.xlu1 %9285, %v10235_v62   ;;  %879 = vst [vmem:[#allocation2 + $0x160] sm:$0xf] %v877_v17  ;;  %v908_v25 = vpop.permute.xlu0 %907  ;;  %v9460_v17 = vld [vmem:[%s12601_s2 + $0x340] sm:$0xff]  }
  0xe7   : > { %8573 = vmatpush3.bf16.msra.mxu1 %v9437_v16  ;;  %619 = vst [vmem:[#allocation2 + $0x138] sm:$0xf] %v617_v20  ;;  %v622_v26 = vpop.permute.xlu1 %621  ;;  %v9153_v28 = vpop.f32.mrf.mxu0  ;;  %v916_v29 = vrot.slane %v908_v25, %v10174_v15  ;;  %v9923_v25 = vmov 47  }
  0xe8   : > { %8574 = vmatprep.subr.bf16.mxu1 %v9440_v2  ;;  %v630_v31 = vrot.slane %v622_v26, %v10174_v15  ;;  %9306 = vset.pattern.permute.xlu0 %v9923_v25  ;;  %v9463_v26 = vld [vmem:[%s12601_s2 + $0x390] sm:$0xff]  }
  0xe9   : > { %8563 = vmatpush3.bf16.msra.mxu0 %v9439_v1  ;;  %v10548_v62 = vld [vmem:[#allocation2 + $0x130] sm:$0xff]  ;;  %v928_v34 = vmul.bf16 %v10552_v33, %v916_v29  ;;  %1453 = vperm.xlu0 %9306, %v10611_v14   ;;  %v9464_v29 = vld [vmem:[%s12601_s2 + $0x478] sm:$0xff]  }
  0xea   : > { %8592 = vmatprep.subr.bf16.mxu0 %v9442_v19  ;;  %1126 = vperm.xlu1 %9285, %v10214_v50   ;;  %v642_v37 = vmul.bf16 %v10552_v33, %v630_v31  ;;  %v7868_v38 = vcombine.high %v10539_v27, %v10548_v62  ;;  %v9448_v50 = vld [vmem:[%s12601_s2 + $0x358] sm:$0xff]   ;;  %v9461_v19 = vld [vmem:[%s12601_s2 + $0x300] sm:$0xff]  }
  0xeb   : > { %8575 = vmatpush3.bf16.msra.mxu1 %v9441_v18  ;;  %930 = vst [vmem:[#allocation2 + $0x68] sm:$0xf] %v928_v34  ;;  %v945_v40 = vpop.permute.xlu0 %944  ;;  %v9922_v18 = vmov 37   ;;  %v9465_v31 = vld [vmem:[%s12601_s2 + $0x438] sm:$0xff]  }
  0xec   : > { %6694 = vmatmul.mubr.bf16.vlgmr.msra.gmra.mxu0 %v7865_v32  ;;  %8576 = vmatprep.subr.bf16.mxu1 %v9444_v24  ;;  %644 = vst [vmem:[#allocation2 + $0x3c] sm:$0xf] %v642_v37  ;;  %v648_v42 = vpop.permute.xlu1 %647  ;;  %v953_v43 = vrot.slane %v945_v40, %v10174_v15  ;;  %v9462_v24 = vld [vmem:[%s12601_s2 + $0x3d0] sm:$0xff]   ;;  %v9466_v32 = vld [vmem:[%s12601_s2 + $0x3c8] sm:$0xff]   ;;  %v7867_v37 = vcombine.low %v10539_v27, %v10548_v62  ;;  %v9470_v27 = vld [vmem:[%s12601_s2 + $0x3c0] sm:$0xff]  }
  0xed   : > { %8593 = vmatpush3.bf16.msra.mxu0 %v9443_v22  ;;  %6734 = vmatprep.mubr.bf16.mxu1 %v7868_v38  ;;  %v656_v6 = vrot.slane %v648_v42, %v10174_v15  ;;  %v9467_v40 = vld [vmem:[%s12601_s2 + $0x388] sm:$0xff]   ;;  %v9469_v42 = vld [vmem:[%s12601_s2 + $0x430] sm:$0xff]  }
  0xee   : > { %8594 = vmatprep.subr.bf16.mxu0 %v9446_v30  ;;  %9287 = vset.pattern.permute.xlu1 %v9910_v35  ;;  %v955_v11 = vmul.bf16 %v10519_v13, %v953_v43  ;;  %v9452_v35 = vld [vmem:[%s12601_s2 + $0x350] sm:$0xff]   ;;  %v10597_v55 = vld [vmem:[#allocation2 + $0x138] sm:$0xff] }
  0xef   : > { %8577 = vmatpush3.bf16.msra.mxu1 %v9445_v36  ;;  %1152 = vperm.xlu1 %9287, %v10581_v47   ;;  %v668_v9 = vmul.bf16 %v10552_v33, %v656_v6  ;;  %v9468_v36 = vld [vmem:[%s12601_s2 + $0x470] sm:$0xff]  }
  0xf0   : > { %8578 = vmatprep.subr.bf16.mxu1 %v9448_v50  ;;  %v659_v3 = vpop.permute.xlu1 %658  ;;  %957 = vst [vmem:[#allocation2 + $0x16c] sm:$0xf] %v955_v11  ;;  %v986_v51 = vpop.permute.xlu0 %985  ;;  %v9474_v11 = vld [vmem:[%s12601_s2 + $0x4f8] sm:$0xff]  }
  0xf1   : > { %8595 = vmatpush3.bf16.msra.mxu0 %v9447_v41  ;;  %670 = vst [vmem:[#allocation2 + $0x40] sm:$0xf] %v668_v9  ;;  %v667_v53 = vrot.slane %v659_v3, %v10174_v15  ;;  %v994_v0 = vrot.slane %v986_v51, %v10174_v15  ;;  %v9924_v9 = vmov 48   ;;  %v9476_v51 = vld [vmem:[%s12601_s2 + $0x460] sm:$0xff]  }
  0xf2   : > { %8596 = vmatprep.subr.bf16.mxu0 %v9450_v44  ;;  %9309 = vset.pattern.permute.xlu0 %v9924_v9 }
  0xf3   : > { %8579 = vmatpush3.bf16.msra.mxu1 %v9449_v45  ;;  %9288 = vset.pattern.permute.xlu1 %v9911_v57  ;;  %v669_v60 = vmul.bf16 %v10519_v13, %v667_v53  ;;  %v10608_v58 = vld [vmem:[#allocation2 + $0x38] sm:$0xff]  ;;  %v1006_v16 = vmul.bf16 %v10552_v33, %v994_v0  ;;  %v9457_v57 = vld [vmem:[%s12601_s2 + $0x308] sm:$0xff]   ;;  %v9471_v45 = vld [vmem:[%s12601_s2 + $0x380] sm:$0xff]  }
  0xf4   : > { %8580 = vmatprep.subr.bf16.mxu1 %v9452_v35  ;;  %1167 = vperm.xlu1 %9288, %v10611_v14   ;;  %v7870_v23 = vcombine.high %v10608_v58, %v10597_v55  ;;  %v9475_v53 = vld [vmem:[%s12601_s2 + $0x4b8] sm:$0xff]  }
  0xf5   : > { %8597 = vmatpush3.bf16.msra.mxu0 %v9451_v46  ;;  %671 = vst [vmem:[#allocation2 + $0x140] sm:$0xf] %v669_v60  ;;  %v685_v2 = vpop.permute.xlu1 %684  ;;  %1008 = vst [vmem:[#allocation2 + $0x74] sm:$0xf] %v1006_v16  ;;  %v1023_v5 = vpop.permute.xlu0 %1022  ;;  %1490 = vperm.xlu0 %9309, %v10581_v47  }
  0xf6   : > { %8598 = vmatprep.subr.bf16.mxu0 %v9454_v49  ;;  %v693_v1 = vrot.slane %v685_v2, %v10174_v15  ;;  %6775 = vmatprep.mubr.bf16.mxu0 %v7870_v23  ;;  %v1031_v12 = vrot.slane %v1023_v5, %v10174_v15  ;;  %v9481_v2 = vld [vmem:[%s12601_s2 + $0x418] sm:$0xff]   ;;  %v9482_v5 = vld [vmem:[%s12601_s2 + $0x4e8] sm:$0xff]  }
  0xf7   : > { %8581 = vmatpush3.bf16.msra.mxu1 %v9453_v48  ;;  %v9473_v48 = vld [vmem:[%s12601_s2 + $0x428] sm:$0xff]  }
  0xf8   : > { %8582 = vmatprep.subr.bf16.mxu1 %v9456_v59  ;;  %9290 = vset.pattern.permute.xlu1 %v9922_v18  ;;  %v695_v20 = vmul.bf16 %v10519_v13, %v693_v1  ;;  %v1033_v22 = vmul.bf16 %v10519_v13, %v1031_v12  ;;  %v10662_v50 = vld [vmem:[#allocation2 + $0x40] sm:$0xff]  ;;  %v9478_v59 = vld [vmem:[%s12601_s2 + $0x4f0] sm:$0xff]  }
  0xf9   : > { %8599 = vmatpush3.bf16.msra.mxu0 %v9455_v56  ;;  %1193 = vperm.xlu1 %9290, %v10611_v14   ;;  %v9484_v18 = vld [vmem:[%s12601_s2 + $0x450] sm:$0xff]  }
  0xfa   : > { %8600 = vmatprep.subr.bf16.mxu0 %v9458_v63  ;;  %697 = vst [vmem:[#allocation2 + $0x144] sm:$0xf] %v695_v20  ;;  %v700_v28 = vpop.permute.xlu1 %699  ;;  %1035 = vst [vmem:[#allocation2 + $0x178] sm:$0xf] %v1033_v22  ;;  %v1064_v35 = vpop.permute.xlu0 %1063  ;;  %v9483_v22 = vld [vmem:[%s12601_s2 + $0x4a8] sm:$0xff]  }
  0xfb   : > { %8583 = vmatpush3.bf16.msra.mxu1 %v9457_v57  ;;  %v708_v30 = vrot.slane %v700_v28, %v10174_v15  ;;  %v1072_v3 = vrot.slane %v1064_v35, %v10174_v15  ;;  %v9477_v57 = vld [vmem:[%s12601_s2 + $0x420] sm:$0xff]   ;;  %v9495_v35 = vld [vmem:[%s12601_s2 + $0x490] sm:$0xff]  }
  0xfc   : > { %8584 = vmatprep.subr.bf16.mxu1 %v9460_v17  ;;  %v9486_v28 = vld [vmem:[%s12601_s2 + $0x4e0] sm:$0xff]  }
  0xfd   : > { %8601 = vmatpush3.bf16.msra.mxu0 %v9459_v7  ;;  %1204 = vperm.xlu1 %9290, %v10581_v47   ;;  %v720_v34 = vmul.bf16 %v10552_v33, %v708_v30  ;;  %v1084_v56 = vmul.bf16 %v10552_v33, %v1072_v3  ;;  %v9925_v7 = vmov 40  }
  0xfe   : > { %8602 = vmatprep.subr.bf16.mxu0 %v9462_v24 }
  0xff   : > { %8585 = vmatpush3.bf16.msra.mxu1 %v9461_v19  ;;  %722 = vst [vmem:[#allocation2 + $0x48] sm:$0xf] %v720_v34  ;;  %v726_v38 = vpop.permute.xlu1 %725  ;;  %v1101_v16 = vpop.permute.xlu0 %1100  ;;  %1086 = vst [vmem:[#allocation2 + $0x80] sm:$0xf] %v1084_v56  ;;  %v9499_v56 = vld [vmem:[%s12601_s2 + $0x488] sm:$0xff]  }
 0x100   : > { %8614 = vmatprep.subr.bf16.mxu1 %v9464_v29  ;;  %v734_v41 = vrot.slane %v726_v38, %v10174_v15  ;;  %v1109_v23 = vrot.slane %v1101_v16, %v10174_v15  ;;  %v9485_v29 = vld [vmem:[%s12601_s2 + $0x410] sm:$0xff]  }
 0x101   : > { %8603 = vmatpush3.bf16.msra.mxu0 %v9463_v26  ;;  %9292 = vset.pattern.permute.xlu1 %v9913_v54  ;;  %v10672_v62 = vld [vmem:[#allocation2 + $0x140] sm:$0xff]  ;;  %v9472_v54 = vld [vmem:[%s12601_s2 + $0x468] sm:$0xff]   ;;  %v9500_v16 = vld [vmem:[%s12601_s2 + $0x570] sm:$0xff]  }
 0x102   : > { %6735 = vmatmul.mubr.bf16.vlgmr.msra.gmra.mxu1 %v7867_v37  ;;  %8604 = vmatprep.subr.bf16.mxu0 %v9466_v32  ;;  %v746_v43 = vmul.bf16 %v10552_v33, %v734_v41  ;;  %v7872_v44 = vcombine.high %v10662_v50, %v10672_v62  ;;  %v1111_v1 = vmul.bf16 %v10519_v13, %v1109_v23  ;;  %v9489_v37 = vld [vmem:[%s12601_s2 + $0x408] sm:$0xff]   ;;  %v9501_v23 = vld [vmem:[%s12601_s2 + $0x530] sm:$0xff]  }
 0x103   : > { %8615 = vmatpush3.bf16.msra.mxu1 %v9465_v31  ;;  %1230 = vperm.xlu1 %9292, %v10581_v47   ;;  %v737_v6 = vpop.permute.xlu1 %736  ;;  %v9488_v31 = vld [vmem:[%s12601_s2 + $0x448] sm:$0xff]  }
 0x104   : > { %8616 = vmatprep.subr.bf16.mxu1 %v9468_v36  ;;  %748 = vst [vmem:[#allocation2 + $0x4c] sm:$0xf] %v746_v43  ;;  %v745_v46 = vrot.slane %v737_v6, %v10174_v15  ;;  %6816 = vmatprep.mubr.bf16.mxu1 %v7872_v44  ;;  %1113 = vst [vmem:[#allocation2 + $0x184] sm:$0xf] %v1111_v1  ;;  %v1142_v34 = vpop.permute.xlu0 %1141  ;;  %v9487_v36 = vld [vmem:[%s12601_s2 + $0x4a0] sm:$0xff]   ;;  %v9926_v6 = vmov 50  }
 0x105   : > { %8605 = vmatpush3.bf16.msra.mxu0 %v9467_v40  ;;  %v1150_v38 = vrot.slane %v1142_v34, %v10174_v15  ;;  %v9490_v40 = vld [vmem:[%s12601_s2 + $0x4d8] sm:$0xff]   ;;  %v9492_v44 = vld [vmem:[%s12601_s2 + $0x440] sm:$0xff]   ;;  %9311 = vset.pattern.permute.xlu0 %v9926_v6  ;;  %v9505_v1 = vld [vmem:[%s12601_s2 + $0x528] sm:$0xff]   ;;  %v9929_v34 = vmov 53  }
 0x106   : > { %8606 = vmatprep.subr.bf16.mxu0 %v9470_v27  ;;  %v747_v49 = vmul.bf16 %v10519_v13, %v745_v46  ;;  %v9491_v27 = vld [vmem:[%s12601_s2 + $0x498] sm:$0xff]   ;;  %1531 = vperm.xlu0 %9311, %v10611_v14  }
 0x107   : > { %8617 = vmatpush3.bf16.msra.mxu1 %v9469_v42  ;;  %9293 = vset.pattern.permute.xlu1 %v9914_v8  ;;  %v7869_v8 = vcombine.low %v10608_v58, %v10597_v55  ;;  %v9479_v55 = vld [vmem:[%s12601_s2 + $0x4b0] sm:$0xff]   ;;  %v9480_v58 = vld [vmem:[%s12601_s2 + $0x458] sm:$0xff]   ;;  %v1162_v43 = vmul.bf16 %v10552_v33, %v1150_v38 }
 0x108   : > { %8618 = vmatprep.subr.bf16.mxu1 %v9472_v54  ;;  %1245 = vperm.xlu1 %9293, %v10611_v14   ;;  %749 = vst [vmem:[#allocation2 + $0x14c] sm:$0xf] %v747_v49  ;;  %v763_v0 = vpop.permute.xlu1 %762  ;;  %v9496_v46 = vld [vmem:[%s12601_s2 + $0x578] sm:$0xff]  }
 0x109   : > { %8607 = vmatpush3.bf16.msra.mxu0 %v9471_v45  ;;  %v771_v60 = vrot.slane %v763_v0, %v10174_v15  ;;  %1164 = vst [vmem:[#allocation2 + $0x8c] sm:$0xf] %v1162_v43  ;;  %v9494_v45 = vld [vmem:[%s12601_s2 + $0x4d0] sm:$0xff]   ;;  %v9927_v0 = vmov 51  }
 0x10a   : > { %8636 = vmatprep.subr.bf16.mxu0 %v9474_v11  ;;  %9314 = vset.pattern.permute.xlu0 %v9927_v0 }
 0x10b   : > { %8619 = vmatpush3.bf16.msra.mxu1 %v9473_v48  ;;  %v773_v63 = vmul.bf16 %v10519_v13, %v771_v60  ;;  %v10731_v12 = vld [vmem:[#allocation2 + $0x48] sm:$0xff]  ;;  %1568 = vperm.xlu0 %9314, %v10581_v47   ;;  %v7871_v60 = vcombine.low %v10662_v50, %v10672_v62  ;;  %v9502_v50 = vld [vmem:[%s12601_s2 + $0x4c0] sm:$0xff]  }
 0x10c   : > { %6776 = vmatmul.mubr.bf16.vlgmr.msra.gmra.mxu0 %v7869_v8  ;;  %8620 = vmatprep.subr.bf16.mxu1 %v9476_v51  ;;  %v9497_v51 = vld [vmem:[%s12601_s2 + $0x538] sm:$0xff]  }
 0x10d   : > { %8637 = vmatpush3.bf16.msra.mxu0 %v9475_v53  ;;  %9295 = vset.pattern.permute.xlu1 %v9925_v7  ;;  %775 = vst [vmem:[#allocation2 + $0x150] sm:$0xf] %v773_v63  ;;  %v778_v17 = vpop.permute.xlu1 %777  ;;  %v9504_v63 = vld [vmem:[%s12601_s2 + $0x568] sm:$0xff]  }
 0x10e   : > { %8638 = vmatprep.subr.bf16.mxu0 %v9478_v59  ;;  %1271 = vperm.xlu1 %9295, %v10611_v14   ;;  %v786_v19 = vrot.slane %v778_v17, %v10174_v15  ;;  %v9508_v17 = vld [vmem:[%s12601_s2 + $0x560] sm:$0xff]  }
 0x10f   : > { %8621 = vmatpush3.bf16.msra.mxu1 %v9477_v57  ;;  %v10738_v20 = vld [vmem:[#allocation2 + $0x148] sm:$0xff]  ;;  %v9928_v57 = vmov 43   ;;  %9316 = vset.pattern.permute.xlu0 %v9929_v34 }
 0x110   : > { %8622 = vmatprep.subr.bf16.mxu1 %v9480_v58  ;;  %v7874_v24 = vcombine.high %v10731_v12, %v10738_v20  ;;  %v798_v26 = vmul.bf16 %v10552_v33, %v786_v19  ;;  %v9503_v58 = vld [vmem:[%s12601_s2 + $0x480] sm:$0xff]   ;;  %1609 = vperm.xlu0 %9316, %v10611_v14  }
 0x111   : > { %8639 = vmatpush3.bf16.msra.mxu0 %v9479_v55 }
 0x112   : > { %8640 = vmatprep.subr.bf16.mxu0 %v9482_v5  ;;  %1282 = vperm.xlu1 %9295, %v10581_v47   ;;  %800 = vst [vmem:[#allocation2 + $0x54] sm:$0xf] %v798_v26  ;;  %v804_v30 = vpop.permute.xlu1 %803  ;;  %v9506_v5 = vld [vmem:[%s12601_s2 + $0x5f8] sm:$0xff]  }
 0x113   : > { %8623 = vmatpush3.bf16.msra.mxu1 %v9481_v2  ;;  %6857 = vmatprep.mubr.bf16.mxu0 %v7874_v24  ;;  %v812_v32 = vrot.slane %v804_v30, %v10174_v15  ;;  %v1179_v30 = vpop.permute.xlu0 %1178 }
 0x114   : > { %8624 = vmatprep.subr.bf16.mxu1 %v9484_v18  ;;  %v10793_v48 = vld [vmem:[#allocation2 + $0x150] sm:$0xff] }
 0x115   : > { %8641 = vmatpush3.bf16.msra.mxu0 %v9483_v22  ;;  %v824_v41 = vmul.bf16 %v10552_v33, %v812_v32  ;;  %v9507_v22 = vld [vmem:[%s12601_s2 + $0x5b8] sm:$0xff]  }
 0x116   : > { %8642 = vmatprep.subr.bf16.mxu0 %v9486_v28  ;;  %9297 = vset.pattern.permute.xlu1 %v9916_v52  ;;  %v815_v42 = vpop.permute.xlu1 %814  ;;  %v9493_v52 = vld [vmem:[%s12601_s2 + $0x400] sm:$0xff]   ;;  %v7873_v28 = vcombine.low %v10731_v12, %v10738_v20  ;;  %v9512_v12 = vld [vmem:[%s12601_s2 + $0x558] sm:$0xff]  }
 0x117   : > { %8625 = vmatpush3.bf16.msra.mxu1 %v9485_v29  ;;  %1308 = vperm.xlu1 %9297, %v10581_v47   ;;  %826 = vst [vmem:[#allocation2 + $0x58] sm:$0xf] %v824_v41  ;;  %v823_v54 = vrot.slane %v815_v42, %v10174_v15  ;;  %v9510_v29 = vld [vmem:[%s12601_s2 + $0x5f0] sm:$0xff]   ;;  %v9513_v41 = vld [vmem:[%s12601_s2 + $0x518] sm:$0xff]  }
 0x118   : > { %8626 = vmatprep.subr.bf16.mxu1 %v9488_v31  ;;  %v9509_v31 = vld [vmem:[%s12601_s2 + $0x520] sm:$0xff]   ;;  %v9516_v42 = vld [vmem:[%s12601_s2 + $0x550] sm:$0xff]  }
 0x119   : > { %8643 = vmatpush3.bf16.msra.mxu0 %v9487_v36  ;;  %v825_v11 = vmul.bf16 %v10519_v13, %v823_v54  ;;  %v10796_v3 = vld [vmem:[#allocation2 + $0x50] sm:$0xff] }
 0x11a   : > { %8644 = vmatprep.subr.bf16.mxu0 %v9490_v40  ;;  %v7876_v59 = vcombine.high %v10796_v3, %v10793_v48  ;;  %v9511_v36 = vld [vmem:[%s12601_s2 + $0x5b0] sm:$0xff]   ;;  %v9514_v40 = vld [vmem:[%s12601_s2 + $0x5e8] sm:$0xff]  }
 0x11b   : > { %8627 = vmatpush3.bf16.msra.mxu1 %v9489_v37  ;;  %9298 = vset.pattern.permute.xlu1 %v9917_v10  ;;  %827 = vst [vmem:[#allocation2 + $0x158] sm:$0xf] %v825_v11  ;;  %v841_v49 = vpop.permute.xlu1 %840  ;;  %v9498_v10 = vld [vmem:[%s12601_s2 + $0x4c8] sm:$0xff]  }
 0x11c   : > { %8628 = vmatprep.subr.bf16.mxu1 %v9492_v44  ;;  %1323 = vperm.xlu1 %9298, %v10611_v14   ;;  %v849_v53 = vrot.slane %v841_v49, %v10174_v15  ;;  %v9518_v44 = vld [vmem:[%s12601_s2 + $0x5e0] sm:$0xff]   ;;  %v9520_v11 = vld [vmem:[%s12601_s2 + $0x548] sm:$0xff]  }
 0x11d   : > { %8645 = vmatpush3.bf16.msra.mxu0 %v9491_v27 }
 0x11e   : > { %8646 = vmatprep.subr.bf16.mxu0 %v9494_v45  ;;  %v851_v8 = vmul.bf16 %v10519_v13, %v849_v53  ;;  %v10838_v7 = vld [vmem:[#allocation2 + $0x58] sm:$0xff]  ;;  %v9930_v45 = vmov 46  }
 0x11f   : > { %8629 = vmatpush3.bf16.msra.mxu1 %v9493_v52  ;;  %v9517_v52 = vld [vmem:[%s12601_s2 + $0x510] sm:$0xff]  }
 0x120   : > { %8658 = vmatprep.subr.bf16.mxu1 %v9496_v46  ;;  %9300 = vset.pattern.permute.xlu1 %v9928_v57  ;;  %853 = vst [vmem:[#allocation2 + $0x15c] sm:$0xf] %v851_v8  ;;  %v856_v55 = vpop.permute.xlu1 %855  ;;  %v9519_v46 = vld [vmem:[%s12601_s2 + $0x5a0] sm:$0xff]   ;;  %v9523_v8 = vld [vmem:[%s12601_s2 + $0x598] sm:$0xff]  }
 0x121   : > { %8647 = vmatpush3.bf16.msra.mxu0 %v9495_v35  ;;  %1349 = vperm.xlu1 %9300, %v10611_v14   ;;  %v864_v62 = vrot.slane %v856_v55, %v10174_v15  ;;  %v9526_v55 = vld [vmem:[%s12601_s2 + $0x5d0] sm:$0xff]  }
 0x122   : > { %6817 = vmatmul.mubr.bf16.vlgmr.msra.gmra.mxu1 %v7871_v60  ;;  %8648 = vmatprep.subr.bf16.mxu0 %v9498_v10  ;;  %v1220_v49 = vpop.permute.xlu0 %1219  ;;  %v9931_v10 = vmov 54  }
 0x123   : > { %8659 = vmatpush3.bf16.msra.mxu1 %v9497_v51  ;;  %6898 = vmatprep.mubr.bf16.mxu1 %v7876_v59  ;;  %v876_v2 = vmul.bf16 %v10552_v33, %v864_v62  ;;  %v9521_v51 = vld [vmem:[%s12601_s2 + $0x508] sm:$0xff]   ;;  %v1228_v53 = vrot.slane %v1220_v49, %v10174_v15  ;;  %v9542_v49 = vld [vmem:[%s12601_s2 + $0x6f0] sm:$0xff]  }
 0x124   : > { %8660 = vmatprep.subr.bf16.mxu1 %v9500_v16  ;;  %9319 = vset.pattern.permute.xlu0 %v9931_v10  ;;  %v9524_v16 = vld [vmem:[%s12601_s2 + $0x540] sm:$0xff]  }
 0x125   : > { %8649 = vmatpush3.bf16.msra.mxu0 %v9499_v56  ;;  %1360 = vperm.xlu1 %9300, %v10581_v47   ;;  %878 = vst [vmem:[#allocation2 + $0x60] sm:$0xf] %v876_v2  ;;  %v882_v19 = vpop.permute.xlu1 %881  ;;  %v9522_v56 = vld [vmem:[%s12601_s2 + $0x5d8] sm:$0xff]   ;;  %v1240_v60 = vmul.bf16 %v10552_v33, %v1228_v53  ;;  %v9934_v53 = vmov 57  }
 0x126   : > { %8650 = vmatprep.subr.bf16.mxu0 %v9502_v50  ;;  %v890_v26 = vrot.slane %v882_v19, %v10174_v15  ;;  %1646 = vperm.xlu0 %9319, %v10581_v47   ;;  %v9527_v19 = vld [vmem:[%s12601_s2 + $0x590] sm:$0xff]  }
 0x127   : > { %8661 = vmatpush3.bf16.msra.mxu1 %v9501_v23  ;;  %v10846_v18 = vld [vmem:[#allocation2 + $0x158] sm:$0xff]  ;;  %v9525_v23 = vld [vmem:[%s12601_s2 + $0x500] sm:$0xff]   ;;  %1242 = vst [vmem:[#allocation2 + $0x98] sm:$0xf] %v1240_v60 }
 0x128   : > { %8662 = vmatprep.subr.bf16.mxu1 %v9504_v63  ;;  %v7878_v24 = vcombine.high %v10838_v7, %v10846_v18  ;;  %v902_v32 = vmul.bf16 %v10552_v33, %v890_v26  ;;  %v1257_v57 = vpop.permute.xlu0 %1256 }
 0x129   : > { %8651 = vmatpush3.bf16.msra.mxu0 %v9503_v58  ;;  %9302 = vset.pattern.permute.xlu1 %v9919_v4  ;;  %v1187_v4 = vrot.slane %v1179_v30, %v10174_v15  ;;  %v1265_v62 = vrot.slane %v1257_v57, %v10174_v15  ;;  %v9528_v58 = vld [vmem:[%s12601_s2 + $0x678] sm:$0xff]   ;;  %v9532_v30 = vld [vmem:[%s12601_s2 + $0x670] sm:$0xff]  }
 0x12a   : > { %8680 = vmatprep.subr.bf16.mxu0 %v9506_v5  ;;  %1386 = vperm.xlu1 %9302, %v10581_v47   ;;  %v893_v20 = vpop.permute.xlu1 %892  ;;  %904 = vst [vmem:[#allocation2 + $0x64] sm:$0xf] %v902_v32  ;;  %v10938_v5 = vld [vmem:[%s10172_s8 + $0x4] sm:$0xf]  ;;  %v9531_v32 = vld [vmem:[%s12601_s2 + $0x588] sm:$0xff]  }
 0x12b   : > { %8663 = vmatpush3.bf16.msra.mxu1 %v9505_v1  ;;  %v901_v37 = vrot.slane %v893_v20, %v10174_v15  ;;  %v1189_v38 = vmul.bf16 %v10519_v13, %v1187_v4  ;;  %v1267_v1 = vmul.bf16 %v10938_v5, %v1265_v62  ;;  %v9538_v20 = vld [vmem:[%s12601_s2 + $0x6f8] sm:$0xff]  }
 0x12c   : > { %6858 = vmatmul.mubr.bf16.vlgmr.msra.gmra.mxu0 %v7873_v28  ;;  %8664 = vmatprep.subr.bf16.mxu1 %v9508_v17 }
 0x12d   : > { %8681 = vmatpush3.bf16.msra.mxu0 %v9507_v22  ;;  %6939 = vmatprep.mubr.bf16.mxu0 %v7878_v24  ;;  %v903_v27 = vmul.bf16 %v10519_v13, %v901_v37  ;;  %1191 = vst [vmem:[#allocation2 + $0x190] sm:$0xf] %v1189_v38  ;;  %1269 = vst [vmem:[#allocation2 + $0x19c] sm:$0xf] %v1267_v1  ;;  %v9530_v22 = vld [vmem:[%s12601_s2 + $0x5c8] sm:$0xff]   ;;  %v9551_v1 = vld [vmem:[%s12601_s2 + $0x6a0] sm:$0xff]  }
 0x12e   : > { %8682 = vmatprep.subr.bf16.mxu0 %v9510_v29  ;;  %9303 = vset.pattern.permute.xlu1 %v9921_v39  ;;  %v9515_v39 = vld [vmem:[%s12601_s2 + $0x5a8] sm:$0xff]   ;;  %v10953_v24 = vld [vmem:[%s10172_s8] sm:$0xf] }
 0x12f   : > { %8665 = vmatpush3.bf16.msra.mxu1 %v9509_v31  ;;  %1401 = vperm.xlu1 %9303, %v10611_v14   ;;  %905 = vst [vmem:[#allocation2 + $0x164] sm:$0xf] %v903_v27  ;;  %v919_v43 = vpop.permute.xlu1 %918 }
 0x130   : > { %8666 = vmatprep.subr.bf16.mxu1 %v9512_v12  ;;  %v927_v54 = vrot.slane %v919_v43, %v10174_v15  ;;  %v9535_v12 = vld [vmem:[%s12601_s2 + $0x580] sm:$0xff]  }
 0x131   : > { %8683 = vmatpush3.bf16.msra.mxu0 %v9511_v36  ;;  %v10935_v63 = vld [vmem:[#allocation2 + $0x60] sm:$0xff] }
 0x132   : > { %8684 = vmatprep.subr.bf16.mxu0 %v9514_v40  ;;  %v929_v35 = vmul.bf16 %v10519_v13, %v927_v54  ;;  %v9932_v40 = vmov 56   ;;  %v9933_v54 = vmov 49  }
 0x133   : > { %8667 = vmatpush3.bf16.msra.mxu1 %v9513_v41  ;;  %9305 = vset.pattern.permute.xlu1 %v9930_v45 }
 0x134   : > { %8668 = vmatprep.subr.bf16.mxu1 %v9516_v42  ;;  %1427 = vperm.xlu1 %9305, %v10611_v14   ;;  %931 = vst [vmem:[#allocation2 + $0x168] sm:$0xf] %v929_v35  ;;  %v934_v13 = vpop.permute.xlu1 %933  ;;  %v9537_v42 = vld [vmem:[%s12601_s2 + $0x628] sm:$0xff]   ;;  %v7877_v35 = vcombine.low %v10838_v7, %v10846_v18  ;;  %v9544_v7 = vld [vmem:[%s12601_s2 + $0x658] sm:$0xff]  }
 0x135   : > { %8685 = vmatpush3.bf16.msra.mxu0 %v9515_v39  ;;  %v942_v59 = vrot.slane %v934_v13, %v10174_v15  ;;  %9321 = vset.pattern.permute.xlu0 %v9932_v40  ;;  %v11024_v13 = vld [vmem:[%s9990_s25 + $0x4] sm:$0xf] }
 0x136   : > { %8686 = vmatprep.subr.bf16.mxu0 %v9518_v44  ;;  %1687 = vperm.xlu0 %9321, %v10611_v14   ;;  %v9540_v44 = vld [vmem:[%s12601_s2 + $0x660] sm:$0xff]  }
 0x137   : > { %8669 = vmatpush3.bf16.msra.mxu1 %v9517_v52  ;;  %v954_v50 = vmul.bf16 %v10552_v33, %v942_v59  ;;  %v10941_v33 = vld [vmem:[#allocation2 + $0x160] sm:$0xff]  ;;  %v1298_v27 = vpop.permute.xlu0 %1297  ;;  %v9546_v59 = vld [vmem:[%s12601_s2 + $0x6e8] sm:$0xff]  }
 0x138   : > { %8670 = vmatprep.subr.bf16.mxu1 %v9520_v11  ;;  %1438 = vperm.xlu1 %9305, %v10581_v47   ;;  %v7880_v28 = vcombine.high %v10935_v63, %v10941_v33  ;;  %v1306_v43 = vrot.slane %v1298_v27, %v10174_v15  ;;  %v9936_v27 = vmov 52  }
 0x139   : > { %8687 = vmatpush3.bf16.msra.mxu0 %v9519_v46  ;;  %956 = vst [vmem:[#allocation2 + $0x6c] sm:$0xf] %v954_v50  ;;  %v11009_v46 = vld [vmem:[%s9990_s25] sm:$0xf]  ;;  %v9549_v50 = vld [vmem:[%s12601_s2 + $0x610] sm:$0xff]  }
 0x13a   : > { %8688 = vmatprep.subr.bf16.mxu0 %v9522_v56  ;;  %v960_v2 = vpop.permute.xlu1 %959  ;;  %v1318_v11 = vmul.bf16 %v10953_v24, %v1306_v43  ;;  %9324 = vset.pattern.permute.xlu0 %v9934_v53  ;;  %v9541_v56 = vld [vmem:[%s12601_s2 + $0x620] sm:$0xff]   ;;  %v9562_v43 = vld [vmem:[%s12601_s2 + $0x6c8] sm:$0xff]  }
 0x13b   : > { %8671 = vmatpush3.bf16.msra.mxu1 %v9521_v51  ;;  %v968_v17 = vrot.slane %v960_v2, %v10174_v15  ;;  %v10989_v38 = vld [vmem:[#allocation2 + $0x168] sm:$0xff]  ;;  %1724 = vperm.xlu0 %9324, %v11024_v13  }
 0x13c   : > { %8672 = vmatprep.subr.bf16.mxu1 %v9524_v16  ;;  %9307 = vset.pattern.permute.xlu1 %v9923_v25  ;;  %v9529_v25 = vld [vmem:[%s12601_s2 + $0x638] sm:$0xff]   ;;  %1320 = vst [vmem:[#allocation2 + $0xa4] sm:$0xf] %v1318_v11  ;;  %v9565_v11 = vld [vmem:[%s12601_s2 + $0x730] sm:$0xff]  }
 0x13d   : > { %8689 = vmatpush3.bf16.msra.mxu0 %v9523_v8  ;;  %1464 = vperm.xlu1 %9307, %v10581_v47   ;;  %v980_v26 = vmul.bf16 %v10953_v24, %v968_v17  ;;  %v7875_v47 = vcombine.low %v10796_v3, %v10793_v48  ;;  %v9533_v48 = vld [vmem:[%s12601_s2 + $0x630] sm:$0xff]   ;;  %v9534_v3 = vld [vmem:[%s12601_s2 + $0x5c0] sm:$0xff]   ;;  %v9545_v16 = vld [vmem:[%s12601_s2 + $0x618] sm:$0xff]  }
 0x13e   : > { %8690 = vmatprep.subr.bf16.mxu0 %v9526_v55  ;;  %v971_v29 = vpop.permute.xlu1 %970  ;;  %v9543_v8 = vld [vmem:[%s12601_s2 + $0x6b0] sm:$0xff]  }
 0x13f   : > { %8673 = vmatpush3.bf16.msra.mxu1 %v9525_v23  ;;  %982 = vst [vmem:[#allocation2 + $0x70] sm:$0xf] %v980_v26  ;;  %v979_v31 = vrot.slane %v971_v29, %v10174_v15  ;;  %v9547_v23 = vld [vmem:[%s12601_s2 + $0x6a8] sm:$0xff]   ;;  %v9548_v55 = vld [vmem:[%s12601_s2 + $0x650] sm:$0xff]   ;;  %v9555_v29 = vld [vmem:[%s12601_s2 + $0x698] sm:$0xff]  }
 0x140   : > { %8702 = vmatprep.subr.bf16.mxu1 %v9528_v58  ;;  %v10992_v41 = vld [vmem:[#allocation2 + $0x68] sm:$0xff]  ;;  %v9550_v58 = vld [vmem:[%s12601_s2 + $0x6e0] sm:$0xff]  }
 0x141   : > { %8691 = vmatpush3.bf16.msra.mxu0 %v9527_v19  ;;  %9308 = vset.pattern.permute.xlu1 %v9924_v9  ;;  %v981_v4 = vmul.bf16 %v10938_v5, %v979_v31  ;;  %v9536_v9 = vld [vmem:[%s12601_s2 + $0x668] sm:$0xff]   ;;  %v7882_v52 = vcombine.high %v10992_v41, %v10989_v38  ;;  %v9556_v31 = vld [vmem:[%s12601_s2 + $0x640] sm:$0xff]  }
 0x142   : > { %6899 = vmatmul.mubr.bf16.vlgmr.msra.gmra.mxu1 %v7875_v47  ;;  %8692 = vmatprep.subr.bf16.mxu0 %v9530_v22  ;;  %v9552_v19 = vld [vmem:[%s12601_s2 + $0x648] sm:$0xff]   ;;  %v1335_v22 = vpop.permute.xlu0 %1334 }
 0x143   : > { %8703 = vmatpush3.bf16.msra.mxu1 %v9529_v25  ;;  %6980 = vmatprep.mubr.bf16.mxu1 %v7880_v28  ;;  %983 = vst [vmem:[#allocation2 + $0x170] sm:$0xf] %v981_v4  ;;  %v1343_v25 = vrot.slane %v1335_v22, %v10174_v15  ;;  %v9554_v28 = vld [vmem:[%s12601_s2 + $0x6d8] sm:$0xff]   ;;  %v9573_v22 = vld [vmem:[%s12601_s2 + $0x720] sm:$0xff]  }
 0x144   : > { %8704 = vmatprep.subr.bf16.mxu1 %v9532_v30  ;;  %v997_v36 = vpop.permute.xlu1 %996  ;;  %1479 = vperm.xlu1 %9308, %v10611_v14   ;;  %v9539_v14 = vld [vmem:[%s12601_s2 + $0x6b8] sm:$0xff]  }
 0x145   : > { %8693 = vmatpush3.bf16.msra.mxu0 %v9531_v32  ;;  %v1005_v37 = vrot.slane %v997_v36, %v10174_v15  ;;  %v1345_v30 = vmul.bf16 %v10938_v5, %v1343_v25  ;;  %v9560_v4 = vld [vmem:[%s12601_s2 + $0x778] sm:$0xff]  }
 0x146   : > { %8694 = vmatprep.subr.bf16.mxu0 %v9534_v3  ;;  %v9935_v3 = vmov 59  }
 0x147   : > { %8705 = vmatpush3.bf16.msra.mxu1 %v9533_v48  ;;  %v1007_v39 = vmul.bf16 %v10938_v5, %v1005_v37  ;;  %v9557_v48 = vld [vmem:[%s12601_s2 + $0x600] sm:$0xff]   ;;  %1347 = vst [vmem:[#allocation2 + $0x1a8] sm:$0xf] %v1345_v30  ;;  %9326 = vset.pattern.permute.xlu0 %v9935_v3 }
 0x148   : > { %8706 = vmatprep.subr.bf16.mxu1 %v9536_v9  ;;  %9310 = vset.pattern.permute.xlu1 %v9933_v54  ;;  %v9559_v9 = vld [vmem:[%s12601_s2 + $0x690] sm:$0xff]  }
 0x149   : > { %8695 = vmatpush3.bf16.msra.mxu0 %v9535_v12  ;;  %1009 = vst [vmem:[#allocation2 + $0x174] sm:$0xf] %v1007_v39  ;;  %v1012_v45 = vpop.permute.xlu1 %1011  ;;  %1505 = vperm.xlu1 %9310, %v11009_v46  }
 0x14a   : > { %8724 = vmatprep.subr.bf16.mxu0 %v9538_v20  ;;  %v1020_v51 = vrot.slane %v1012_v45, %v10174_v15  ;;  %1765 = vperm.xlu0 %9326, %v11009_v46   ;;  %v11097_v20 = vld [vmem:[#allocation2 + $0x70] sm:$0xff] }
 0x14b   : > { %8707 = vmatpush3.bf16.msra.mxu1 %v9537_v42  ;;  %v9561_v42 = vld [vmem:[%s12601_s2 + $0x738] sm:$0xff]   ;;  %v9564_v45 = vld [vmem:[%s12601_s2 + $0x770] sm:$0xff]  }
 0x14c   : > { %6940 = vmatmul.mubr.bf16.vlgmr.msra.gmra.mxu0 %v7877_v35  ;;  %8708 = vmatprep.subr.bf16.mxu1 %v9540_v44  ;;  %v1032_v18 = vmul.bf16 %v10953_v24, %v1020_v51  ;;  %v9563_v44 = vld [vmem:[%s12601_s2 + $0x688] sm:$0xff]  }
 0x14d   : > { %8725 = vmatpush3.bf16.msra.mxu0 %v9539_v14  ;;  %7021 = vmatprep.mubr.bf16.mxu0 %v7882_v52  ;;  %v7879_v52 = vcombine.low %v10935_v63, %v10941_v33  ;;  %v9566_v63 = vld [vmem:[%s12601_s2 + $0x6c0] sm:$0xff]   ;;  %v9568_v51 = vld [vmem:[%s12601_s2 + $0x768] sm:$0xff]  }
 0x14e   : > { %8726 = vmatprep.subr.bf16.mxu0 %v9542_v49  ;;  %1034 = vst [vmem:[#allocation2 + $0x78] sm:$0xf] %v1032_v18  ;;  %v1038_v60 = vpop.permute.xlu1 %1037  ;;  %1516 = vperm.xlu1 %9310, %v11024_v13   ;;  %v9567_v49 = vld [vmem:[%s12601_s2 + $0x680] sm:$0xff]   ;;  %v9937_v18 = vmov 60  }
 0x14f   : > { %8709 = vmatpush3.bf16.msra.mxu1 %v9541_v56  ;;  %v1046_v57 = vrot.slane %v1038_v60, %v10174_v15  ;;  %v9570_v56 = vld [vmem:[%s12601_s2 + $0x7f8] sm:$0xff]   ;;  %9329 = vset.pattern.permute.xlu0 %v9937_v18 }
 0x150   : > { %8710 = vmatprep.subr.bf16.mxu1 %v9544_v7  ;;  %v11099_v36 = vld [vmem:[#allocation2 + $0x170] sm:$0xff]  ;;  %1802 = vperm.xlu0 %9329, %v11024_v13  }
 0x151   : > { %8727 = vmatpush3.bf16.msra.mxu0 %v9543_v8  ;;  %v1058_v62 = vmul.bf16 %v10953_v24, %v1046_v57  ;;  %v7884_v54 = vcombine.high %v11097_v20, %v11099_v36  ;;  %v1376_v57 = vpop.permute.xlu0 %1375 }
 0x152   : > { %8728 = vmatprep.subr.bf16.mxu0 %v9546_v59  ;;  %v1049_v2 = vpop.permute.xlu1 %1048  ;;  %9312 = vset.pattern.permute.xlu1 %v9926_v6  ;;  %v9553_v6 = vld [vmem:[%s12601_s2 + $0x608] sm:$0xff]  }
 0x153   : > { %8711 = vmatpush3.bf16.msra.mxu1 %v9545_v16  ;;  %1060 = vst [vmem:[#allocation2 + $0x7c] sm:$0xf] %v1058_v62  ;;  %v1057_v17 = vrot.slane %v1049_v2, %v10174_v15  ;;  %1542 = vperm.xlu1 %9312, %v11024_v13   ;;  %v9571_v62 = vld [vmem:[%s12601_s2 + $0x7b8] sm:$0xff]  }
 0x154   : > { %8712 = vmatprep.subr.bf16.mxu1 %v9548_v55  ;;  %v1384_v55 = vrot.slane %v1376_v57, %v10174_v15  ;;  %v9591_v57 = vld [vmem:[%s12601_s2 + $0x790] sm:$0xff]  }
 0x155   : > { %8729 = vmatpush3.bf16.msra.mxu0 %v9547_v23  ;;  %v1059_v26 = vmul.bf16 %v10938_v5, %v1057_v17  ;;  %v9569_v23 = vld [vmem:[%s12601_s2 + $0x728] sm:$0xff]   ;;  %v9574_v17 = vld [vmem:[%s12601_s2 + $0x7f0] sm:$0xff]  }
 0x156   : > { %8730 = vmatprep.subr.bf16.mxu0 %v9550_v58  ;;  %v1396_v2 = vmul.bf16 %v10953_v24, %v1384_v55 }
 0x157   : > { %8713 = vmatpush3.bf16.msra.mxu1 %v9549_v50  ;;  %1061 = vst [vmem:[#allocation2 + $0x17c] sm:$0xf] %v1059_v26  ;;  %v1075_v47 = vpop.permute.xlu1 %1074  ;;  %9313 = vset.pattern.permute.xlu1 %v9927_v0  ;;  %v9558_v0 = vld [vmem:[%s12601_s2 + $0x6d0] sm:$0xff]  }
 0x158   : > { %8714 = vmatprep.subr.bf16.mxu1 %v9552_v19  ;;  %v1083_v32 = vrot.slane %v1075_v47, %v10174_v15  ;;  %1557 = vperm.xlu1 %9313, %v11009_v46   ;;  %1398 = vst [vmem:[#allocation2 + $0xb0] sm:$0xf] %v1396_v2  ;;  %v9577_v47 = vld [vmem:[%s12601_s2 + $0x718] sm:$0xff]   ;;  %v9595_v2 = vld [vmem:[%s12601_s2 + $0x788] sm:$0xff]  }
 0x159   : > { %8731 = vmatpush3.bf16.msra.mxu0 %v9551_v1  ;;  %v7881_v1 = vcombine.low %v10992_v41, %v10989_v38  ;;  %v9576_v41 = vld [vmem:[%s12601_s2 + $0x758] sm:$0xff]  }
 0x15a   : > { %8732 = vmatprep.subr.bf16.mxu0 %v9554_v28  ;;  %v1085_v12 = vmul.bf16 %v10938_v5, %v1083_v32  ;;  %v11139_v8 = vld [vmem:[#allocation2 + $0x78] sm:$0xff]  ;;  %v1413_v38 = vpop.permute.xlu0 %1412  ;;  %v9578_v28 = vld [vmem:[%s12601_s2 + $0x7e8] sm:$0xff]   ;;  %v9580_v32 = vld [vmem:[%s12601_s2 + $0x750] sm:$0xff]  }
 0x15b   : > { %8715 = vmatpush3.bf16.msra.mxu1 %v9553_v6  ;;  %v1421_v26 = vrot.slane %v1413_v38, %v10174_v15  ;;  %v9602_v38 = vld [vmem:[%s12601_s2 + $0x8f8] sm:$0xff]  }
 0x15c   : > { %8716 = vmatprep.subr.bf16.mxu1 %v9556_v31  ;;  %1087 = vst [vmem:[#allocation2 + $0x180] sm:$0xf] %v1085_v12  ;;  %v1090_v37 = vpop.permute.xlu1 %1089  ;;  %9315 = vset.pattern.permute.xlu1 %v9936_v27  ;;  %v9938_v31 = vmov 55  }
 0x15d   : > { %8733 = vmatpush3.bf16.msra.mxu0 %v9555_v29  ;;  %v1098_v39 = vrot.slane %v1090_v37, %v10174_v15  ;;  %1583 = vperm.xlu1 %9315, %v11009_v46   ;;  %v1423_v29 = vmul.bf16 %v10938_v5, %v1421_v26  ;;  %v9584_v37 = vld [vmem:[%s12601_s2 + $0x748] sm:$0xff]   ;;  %v9941_v26 = vmov 58  }
 0x15e   : > { %8734 = vmatprep.subr.bf16.mxu0 %v9558_v0  ;;  %v11142_v60 = vld [vmem:[#allocation2 + $0x178] sm:$0xff]  ;;  %v9579_v0 = vld [vmem:[%s12601_s2 + $0x7a8] sm:$0xff]  }
 0x15f   : > { %8717 = vmatpush3.bf16.msra.mxu1 %v9557_v48  ;;  %v1110_v14 = vmul.bf16 %v10953_v24, %v1098_v39  ;;  %v7886_v58 = vcombine.high %v11139_v8, %v11142_v60  ;;  %1425 = vst [vmem:[#allocation2 + $0x1b4] sm:$0xf] %v1423_v29  ;;  %v9601_v29 = vld [vmem:[%s12601_s2 + $0x828] sm:$0xff]  }
 0x160   : > { %8746 = vmatprep.subr.bf16.mxu1 %v9560_v4  ;;  %v9582_v4 = vld [vmem:[%s12601_s2 + $0x7e0] sm:$0xff]  }
 0x161   : > { %8735 = vmatpush3.bf16.msra.mxu0 %v9559_v9  ;;  %1112 = vst [vmem:[#allocation2 + $0x84] sm:$0xf] %v1110_v14  ;;  %v1116_v35 = vpop.permute.xlu1 %1115  ;;  %1594 = vperm.xlu1 %9315, %v11024_v13   ;;  %v9581_v9 = vld [vmem:[%s12601_s2 + $0x710] sm:$0xff]   ;;  %v9939_v14 = vmov 62  }
 0x162   : > { %6981 = vmatmul.mubr.bf16.vlgmr.msra.gmra.mxu1 %v7879_v52  ;;  %8736 = vmatprep.subr.bf16.mxu0 %v9562_v43  ;;  %v1124_v33 = vrot.slane %v1116_v35, %v10174_v15  ;;  %v9585_v43 = vld [vmem:[%s12601_s2 + $0x708] sm:$0xff]   ;;  %v9587_v52 = vld [vmem:[%s12601_s2 + $0x798] sm:$0xff]   ;;  %v9588_v35 = vld [vmem:[%s12601_s2 + $0x740] sm:$0xff]  }
 0x163   : > { %8747 = vmatpush3.bf16.msra.mxu1 %v9561_v42  ;;  %7062 = vmatprep.mubr.bf16.mxu1 %v7884_v54  ;;  %v9583_v42 = vld [vmem:[%s12601_s2 + $0x7a0] sm:$0xff]  }
 0x164   : > { %8748 = vmatprep.subr.bf16.mxu1 %v9564_v45  ;;  %v1136_v7 = vmul.bf16 %v10953_v24, %v1124_v33  ;;  %v1454_v54 = vpop.permute.xlu0 %1453  ;;  %9331 = vset.pattern.permute.xlu0 %v9939_v14  ;;  %v9589_v33 = vld [vmem:[%s12601_s2 + $0x700] sm:$0xff]  }
 0x165   : > { %8737 = vmatpush3.bf16.msra.mxu0 %v9563_v44  ;;  %v1127_v59 = vpop.permute.xlu1 %1126  ;;  %9317 = vset.pattern.permute.xlu1 %v9929_v34  ;;  %v9572_v34 = vld [vmem:[%s12601_s2 + $0x760] sm:$0xff]   ;;  %v9586_v44 = vld [vmem:[%s12601_s2 + $0x7d8] sm:$0xff]  }
 0x166   : > { %8738 = vmatprep.subr.bf16.mxu0 %v9566_v63  ;;  %1138 = vst [vmem:[#allocation2 + $0x88] sm:$0xf] %v1136_v7  ;;  %v1135_v16 = vrot.slane %v1127_v59, %v10174_v15  ;;  %1620 = vperm.xlu1 %9317, %v11024_v13   ;;  %v11239_v7 = vld [vmem:[#allocation2 + $0x180] sm:$0xff] }
 0x167   : > { %8749 = vmatpush3.bf16.msra.mxu1 %v9565_v11  ;;  %v1462_v11 = vrot.slane %v1454_v54, %v10174_v15  ;;  %1843 = vperm.xlu0 %9331, %v11009_v46   ;;  %v9611_v54 = vld [vmem:[%s12601_s2 + $0x8a8] sm:$0xff]  }
 0x168   : > { %8750 = vmatprep.subr.bf16.mxu1 %v9568_v51  ;;  %v1137_v50 = vmul.bf16 %v10938_v5, %v1135_v16  ;;  %v11242_v16 = vld [vmem:[#allocation2 + $0x80] sm:$0xff] }
 0x169   : > { %8739 = vmatpush3.bf16.msra.mxu0 %v9567_v49  ;;  %v9590_v49 = vld [vmem:[%s12601_s2 + $0x7d0] sm:$0xff]  }
 0x16a   : > { %8768 = vmatprep.subr.bf16.mxu0 %v9570_v56  ;;  %1139 = vst [vmem:[#allocation2 + $0x188] sm:$0xf] %v1137_v50  ;;  %v1153_v19 = vpop.permute.xlu1 %1152  ;;  %9318 = vset.pattern.permute.xlu1 %v9931_v10  ;;  %v9575_v10 = vld [vmem:[%s12601_s2 + $0x7b0] sm:$0xff]   ;;  %v1474_v56 = vmul.bf16 %v10953_v24, %v1462_v11  ;;  %v7888_v50 = vcombine.high %v11242_v16, %v11239_v7  ;;  %v9614_v11 = vld [vmem:[%s12601_s2 + $0x8e0] sm:$0xff]  }
 0x16b   : > { %8751 = vmatpush3.bf16.msra.mxu1 %v9569_v23  ;;  %v1161_v6 = vrot.slane %v1153_v19, %v10174_v15  ;;  %1635 = vperm.xlu1 %9318, %v11009_v46   ;;  %v9594_v23 = vld [vmem:[%s12601_s2 + $0x7c8] sm:$0xff]  }
 0x16c   : > { %7022 = vmatmul.mubr.bf16.vlgmr.msra.gmra.mxu0 %v7881_v1  ;;  %8752 = vmatprep.subr.bf16.mxu1 %v9572_v34  ;;  %1476 = vst [vmem:[#allocation2 + $0xbc] sm:$0xf] %v1474_v56  ;;  %v9593_v34 = vld [vmem:[%s12601_s2 + $0x838] sm:$0xff]   ;;  %v9596_v1 = vld [vmem:[%s12601_s2 + $0x870] sm:$0xff]   ;;  %v11356_v56 = vld [vmem:[%s10172_s8 + $0x4] sm:$0xf] }
 0x16d   : > { %8769 = vmatpush3.bf16.msra.mxu0 %v9571_v62  ;;  %7103 = vmatprep.mubr.bf16.mxu0 %v7886_v58  ;;  %v1163_v25 = vmul.bf16 %v10938_v5, %v1161_v6  ;;  %v9940_v58 = vmov 63  }
 0x16e   : > { %8770 = vmatprep.subr.bf16.mxu0 %v9574_v17  ;;  %9334 = vset.pattern.permute.xlu0 %v9940_v58  ;;  %v9597_v17 = vld [vmem:[%s12601_s2 + $0x830] sm:$0xff]  }
 0x16f   : > { %8753 = vmatpush3.bf16.msra.mxu1 %v9573_v22  ;;  %1165 = vst [vmem:[#allocation2 + $0x18c] sm:$0xf] %v1163_v25  ;;  %v1168_v30 = vpop.permute.xlu1 %1167  ;;  %9320 = vset.pattern.permute.xlu1 %v9938_v31  ;;  %v9600_v22 = vld [vmem:[%s12601_s2 + $0x868] sm:$0xff]  }
 0x170   : > { %8754 = vmatprep.subr.bf16.mxu1 %v9576_v41  ;;  %v1176_v48 = vrot.slane %v1168_v30, %v10174_v15  ;;  %1661 = vperm.xlu1 %9320, %v11009_v46   ;;  %v9603_v30 = vld [vmem:[%s12601_s2 + $0x8b8] sm:$0xff]  }
 0x171   : > { %8771 = vmatpush3.bf16.msra.mxu0 %v9575_v10  ;;  %1880 = vperm.xlu0 %9334, %v11024_v13   ;;  %v11285_v10 = vld [vmem:[#allocation2 + $0x88] sm:$0xff] }
 0x172   : > { %8772 = vmatprep.subr.bf16.mxu0 %v9578_v28  ;;  %v1188_v12 = vmul.bf16 %v10953_v24, %v1176_v48  ;;  %v7885_v48 = vcombine.low %v11139_v8, %v11142_v60  ;;  %v9608_v8 = vld [vmem:[%s12601_s2 + $0x858] sm:$0xff]  }
 0x173   : > { %8755 = vmatpush3.bf16.msra.mxu1 %v9577_v47  ;;  %v9604_v47 = vld [vmem:[%s12601_s2 + $0x860] sm:$0xff]  }
 0x174   : > { %8756 = vmatprep.subr.bf16.mxu1 %v9580_v32  ;;  %1190 = vst [vmem:[#allocation2 + $0x90] sm:$0xf] %v1188_v12  ;;  %v1194_v27 = vpop.permute.xlu1 %1193  ;;  %1672 = vperm.xlu1 %9320, %v11024_v13   ;;  %v1491_v12 = vpop.permute.xlu0 %1490 }
 0x175   : > { %8773 = vmatpush3.bf16.msra.mxu0 %v9579_v0  ;;  %v1202_v39 = vrot.slane %v1194_v27, %v10174_v15  ;;  %v9606_v0 = vld [vmem:[%s12601_s2 + $0x8f0] sm:$0xff]  }
 0x176   : > { %8774 = vmatprep.subr.bf16.mxu0 %v9582_v4  ;;  %v11288_v25 = vld [vmem:[#allocation2 + $0x188] sm:$0xff]  ;;  %v9607_v27 = vld [vmem:[%s12601_s2 + $0x8b0] sm:$0xff]  }
 0x177   : > { %8757 = vmatpush3.bf16.msra.mxu1 %v9581_v9  ;;  %v1214_v45 = vmul.bf16 %v10953_v24, %v1202_v39  ;;  %v7890_v31 = vcombine.high %v11285_v10, %v11288_v25  ;;  %v9605_v9 = vld [vmem:[%s12601_s2 + $0x820] sm:$0xff]  }
 0x178   : > { %8758 = vmatprep.subr.bf16.mxu1 %v9584_v37  ;;  %v1205_v63 = vpop.permute.xlu1 %1204  ;;  %9322 = vset.pattern.permute.xlu1 %v9932_v40  ;;  %v9592_v40 = vld [vmem:[%s12601_s2 + $0x878] sm:$0xff]   ;;  %v1499_v37 = vrot.slane %v1491_v12, %v10174_v15  ;;  %v9632_v12 = vld [vmem:[%s12601_s2 + $0x968] sm:$0xff]  }
 0x179   : > { %8775 = vmatpush3.bf16.msra.mxu0 %v9583_v42  ;;  %1216 = vst [vmem:[#allocation2 + $0x94] sm:$0xf] %v1214_v45  ;;  %v1213_v51 = vrot.slane %v1205_v63, %v10174_v15  ;;  %1698 = vperm.xlu1 %9322, %v11024_v13   ;;  %v9615_v63 = vld [vmem:[%s12601_s2 + $0x8a0] sm:$0xff]  }
 0x17a   : > { %8776 = vmatprep.subr.bf16.mxu0 %v9586_v44  ;;  %v1501_v39 = vmul.bf16 %v10938_v5, %v1499_v37  ;;  %v9864_v37 = vld [vmem:[%s9990_s25 + $0x4] sm:$0xf] }
 0x17b   : > { %8759 = vmatpush3.bf16.msra.mxu1 %v9585_v43  ;;  %v1215_v59 = vmul.bf16 %v10938_v5, %v1213_v51  ;;  %v9610_v43 = vld [vmem:[%s12601_s2 + $0x8e8] sm:$0xff]  }
 0x17c   : > { %8760 = vmatprep.subr.bf16.mxu1 %v9588_v35  ;;  %1503 = vst [vmem:[#allocation2 + $0x1c0] sm:$0xf] %v1501_v39  ;;  %v9617_v51 = vld [vmem:[%s12601_s2 + $0x808] sm:$0xff]  }
 0x17d   : > { %8777 = vmatpush3.bf16.msra.mxu0 %v9587_v52  ;;  %1217 = vst [vmem:[#allocation2 + $0x194] sm:$0xf] %v1215_v59  ;;  %9323 = vset.pattern.permute.xlu1 %v9934_v53  ;;  %v7883_v53 = vcombine.low %v11097_v20, %v11099_v36  ;;  %v9598_v20 = vld [vmem:[%s12601_s2 + $0x7c0] sm:$0xff]   ;;  %v9612_v52 = vld [vmem:[%s12601_s2 + $0x850] sm:$0xff]   ;;  %v9618_v59 = vld [vmem:[%s12601_s2 + $0x8d8] sm:$0xff]  }
 0x17e   : > { %8778 = vmatprep.subr.bf16.mxu0 %v9590_v49  ;;  %v1231_v55 = vpop.permute.xlu1 %1230  ;;  %1713 = vperm.xlu1 %9323, %v11009_v46   ;;  %v9599_v36 = vld [vmem:[%s12601_s2 + $0x780] sm:$0xff]   ;;  %v9633_v39 = vld [vmem:[%s12601_s2 + $0x928] sm:$0xff]  }
 0x17f   : > { %8761 = vmatpush3.bf16.msra.mxu1 %v9589_v33  ;;  %v1239_v62 = vrot.slane %v1231_v55, %v10174_v15  ;;  %v9616_v33 = vld [vmem:[%s12601_s2 + $0x848] sm:$0xff]   ;;  %v11367_v55 = vld [vmem:[%s10172_s8] sm:$0xf] }
 0x180   : > { %8790 = vmatprep.subr.bf16.mxu1 %v9592_v40 }
 0x181   : > { %8779 = vmatpush3.bf16.msra.mxu0 %v9591_v57  ;;  %v1241_v19 = vmul.bf16 %v10938_v5, %v1239_v62  ;;  %v1532_v49 = vpop.permute.xlu0 %1531  ;;  %v9619_v57 = vld [vmem:[%s12601_s2 + $0x898] sm:$0xff]  }
 0x182   : > { %7063 = vmatmul.mubr.bf16.vlgmr.msra.gmra.mxu1 %v7883_v53  ;;  %8780 = vmatprep.subr.bf16.mxu0 %v9594_v23  ;;  %v9942_v53 = vmov 61  }
 0x183   : > { %8791 = vmatpush3.bf16.msra.mxu1 %v9593_v34  ;;  %7144 = vmatprep.mubr.bf16.mxu1 %v7888_v50  ;;  %1243 = vst [vmem:[#allocation2 + $0x198] sm:$0xf] %v1241_v19  ;;  %v1246_v6 = vpop.permute.xlu1 %1245  ;;  %v9620_v50 = vld [vmem:[%s12601_s2 + $0x840] sm:$0xff]   ;;  %v9624_v19 = vld [vmem:[%s12601_s2 + $0x978] sm:$0xff]  }
 0x184   : > { %8792 = vmatprep.subr.bf16.mxu1 %v9596_v1  ;;  %v1254_v41 = vrot.slane %v1246_v6, %v10174_v15  ;;  %9325 = vset.pattern.permute.xlu1 %v9941_v26  ;;  %v9622_v1 = vld [vmem:[%s12601_s2 + $0x8d0] sm:$0xff]  }
 0x185   : > { %8781 = vmatpush3.bf16.msra.mxu0 %v9595_v2  ;;  %1739 = vperm.xlu1 %9325, %v11009_v46   ;;  %v9621_v2 = vld [vmem:[%s12601_s2 + $0x800] sm:$0xff]   ;;  %v11388_v6 = vld [vmem:[#allocation2 + $0x190] sm:$0xff] }
 0x186   : > { %8782 = vmatprep.subr.bf16.mxu0 %v9598_v20  ;;  %v1266_v28 = vmul.bf16 %v10953_v24, %v1254_v41  ;;  %v9623_v41 = vld [vmem:[%s12601_s2 + $0x890] sm:$0xff]  }
 0x187   : > { %8793 = vmatpush3.bf16.msra.mxu1 %v9597_v17  ;;  %v1569_v17 = vpop.permute.xlu0 %1568 }
 0x188   : > { %8794 = vmatprep.subr.bf16.mxu1 %v9600_v22  ;;  %1268 = vst [vmem:[#allocation2 + $0x9c] sm:$0xf] %v1266_v28  ;;  %v11386_v22 = vld [vmem:[#allocation2 + $0x90] sm:$0xff]  ;;  %v9625_v28 = vld [vmem:[%s12601_s2 + $0x938] sm:$0xff]  }
 0x189   : > { %8783 = vmatpush3.bf16.msra.mxu0 %v9599_v36  ;;  %v1272_v32 = vpop.permute.xlu1 %1271  ;;  %1750 = vperm.xlu1 %9325, %v11024_v13   ;;  %v1577_v36 = vrot.slane %v1569_v17, %v10174_v15 }
 0x18a   : > { %8812 = vmatprep.subr.bf16.mxu0 %v9602_v38  ;;  %v1280_v4 = vrot.slane %v1272_v32, %v10174_v15  ;;  %v9628_v32 = vld [vmem:[%s12601_s2 + $0x970] sm:$0xff]  }
 0x18b   : > { %8795 = vmatpush3.bf16.msra.mxu1 %v9601_v29  ;;  %v9626_v29 = vld [vmem:[%s12601_s2 + $0x8c8] sm:$0xff]  }
 0x18c   : > { %7104 = vmatmul.mubr.bf16.vlgmr.msra.gmra.mxu0 %v7885_v48  ;;  %8796 = vmatprep.subr.bf16.mxu1 %v9604_v47  ;;  %v1292_v60 = vmul.bf16 %v10953_v24, %v1280_v4  ;;  %v9609_v24 = vld [vmem:[%s12601_s2 + $0x818] sm:$0xff]   ;;  %v9627_v47 = vld [vmem:[%s12601_s2 + $0x888] sm:$0xff]  }
 0x18d   : > { %8813 = vmatpush3.bf16.msra.mxu0 %v9603_v30  ;;  %7185 = vmatprep.mubr.bf16.mxu0 %v7890_v31  ;;  %v1283_v42 = vpop.permute.xlu1 %1282  ;;  %v7892_v30 = vcombine.high %v11386_v22, %v11388_v6  ;;  %v7887_v31 = vcombine.low %v11242_v16, %v11239_v7  ;;  %v9630_v7 = vld [vmem:[%s12601_s2 + $0x8c0] sm:$0xff]  }
 0x18e   : > { %8814 = vmatprep.subr.bf16.mxu0 %v9606_v0  ;;  %1294 = vst [vmem:[#allocation2 + $0xa0] sm:$0xf] %v1292_v60  ;;  %v1291_v44 = vrot.slane %v1283_v42, %v10174_v15  ;;  %9327 = vset.pattern.permute.xlu1 %v9935_v3  ;;  %v9613_v3 = vld [vmem:[%s12601_s2 + $0x810] sm:$0xff]   ;;  %v9631_v16 = vld [vmem:[%s12601_s2 + $0x880] sm:$0xff]  }
 0x18f   : > { %8797 = vmatpush3.bf16.msra.mxu1 %v9605_v9  ;;  %1776 = vperm.xlu1 %9327, %v11024_v13   ;;  %v9629_v0 = vld [vmem:[%s12601_s2 + $0x930] sm:$0xff]  }
 0x190   : > { %8798 = vmatprep.subr.bf16.mxu1 %v9608_v8  ;;  %v1293_v45 = vmul.bf16 %v10938_v5, %v1291_v44  ;;  %v11432_v8 = vld [vmem:[#allocation2 + $0x198] sm:$0xff] }
 0x191   : > { %8815 = vmatpush3.bf16.msra.mxu0 %v9607_v27  ;;  %v11434_v27 = vld [vmem:[#allocation2 + $0x98] sm:$0xff] }
 0x192   : > { %8816 = vmatprep.subr.bf16.mxu0 %v9610_v43  ;;  %1295 = vst [vmem:[#allocation2 + $0x1a0] sm:$0xf] %v1293_v45  ;;  %v1309_v35 = vpop.permute.xlu1 %1308  ;;  %v9636_v43 = vld [vmem:[%s12601_s2 + $0x960] sm:$0xff]   ;;  %v7889_v45 = vcombine.low %v11285_v10, %v11288_v25  ;;  %v9640_v10 = vld [vmem:[%s12601_s2 + $0x958] sm:$0xff]  }
 0x193   : > { %8799 = vmatpush3.bf16.msra.mxu1 %v9609_v24  ;;  %v1317_v5 = vrot.slane %v1309_v35, %v10174_v15  ;;  %9328 = vset.pattern.permute.xlu1 %v9937_v18  ;;  %v1540_v18 = vrot.slane %v1532_v49, %v10174_v15  ;;  %v9635_v24 = vld [vmem:[%s12601_s2 + $0x9b8] sm:$0xff]   ;;  %v9642_v49 = vld [vmem:[%s12601_s2 + $0x9e8] sm:$0xff]  }
 0x194   : > { %8800 = vmatprep.subr.bf16.mxu1 %v9612_v52  ;;  %1791 = vperm.xlu1 %9328, %v11009_v46   ;;  %v9865_v52 = vld [vmem:[%s9990_s25] sm:$0xf] }
 0x195   : > { %8817 = vmatpush3.bf16.msra.mxu0 %v9611_v54  ;;  %v1319_v40 = vmul.bf16 %v11356_v56, %v1317_v5  ;;  %v1552_v34 = vmul.bf16 %v11367_v55, %v1540_v18  ;;  %v7894_v54 = vcombine.high %v11434_v27, %v11432_v8  ;;  %v9639_v5 = vld [vmem:[%s12601_s2 + $0x9b0] sm:$0xff]  }
 0x196   : > { %8818 = vmatprep.subr.bf16.mxu0 %v9614_v11  ;;  %v9637_v11 = vld [vmem:[%s12601_s2 + $0x920] sm:$0xff]  }
 0x197   : > { %8801 = vmatpush3.bf16.msra.mxu1 %v9613_v3  ;;  %1321 = vst [vmem:[#allocation2 + $0x1a4] sm:$0xf] %v1319_v40  ;;  %v1324_v23 = vpop.permute.xlu1 %1323  ;;  %1554 = vst [vmem:[#allocation2 + $0xc8] sm:$0xf] %v1552_v34  ;;  %v9638_v3 = vld [vmem:[%s12601_s2 + $0x9f0] sm:$0xff]   ;;  %v9641_v40 = vld [vmem:[%s12601_s2 + $0x918] sm:$0xff]  }
 0x198   : > { %8802 = vmatprep.subr.bf16.mxu1 %v9616_v33  ;;  %v1332_v62 = vrot.slane %v1324_v23, %v10174_v15  ;;  %9330 = vset.pattern.permute.xlu1 %v9942_v53  ;;  %v9643_v23 = vld [vmem:[%s12601_s2 + $0x9a8] sm:$0xff]   ;;  %v9646_v34 = vld [vmem:[%s12601_s2 + $0x9e0] sm:$0xff]  }
 0x199   : > { %8819 = vmatpush3.bf16.msra.mxu0 %v9615_v63  ;;  %1817 = vperm.xlu1 %9330, %v11009_v46   ;;  %v1579_v46 = vmul.bf16 %v11356_v56, %v1577_v36  ;;  %v1610_v63 = vpop.permute.xlu0 %1609  ;;  %v9649_v36 = vld [vmem:[%s12601_s2 + $0x908] sm:$0xff]  }
 0x19a   : > { %8820 = vmatprep.subr.bf16.mxu0 %v9618_v59  ;;  %v1344_v20 = vmul.bf16 %v11367_v55, %v1332_v62  ;;  %v1618_v25 = vrot.slane %v1610_v63, %v10174_v15  ;;  %v9644_v59 = vld [vmem:[%s12601_s2 + $0x950] sm:$0xff]  }
 0x19b   : > { %8803 = vmatpush3.bf16.msra.mxu1 %v9617_v51  ;;  %1581 = vst [vmem:[#allocation2 + $0x1cc] sm:$0xf] %v1579_v46  ;;  %v9645_v62 = vld [vmem:[%s12601_s2 + $0x910] sm:$0xff]  }
 0x19c   : > { %8804 = vmatprep.subr.bf16.mxu1 %v9620_v50  ;;  %1346 = vst [vmem:[#allocation2 + $0xa8] sm:$0xf] %v1344_v20  ;;  %v1350_v38 = vpop.permute.xlu1 %1349  ;;  %v1630_v51 = vmul.bf16 %v11367_v55, %v1618_v25  ;;  %v9667_v25 = vld [vmem:[%s12601_s2 + $0xab8] sm:$0xff]  }
 0x19d   : > { %8821 = vmatpush3.bf16.msra.mxu0 %v9619_v57  ;;  %v1358_v26 = vrot.slane %v1350_v38, %v10174_v15  ;;  %1828 = vperm.xlu1 %9330, %v11024_v13   ;;  %v9650_v38 = vld [vmem:[%s12601_s2 + $0x9d8] sm:$0xff]  }
 0x19e   : > { %8822 = vmatprep.subr.bf16.mxu0 %v9622_v1  ;;  %1632 = vst [vmem:[#allocation2 + $0xd4] sm:$0xf] %v1630_v51  ;;  %v7893_v51 = vcombine.low %v11434_v27, %v11432_v8  ;;  %v9672_v8 = vld [vmem:[%s12601_s2 + $0xa58] sm:$0xff]  }
 0x19f   : > { %8805 = vmatpush3.bf16.msra.mxu1 %v9621_v2  ;;  %v1370_v13 = vmul.bf16 %v11367_v55, %v1358_v26  ;;  %v9648_v2 = vld [vmem:[%s12601_s2 + $0x948] sm:$0xff]  }
 0x1a0   : > { %8834 = vmatprep.subr.bf16.mxu1 %v9624_v19  ;;  %v1361_v48 = vpop.permute.xlu1 %1360  ;;  %v9647_v19 = vld [vmem:[%s12601_s2 + $0x9a0] sm:$0xff]  }
 0x1a1   : > { %8823 = vmatpush3.bf16.msra.mxu0 %v9623_v41  ;;  %1372 = vst [vmem:[#allocation2 + $0xac] sm:$0xf] %v1370_v13  ;;  %v1369_v4 = vrot.slane %v1361_v48, %v10174_v15  ;;  %9332 = vset.pattern.permute.xlu1 %v9939_v14  ;;  %v9634_v14 = vld [vmem:[%s12601_s2 + $0x9f8] sm:$0xff]   ;;  %v1647_v17 = vpop.permute.xlu0 %1646  ;;  %v11524_v48 = vld [vmem:[#allocation2 + $0xa0] sm:$0xff] }
 0x1a2   : > { %7145 = vmatmul.mubr.bf16.vlgmr.msra.gmra.mxu1 %v7887_v31  ;;  %8824 = vmatprep.subr.bf16.mxu0 %v9626_v29  ;;  %v1655_v20 = vrot.slane %v1647_v17, %v10174_v15  ;;  %v9651_v41 = vld [vmem:[%s12601_s2 + $0x998] sm:$0xff]   ;;  %v9675_v17 = vld [vmem:[%s12601_s2 + $0xaa8] sm:$0xff]  }
 0x1a3   : > { %8835 = vmatpush3.bf16.msra.mxu1 %v9625_v28  ;;  %7226 = vmatprep.mubr.bf16.mxu1 %v7892_v30  ;;  %v1371_v9 = vmul.bf16 %v11356_v56, %v1369_v4  ;;  %v9652_v28 = vld [vmem:[%s12601_s2 + $0x940] sm:$0xff]   ;;  %v9654_v30 = vld [vmem:[%s12601_s2 + $0x9d0] sm:$0xff]   ;;  %v9656_v31 = vld [vmem:[%s12601_s2 + $0xa78] sm:$0xff]  }
 0x1a4   : > { %8836 = vmatprep.subr.bf16.mxu1 %v9628_v32  ;;  %1854 = vperm.xlu1 %9332, %v9864_v37   ;;  %v1657_v26 = vmul.bf16 %v11356_v56, %v1655_v20  ;;  %v9655_v32 = vld [vmem:[%s12601_s2 + $0x990] sm:$0xff]   ;;  %v11527_v4 = vld [vmem:[#allocation2 + $0x1a0] sm:$0xff]  ;;  %v7891_v37 = vcombine.low %v11386_v22, %v11388_v6 }
 0x1a5   : > { %8825 = vmatpush3.bf16.msra.mxu0 %v9627_v47  ;;  %1373 = vst [vmem:[#allocation2 + $0x1ac] sm:$0xf] %v1371_v9  ;;  %v1387_v60 = vpop.permute.xlu1 %1386  ;;  %v9653_v47 = vld [vmem:[%s12601_s2 + $0x900] sm:$0xff]   ;;  %v7896_v9 = vcombine.high %v11524_v48, %v11527_v4  ;;  %v9677_v20 = vld [vmem:[%s12601_s2 + $0xa10] sm:$0xff]  }
 0x1a6   : > { %8826 = vmatprep.subr.bf16.mxu0 %v9630_v7  ;;  %v1395_v42 = vrot.slane %v1387_v60, %v10174_v15  ;;  %1659 = vst [vmem:[#allocation2 + $0x1d8] sm:$0xf] %v1657_v26  ;;  %v9657_v7 = vld [vmem:[%s12601_s2 + $0xa38] sm:$0xff]   ;;  %v9660_v60 = vld [vmem:[%s12601_s2 + $0xa70] sm:$0xff]   ;;  %v9663_v6 = vld [vmem:[%s12601_s2 + $0x980] sm:$0xff]  }
 0x1a7   : > { %8837 = vmatpush3.bf16.msra.mxu1 %v9629_v0  ;;  %v9680_v26 = vld [vmem:[%s12601_s2 + $0xa48] sm:$0xff]  }
 0x1a8   : > { %8838 = vmatprep.subr.bf16.mxu1 %v9632_v12  ;;  %v1397_v44 = vmul.bf16 %v11356_v56, %v1395_v42  ;;  %9333 = vset.pattern.permute.xlu1 %v9940_v58  ;;  %v9659_v12 = vld [vmem:[%s12601_s2 + $0x988] sm:$0xff]  }
 0x1a9   : > { %8827 = vmatpush3.bf16.msra.mxu0 %v9631_v16  ;;  %1869 = vperm.xlu1 %9333, %v9865_v52   ;;  %v9658_v16 = vld [vmem:[%s12601_s2 + $0x9c8] sm:$0xff]  }
 0x1aa   : > { %8856 = vmatprep.subr.bf16.mxu0 %v9634_v14  ;;  %1399 = vst [vmem:[#allocation2 + $0x1b0] sm:$0xf] %v1397_v44  ;;  %v1402_v58 = vpop.permute.xlu1 %1401  ;;  %v9664_v44 = vld [vmem:[%s12601_s2 + $0xa68] sm:$0xff]  }
 0x1ab   : > { %8839 = vmatpush3.bf16.msra.mxu1 %v9633_v39  ;;  %v1410_v35 = vrot.slane %v1402_v58, %v10174_v15  ;;  %v9661_v39 = vld [vmem:[%s12601_s2 + $0xa30] sm:$0xff]   ;;  %v11562_v52 = vld [vmem:[#allocation2 + $0xa8] sm:$0xff] }
 0x1ac   : > { %7186 = vmatmul.mubr.bf16.vlgmr.msra.gmra.mxu0 %v7889_v45  ;;  %8840 = vmatprep.subr.bf16.mxu1 %v9636_v43  ;;  %v9662_v43 = vld [vmem:[%s12601_s2 + $0x9c0] sm:$0xff]  }
 0x1ad   : > { %8857 = vmatpush3.bf16.msra.mxu0 %v9635_v24  ;;  %7267 = vmatprep.mubr.bf16.mxu0 %v7894_v54  ;;  %v1422_v33 = vmul.bf16 %v11367_v55, %v1410_v35  ;;  %v9666_v24 = vld [vmem:[%s12601_s2 + $0xaf8] sm:$0xff]  }
 0x1ae   : > { %8858 = vmatprep.subr.bf16.mxu0 %v9638_v3  ;;  %v11565_v3 = vld [vmem:[#allocation2 + $0x1a8] sm:$0xff] }
 0x1af   : > { %8841 = vmatpush3.bf16.msra.mxu1 %v9637_v11  ;;  %1424 = vst [vmem:[#allocation2 + $0xb4] sm:$0xf] %v1422_v33  ;;  %v1428_v18 = vpop.permute.xlu1 %1427  ;;  %v9665_v11 = vld [vmem:[%s12601_s2 + $0xa28] sm:$0xff]  }
 0x1b0   : > { %8842 = vmatprep.subr.bf16.mxu1 %v9640_v10  ;;  %v1436_v57 = vrot.slane %v1428_v18, %v10174_v15  ;;  %v9668_v10 = vld [vmem:[%s12601_s2 + $0xa60] sm:$0xff]  }
 0x1b1   : > { %8859 = vmatpush3.bf16.msra.mxu0 %v9639_v5  ;;  %v1688_v58 = vpop.permute.xlu0 %1687  ;;  %v7898_v5 = vcombine.high %v11562_v52, %v11565_v3 }
 0x1b2   : > { %8860 = vmatprep.subr.bf16.mxu0 %v9642_v49  ;;  %v1448_v50 = vmul.bf16 %v11367_v55, %v1436_v57  ;;  %v1696_v63 = vrot.slane %v1688_v58, %v10174_v15  ;;  %v9669_v57 = vld [vmem:[%s12601_s2 + $0xa20] sm:$0xff]  }
 0x1b3   : > { %8843 = vmatpush3.bf16.msra.mxu1 %v9641_v40  ;;  %v1439_v53 = vpop.permute.xlu1 %1438  ;;  %v9670_v40 = vld [vmem:[%s12601_s2 + $0xaf0] sm:$0xff]  }
 0x1b4   : > { %8844 = vmatprep.subr.bf16.mxu1 %v9644_v59  ;;  %1450 = vst [vmem:[#allocation2 + $0xb8] sm:$0xf] %v1448_v50  ;;  %v1447_v1 = vrot.slane %v1439_v53, %v10174_v15  ;;  %v1708_v49 = vmul.bf16 %v11367_v55, %v1696_v63  ;;  %v9693_v63 = vld [vmem:[%s12601_s2 + $0xb30] sm:$0xff]  }
 0x1b5   : > { %8861 = vmatpush3.bf16.msra.mxu0 %v9643_v23 }
 0x1b6   : > { %8862 = vmatprep.subr.bf16.mxu0 %v9646_v34  ;;  %v1449_v46 = vmul.bf16 %v11356_v56, %v1447_v1  ;;  %v1725_v59 = vpop.permute.xlu0 %1724  ;;  %1710 = vst [vmem:[#allocation2 + $0xe0] sm:$0xf] %v1708_v49  ;;  %v9671_v34 = vld [vmem:[%s12601_s2 + $0xab0] sm:$0xff]  }
 0x1b7   : > { %8845 = vmatpush3.bf16.msra.mxu1 %v9645_v62  ;;  %v1733_v23 = vrot.slane %v1725_v59, %v10174_v15  ;;  %v9674_v62 = vld [vmem:[%s12601_s2 + $0xae8] sm:$0xff]  }
 0x1b8   : > { %8846 = vmatprep.subr.bf16.mxu1 %v9648_v2  ;;  %1451 = vst [vmem:[#allocation2 + $0x1b8] sm:$0xf] %v1449_v46  ;;  %v1465_v29 = vpop.permute.xlu1 %1464  ;;  %v9673_v2 = vld [vmem:[%s12601_s2 + $0xa18] sm:$0xff]   ;;  %v9679_v46 = vld [vmem:[%s12601_s2 + $0xaa0] sm:$0xff]   ;;  %v9697_v59 = vld [vmem:[%s12601_s2 + $0xb28] sm:$0xff]  }
 0x1b9   : > { %8863 = vmatpush3.bf16.msra.mxu0 %v9647_v19  ;;  %v1473_v13 = vrot.slane %v1465_v29, %v10174_v15  ;;  %v1735_v50 = vmul.bf16 %v11356_v56, %v1733_v23  ;;  %v9676_v19 = vld [vmem:[%s12601_s2 + $0xa50] sm:$0xff]   ;;  %v9681_v29 = vld [vmem:[%s12601_s2 + $0xa08] sm:$0xff]   ;;  %v9700_v23 = vld [vmem:[%s12601_s2 + $0xb60] sm:$0xff]  }
 0x1ba   : > { %8864 = vmatprep.subr.bf16.mxu0 %v9650_v38  ;;  %v9678_v38 = vld [vmem:[%s12601_s2 + $0xae0] sm:$0xff]  }
 0x1bb   : > { %8847 = vmatpush3.bf16.msra.mxu1 %v9649_v36  ;;  %v1475_v0 = vmul.bf16 %v11356_v56, %v1473_v13  ;;  %1737 = vst [vmem:[#allocation2 + $0x1e4] sm:$0xf] %v1735_v50 }
 0x1bc   : > { %8848 = vmatprep.subr.bf16.mxu1 %v9652_v28 }
 0x1bd   : > { %8865 = vmatpush3.bf16.msra.mxu0 %v9651_v41  ;;  %1477 = vst [vmem:[#allocation2 + $0x1bc] sm:$0xf] %v1475_v0  ;;  %v9684_v0 = vld [vmem:[%s12601_s2 + $0xa40] sm:$0xff]  }
 0x1be   : > { %8866 = vmatprep.subr.bf16.mxu0 %v9654_v30  ;;  %v9682_v30 = vld [vmem:[%s12601_s2 + $0xad8] sm:$0xff]  }
 0x1bf   : > { %8849 = vmatpush3.bf16.msra.mxu1 %v9653_v47  ;;  %v1480_v14 = vpop.permute.xlu1 %1479 }
 0x1c0   : > { %8878 = vmatprep.subr.bf16.mxu1 %v9656_v31  ;;  %v1488_v42 = vrot.slane %v1480_v14, %v10174_v15  ;;  %v9686_v14 = vld [vmem:[%s12601_s2 + $0xad0] sm:$0xff]  }
 0x1c1   : > { %8867 = vmatpush3.bf16.msra.mxu0 %v9655_v32  ;;  %v9683_v32 = vld [vmem:[%s12601_s2 + $0xa98] sm:$0xff]  }
 0x1c2   : > { %7227 = vmatmul.mubr.bf16.vlgmr.msra.gmra.mxu1 %v7891_v37  ;;  %8868 = vmatprep.subr.bf16.mxu0 %v9658_v16  ;;  %v1500_v22 = vmul.bf16 %v11367_v55, %v1488_v42  ;;  %v9688_v37 = vld [vmem:[%s12601_s2 + $0xb78] sm:$0xff]  }
 0x1c3   : > { %8879 = vmatpush3.bf16.msra.mxu1 %v9657_v7  ;;  %7308 = vmatprep.mubr.bf16.mxu1 %v7896_v9 }
 0x1c4   : > { %8880 = vmatprep.subr.bf16.mxu1 %v9660_v60  ;;  %1502 = vst [vmem:[#allocation2 + $0xc0] sm:$0xf] %v1500_v22  ;;  %v1506_v54 = vpop.permute.xlu1 %1505  ;;  %v11651_v60 = vld [vmem:[#allocation2 + $0x1b0] sm:$0xff] }
 0x1c5   : > { %8869 = vmatpush3.bf16.msra.mxu0 %v9659_v12  ;;  %v1514_v45 = vrot.slane %v1506_v54, %v10174_v15  ;;  %v1766_v47 = vpop.permute.xlu0 %1765  ;;  %v9685_v12 = vld [vmem:[%s12601_s2 + $0xa00] sm:$0xff]   ;;  %v9687_v22 = vld [vmem:[%s12601_s2 + $0xa90] sm:$0xff]   ;;  %v9691_v54 = vld [vmem:[%s12601_s2 + $0xa88] sm:$0xff]  }
 0x1c6   : > { %8870 = vmatprep.subr.bf16.mxu0 %v9662_v43  ;;  %v1774_v31 = vrot.slane %v1766_v47, %v10174_v15 }
 0x1c7   : > { %8881 = vmatpush3.bf16.msra.mxu1 %v9661_v39  ;;  %v1526_v35 = vmul.bf16 %v11367_v55, %v1514_v45  ;;  %v11654_v39 = vld [vmem:[#allocation2 + $0xb0] sm:$0xff] }
 0x1c8   : > { %8882 = vmatprep.subr.bf16.mxu1 %v9664_v44  ;;  %v1786_v16 = vmul.bf16 %v11367_v55, %v1774_v31  ;;  %v9690_v44 = vld [vmem:[%s12601_s2 + $0xac8] sm:$0xff]   ;;  %v7900_v45 = vcombine.high %v11654_v39, %v11651_v60 }
 0x1c9   : > { %8871 = vmatpush3.bf16.msra.mxu0 %v9663_v6  ;;  %1528 = vst [vmem:[#allocation2 + $0xc4] sm:$0xf] %v1526_v35  ;;  %v1517_v33 = vpop.permute.xlu1 %1516  ;;  %v9692_v35 = vld [vmem:[%s12601_s2 + $0xb70] sm:$0xff]  }
 0x1ca   : > { %8900 = vmatprep.subr.bf16.mxu0 %v9666_v24  ;;  %v1525_v18 = vrot.slane %v1517_v33, %v10174_v15  ;;  %1788 = vst [vmem:[#allocation2 + $0xec] sm:$0xf] %v1786_v16  ;;  %v9689_v24 = vld [vmem:[%s12601_s2 + $0xb38] sm:$0xff]  }
 0x1cb   : > { %8883 = vmatpush3.bf16.msra.mxu1 %v9665_v11  ;;  %v7895_v11 = vcombine.low %v11524_v48, %v11527_v4  ;;  %v9695_v4 = vld [vmem:[%s12601_s2 + $0xa80] sm:$0xff]   ;;  %v9698_v33 = vld [vmem:[%s12601_s2 + $0xbf8] sm:$0xff]   ;;  %v1803_v50 = vpop.permute.xlu0 %1802 }
 0x1cc   : > { %7268 = vmatmul.mubr.bf16.vlgmr.msra.gmra.mxu0 %v7893_v51  ;;  %8884 = vmatprep.subr.bf16.mxu1 %v9668_v10  ;;  %v1527_v27 = vmul.bf16 %v11356_v56, %v1525_v18  ;;  %v11694_v51 = vld [vmem:[#allocation2 + $0xb8] sm:$0xff] }
 0x1cd   : > { %8901 = vmatpush3.bf16.msra.mxu0 %v9667_v25  ;;  %7349 = vmatprep.mubr.bf16.mxu0 %v7898_v5  ;;  %v9694_v25 = vld [vmem:[%s12601_s2 + $0xac0] sm:$0xff]   ;;  %v9696_v5 = vld [vmem:[%s12601_s2 + $0xb68] sm:$0xff]   ;;  %v9714_v16 = vld [vmem:[%s12601_s2 + $0xbd8] sm:$0xff]  }
 0x1ce   : > { %8902 = vmatprep.subr.bf16.mxu0 %v9670_v40  ;;  %1529 = vst [vmem:[#allocation2 + $0x1c4] sm:$0xf] %v1527_v27  ;;  %v1543_v53 = vpop.permute.xlu1 %1542  ;;  %v11696_v40 = vld [vmem:[#allocation2 + $0x1b8] sm:$0xff] }
 0x1cf   : > { %8885 = vmatpush3.bf16.msra.mxu1 %v9669_v57  ;;  %v1551_v1 = vrot.slane %v1543_v53, %v10174_v15  ;;  %v7902_v27 = vcombine.high %v11694_v51, %v11696_v40  ;;  %v9702_v53 = vld [vmem:[%s12601_s2 + $0xbf0] sm:$0xff]  }
 0x1d0   : > { %8886 = vmatprep.subr.bf16.mxu1 %v9672_v8  ;;  %v9699_v8 = vld [vmem:[%s12601_s2 + $0xbb8] sm:$0xff]  }
 0x1d1   : > { %8903 = vmatpush3.bf16.msra.mxu0 %v9671_v34  ;;  %v1553_v36 = vmul.bf16 %v11356_v56, %v1551_v1  ;;  %v9701_v1 = vld [vmem:[%s12601_s2 + $0xb20] sm:$0xff]  }
 0x1d2   : > { %8904 = vmatprep.subr.bf16.mxu0 %v9674_v62  ;;  %v7897_v62 = vcombine.low %v11562_v52, %v11565_v3  ;;  %v9704_v52 = vld [vmem:[%s12601_s2 + $0xb58] sm:$0xff]  }
 0x1d3   : > { %8887 = vmatpush3.bf16.msra.mxu1 %v9673_v2  ;;  %1555 = vst [vmem:[#allocation2 + $0x1c8] sm:$0xf] %v1553_v36  ;;  %v1558_v41 = vpop.permute.xlu1 %1557  ;;  %v1811_v2 = vrot.slane %v1803_v50, %v10174_v15  ;;  %v9706_v36 = vld [vmem:[%s12601_s2 + $0xbe8] sm:$0xff]  }
 0x1d4   : > { %8888 = vmatprep.subr.bf16.mxu1 %v9676_v19  ;;  %v1566_v28 = vrot.slane %v1558_v41, %v10174_v15  ;;  %v9708_v41 = vld [vmem:[%s12601_s2 + $0xb50] sm:$0xff]  }
 0x1d5   : > { %8905 = vmatpush3.bf16.msra.mxu0 %v9675_v17  ;;  %v1813_v19 = vmul.bf16 %v11356_v56, %v1811_v2 }
 0x1d6   : > { %8906 = vmatprep.subr.bf16.mxu0 %v9678_v38  ;;  %v1578_v13 = vmul.bf16 %v11367_v55, %v1566_v28  ;;  %v9710_v28 = vld [vmem:[%s12601_s2 + $0xbe0] sm:$0xff]  }
 0x1d7   : > { %8889 = vmatpush3.bf16.msra.mxu1 %v9677_v20  ;;  %v9703_v20 = vld [vmem:[%s12601_s2 + $0xbb0] sm:$0xff]   ;;  %1815 = vst [vmem:[#allocation2 + $0x1f0] sm:$0xf] %v1813_v19  ;;  %v9731_v19 = vld [vmem:[%s12601_s2 + $0xcb8] sm:$0xff]  }
 0x1d8   : > { %8890 = vmatprep.subr.bf16.mxu1 %v9680_v26  ;;  %1580 = vst [vmem:[#allocation2 + $0xcc] sm:$0xf] %v1578_v13  ;;  %v1584_v7 = vpop.permute.xlu1 %1583  ;;  %v9712_v13 = vld [vmem:[%s12601_s2 + $0xb48] sm:$0xff]  }
 0x1d9   : > { %8907 = vmatpush3.bf16.msra.mxu0 %v9679_v46  ;;  %v1592_v9 = vrot.slane %v1584_v7, %v10174_v15 }
 0x1da   : > { %8908 = vmatprep.subr.bf16.mxu0 %v9682_v30  ;;  %v9709_v30 = vld [vmem:[%s12601_s2 + $0xb10] sm:$0xff]  }
 0x1db   : > { %8891 = vmatpush3.bf16.msra.mxu1 %v9681_v29  ;;  %v1604_v42 = vmul.bf16 %v11367_v55, %v1592_v9  ;;  %v11746_v29 = vld [vmem:[%s10172_s8 + $0x4] sm:$0xf]  ;;  %v9713_v9 = vld [vmem:[%s12601_s2 + $0xb08] sm:$0xff]  }
 0x1dc   : > { %8892 = vmatprep.subr.bf16.mxu1 %v9684_v0  ;;  %v1595_v43 = vpop.permute.xlu1 %1594 }
 0x1dd   : > { %8909 = vmatpush3.bf16.msra.mxu0 %v9683_v32  ;;  %1606 = vst [vmem:[#allocation2 + $0xd0] sm:$0xf] %v1604_v42  ;;  %v1603_v6 = vrot.slane %v1595_v43, %v10174_v15  ;;  %v9711_v32 = vld [vmem:[%s12601_s2 + $0xba0] sm:$0xff]  }
 0x1de   : > { %8910 = vmatprep.subr.bf16.mxu0 %v9686_v14  ;;  %v9715_v14 = vld [vmem:[%s12601_s2 + $0xb98] sm:$0xff]   ;;  %v9716_v42 = vld [vmem:[%s12601_s2 + $0xb40] sm:$0xff]  }
 0x1df   : > { %8893 = vmatpush3.bf16.msra.mxu1 %v9685_v12  ;;  %v1605_v58 = vmul.bf16 %v11356_v56, %v1603_v6  ;;  %v11774_v43 = vld [vmem:[%s10172_s8] sm:$0xf]  ;;  %s7848_s8 = sshll.u32 %s12677_s17, 3 }
 0x1e0   : > { %8922 = vmatprep.subr.bf16.mxu1 %v9688_v37  ;;  %v9717_v6 = vld [vmem:[%s12601_s2 + $0xb00] sm:$0xff]   ;;  %s221_s12 = scalar_lea.vmem %s12603_s4, %s7848_s8 }
 0x1e1   : > { %8911 = vmatpush3.bf16.msra.mxu0 %v9687_v22  ;;  %1607 = vst [vmem:[#allocation2 + $0x1d0] sm:$0xf] %v1605_v58  ;;  %v1621_v10 = vpop.permute.xlu1 %1620  ;;  %v11787_v58 = vld [vmem:[#allocation2 + $0xc0] sm:$0xff] }
 0x1e2   : > { %7309 = vmatmul.mubr.bf16.vlgmr.msra.gmra.mxu1 %v7895_v11  ;;  %8912 = vmatprep.subr.bf16.mxu0 %v9690_v44  ;;  %v1629_v48 = vrot.slane %v1621_v10, %v10174_v15  ;;  %v1844_v7 = vpop.permute.xlu0 %1843  ;;  %v9718_v44 = vld [vmem:[%s12601_s2 + $0xbd0] sm:$0xff]  }
 0x1e3   : > { %8923 = vmatpush3.bf16.msra.mxu1 %v9689_v24  ;;  %7390 = vmatprep.mubr.bf16.mxu1 %v7900_v45  ;;  %v1852_v12 = vrot.slane %v1844_v7, %v10174_v15  ;;  %v9741_v7 = vld [vmem:[%s12601_s2 + $0xc10] sm:$0xff]  }
 0x1e4   : > { %8924 = vmatprep.subr.bf16.mxu1 %v9692_v35  ;;  %v1631_v49 = vmul.bf16 %v11356_v56, %v1629_v48  ;;  %v9705_v56 = vld [vmem:[%s12601_s2 + $0xb18] sm:$0xff]   ;;  %v11789_v35 = vld [vmem:[#allocation2 + $0x1c0] sm:$0xff]  ;;  %v9722_v48 = vld [vmem:[%s12601_s2 + $0xbc8] sm:$0xff]  }
 0x1e5   : > { %8913 = vmatpush3.bf16.msra.mxu0 %v9691_v54  ;;  %v1864_v22 = vmul.bf16 %v11774_v43, %v1852_v12  ;;  %v9720_v54 = vld [vmem:[%s12601_s2 + $0xc78] sm:$0xff]  }
 0x1e6   : > { %8914 = vmatprep.subr.bf16.mxu0 %v9694_v25  ;;  %1633 = vst [vmem:[#allocation2 + $0x1d4] sm:$0xf] %v1631_v49  ;;  %v1636_v18 = vpop.permute.xlu1 %1635  ;;  %v9719_v25 = vld [vmem:[%s12601_s2 + $0xb90] sm:$0xff]   ;;  %v7899_v49 = vcombine.low %v11654_v39, %v11651_v60  ;;  %v9726_v60 = vld [vmem:[%s12601_s2 + $0xbc0] sm:$0xff]  }
 0x1e7   : > { %8925 = vmatpush3.bf16.msra.mxu1 %v9693_v63  ;;  %v1644_v57 = vrot.slane %v1636_v18, %v10174_v15  ;;  %1866 = vst [vmem:[#allocation2 + $0xf8] sm:$0xf] %v1864_v22  ;;  %v9723_v18 = vld [vmem:[%s12601_s2 + $0xb88] sm:$0xff]   ;;  %v9727_v39 = vld [vmem:[%s12601_s2 + $0xb80] sm:$0xff]   ;;  %v9747_v22 = vld [vmem:[%s12601_s2 + $0xc98] sm:$0xff]  }
 0x1e8   : > { %8926 = vmatprep.subr.bf16.mxu1 %v9696_v5  ;;  %v9721_v5 = vld [vmem:[%s12601_s2 + $0xc38] sm:$0xff]  }
 0x1e9   : > { %8915 = vmatpush3.bf16.msra.mxu0 %v9695_v4  ;;  %v1656_v34 = vmul.bf16 %v11367_v55, %v1644_v57 }
 0x1ea   : > { %8944 = vmatprep.subr.bf16.mxu0 %v9698_v33  ;;  %v7904_v33 = vcombine.high %v11787_v58, %v11789_v35 }
 0x1eb   : > { %8927 = vmatpush3.bf16.msra.mxu1 %v9697_v59  ;;  %1658 = vst [vmem:[#allocation2 + $0xd8] sm:$0xf] %v1656_v34  ;;  %v1662_v17 = vpop.permute.xlu1 %1661  ;;  %v9724_v59 = vld [vmem:[%s12601_s2 + $0xc70] sm:$0xff]   ;;  %v9728_v34 = vld [vmem:[%s12601_s2 + $0xc68] sm:$0xff]  }
 0x1ec   : > { %7350 = vmatmul.mubr.bf16.vlgmr.msra.gmra.mxu0 %v7897_v62  ;;  %8928 = vmatprep.subr.bf16.mxu1 %v9700_v23  ;;  %v1670_v3 = vrot.slane %v1662_v17, %v10174_v15  ;;  %v1881_v11 = vpop.permute.xlu0 %1880  ;;  %v9725_v23 = vld [vmem:[%s12601_s2 + $0xc30] sm:$0xff]   ;;  %v9730_v62 = vld [vmem:[%s12601_s2 + $0xcf8] sm:$0xff]   ;;  %v9729_v17 = vld [vmem:[%s12601_s2 + $0xc28] sm:$0xff]  }
 0x1ed   : > { %8945 = vmatpush3.bf16.msra.mxu0 %v9699_v8  ;;  %7431 = vmatprep.mubr.bf16.mxu0 %v7902_v27  ;;  %v1889_v10 = vrot.slane %v1881_v11, %v10174_v15 }
 0x1ee   : > { %8946 = vmatprep.subr.bf16.mxu0 %v9702_v53  ;;  %v1682_v38 = vmul.bf16 %v11367_v55, %v1670_v3  ;;  %v9707_v55 = vld [vmem:[%s12601_s2 + $0xba8] sm:$0xff]   ;;  %v9732_v3 = vld [vmem:[%s12601_s2 + $0xc60] sm:$0xff]  }
 0x1ef   : > { %8929 = vmatpush3.bf16.msra.mxu1 %v9701_v1  ;;  %v1673_v46 = vpop.permute.xlu1 %1672  ;;  %v1891_v4 = vmul.bf16 %v11746_v29, %v1889_v10  ;;  %v11830_v53 = vld [vmem:[#allocation2 + $0x1c8] sm:$0xff]  ;;  %v11913_v10 = vld [vmem:[#allocation2 + $0xd0] sm:$0xff] }
 0x1f0   : > { %8930 = vmatprep.subr.bf16.mxu1 %v9704_v52  ;;  %1684 = vst [vmem:[#allocation2 + $0xdc] sm:$0xf] %v1682_v38  ;;  %v1681_v26 = vrot.slane %v1673_v46, %v10174_v15  ;;  %v11833_v1 = vld [vmem:[#allocation2 + $0xc8] sm:$0xff]  ;;  %v9734_v38 = vld [vmem:[%s12601_s2 + $0xcf0] sm:$0xff]   ;;  %v9733_v46 = vld [vmem:[%s12601_s2 + $0xc20] sm:$0xff]  }
 0x1f1   : > { %8947 = vmatpush3.bf16.msra.mxu0 %v9703_v20  ;;  %1893 = vst [vmem:[#allocation2 + $0x1fc] sm:$0xf] %v1891_v4  ;;  %v7906_v20 = vcombine.high %v11833_v1, %v11830_v53  ;;  %v9751_v4 = vld [vmem:[%s12601_s2 + $0xc90] sm:$0xff]  }
 0x1f2   : > { %8948 = vmatprep.subr.bf16.mxu0 %v9706_v36  ;;  %v1683_v47 = vmul.bf16 %v11746_v29, %v1681_v26  ;;  %v7901_v36 = vcombine.low %v11694_v51, %v11696_v40  ;;  %v9736_v26 = vld [vmem:[%s12601_s2 + $0xc58] sm:$0xff]   ;;  %v9735_v51 = vld [vmem:[%s12601_s2 + $0xcb0] sm:$0xff]  }
 0x1f3   : > { %8931 = vmatpush3.bf16.msra.mxu1 %v9705_v56 }
 0x1f4   : > { %8932 = vmatprep.subr.bf16.mxu1 %v9708_v41  ;;  %1685 = vst [vmem:[#allocation2 + $0x1dc] sm:$0xf] %v1683_v47  ;;  %v1699_v31 = vpop.permute.xlu1 %1698 }
 0x1f5   : > { %8949 = vmatpush3.bf16.msra.mxu0 %v9707_v55  ;;  %v1707_v0 = vrot.slane %v1699_v31, %v10174_v15  ;;  %v9738_v55 = vld [vmem:[%s12601_s2 + $0xce8] sm:$0xff]  }
 0x1f6   : > { %8950 = vmatprep.subr.bf16.mxu0 %v9710_v28  ;;  %v9737_v28 = vld [vmem:[%s12601_s2 + $0xc18] sm:$0xff]   ;;  %v9739_v31 = vld [vmem:[%s12601_s2 + $0xca8] sm:$0xff]  }
 0x1f7   : > { %8933 = vmatpush3.bf16.msra.mxu1 %v9709_v30  ;;  %v1709_v37 = vmul.bf16 %v11746_v29, %v1707_v0  ;;  %v9740_v30 = vld [vmem:[%s12601_s2 + $0xc50] sm:$0xff]  }
 0x1f8   : > { %8934 = vmatprep.subr.bf16.mxu1 %v9712_v13 }
 0x1f9   : > { %8951 = vmatpush3.bf16.msra.mxu0 %v9711_v32  ;;  %1711 = vst [vmem:[#allocation2 + $0x1e0] sm:$0xf] %v1709_v37  ;;  %v1714_v24 = vpop.permute.xlu1 %1713  ;;  %v9742_v32 = vld [vmem:[%s12601_s2 + $0xce0] sm:$0xff]   ;;  %v9745_v37 = vld [vmem:[%s12601_s2 + $0xc08] sm:$0xff]  }
 0x1fa   : > { %8952 = vmatprep.subr.bf16.mxu0 %v9714_v16  ;;  %v1722_v45 = vrot.slane %v1714_v24, %v10174_v15  ;;  %v9744_v16 = vld [vmem:[%s12601_s2 + $0xc48] sm:$0xff]  }
 0x1fb   : > { %8935 = vmatpush3.bf16.msra.mxu1 %v9713_v9  ;;  %v9743_v9 = vld [vmem:[%s12601_s2 + $0xca0] sm:$0xff]  }
 0x1fc   : > { %8936 = vmatprep.subr.bf16.mxu1 %v9716_v42  ;;  %v1734_v63 = vmul.bf16 %v11774_v43, %v1722_v45  ;;  %v9746_v42 = vld [vmem:[%s12601_s2 + $0xcd8] sm:$0xff]   ;;  %v9750_v45 = vld [vmem:[%s12601_s2 + $0xcd0] sm:$0xff]  }
 0x1fd   : > { %8953 = vmatpush3.bf16.msra.mxu0 %v9715_v14 }
 0x1fe   : > { %8954 = vmatprep.subr.bf16.mxu0 %v9718_v44  ;;  %1736 = vst [vmem:[#allocation2 + $0xe4] sm:$0xf] %v1734_v63  ;;  %v9748_v44 = vld [vmem:[%s12601_s2 + $0xc40] sm:$0xff]   ;;  %v9752_v63 = vld [vmem:[%s12601_s2 + $0xd78] sm:$0xff]  }
 0x1ff   : > { %8937 = vmatpush3.bf16.msra.mxu1 %v9717_v6 }
 0x200   : > { %8966 = vmatprep.subr.bf16.mxu1 %v9720_v54  ;;  %v1740_v57 = vpop.permute.xlu1 %1739  ;;  %v9749_v54 = vld [vmem:[%s12601_s2 + $0xc00] sm:$0xff]  }
 0x201   : > { %8955 = vmatpush3.bf16.msra.mxu0 %v9719_v25  ;;  %v1748_v8 = vrot.slane %v1740_v57, %v10174_v15  ;;  %v9755_v57 = vld [vmem:[%s12601_s2 + $0xc88] sm:$0xff]  }
 0x202   : > { %7391 = vmatmul.mubr.bf16.vlgmr.msra.gmra.mxu1 %v7899_v49  ;;  %8956 = vmatprep.subr.bf16.mxu0 %v9722_v48  ;;  %v11916_v48 = vld [vmem:[#allocation2 + $0x1d0] sm:$0xff] }
 0x203   : > { %8967 = vmatpush3.bf16.msra.mxu1 %v9721_v5  ;;  %7472 = vmatprep.mubr.bf16.mxu1 %v7904_v33  ;;  %v1760_v27 = vmul.bf16 %v11774_v43, %v1748_v8  ;;  %v9754_v5 = vld [vmem:[%s12601_s2 + $0xcc8] sm:$0xff]   ;;  %v9753_v33 = vld [vmem:[%s12601_s2 + $0xd38] sm:$0xff]   ;;  %v7908_v49 = vcombine.high %v11913_v10, %v11916_v48 }
 0x204   : > { %8968 = vmatprep.subr.bf16.mxu1 %v9724_v59  ;;  %v1751_v50 = vpop.permute.xlu1 %1750  ;;  %v7903_v59 = vcombine.low %v11787_v58, %v11789_v35  ;;  %v9758_v58 = vld [vmem:[%s12601_s2 + $0xcc0] sm:$0xff]  }
 0x205   : > { %8957 = vmatpush3.bf16.msra.mxu0 %v9723_v18  ;;  %1762 = vst [vmem:[#allocation2 + $0xe8] sm:$0xf] %v1760_v27  ;;  %v1759_v2 = vrot.slane %v1751_v50, %v10174_v15  ;;  %v9760_v27 = vld [vmem:[%s12601_s2 + $0xd68] sm:$0xff]  }
 0x206   : > { %8958 = vmatprep.subr.bf16.mxu0 %v9726_v60  ;;  %v9757_v60 = vld [vmem:[%s12601_s2 + $0xd30] sm:$0xff]  }
 0x207   : > { %8969 = vmatpush3.bf16.msra.mxu1 %v9725_v23  ;;  %v1761_v52 = vmul.bf16 %v11746_v29, %v1759_v2  ;;  %v9756_v23 = vld [vmem:[%s12601_s2 + $0xd70] sm:$0xff]   ;;  %v11957_v2 = vld [vmem:[#allocation2 + $0x1d8] sm:$0xff] }
 0x208   : > { %8970 = vmatprep.subr.bf16.mxu1 %v9728_v34  ;;  %v9762_v34 = vld [vmem:[%s12601_s2 + $0xdf8] sm:$0xff]  }
 0x209   : > { %8959 = vmatpush3.bf16.msra.mxu0 %v9727_v39  ;;  %1763 = vst [vmem:[#allocation2 + $0x1e8] sm:$0xf] %v1761_v52  ;;  %v9759_v39 = vld [vmem:[%s12601_s2 + $0xc80] sm:$0xff]  }
 0x20a   : > { %8988 = vmatprep.subr.bf16.mxu0 %v9730_v62  ;;  %v1777_v56 = vpop.permute.xlu1 %1776  ;;  %v11954_v62 = vld [vmem:[#allocation2 + $0xd8] sm:$0xff] }
 0x20b   : > { %8971 = vmatpush3.bf16.msra.mxu1 %v9729_v17  ;;  %v1785_v41 = vrot.slane %v1777_v56, %v10174_v15  ;;  %v9761_v17 = vld [vmem:[%s12601_s2 + $0xd28] sm:$0xff]   ;;  %v9769_v56 = vld [vmem:[%s12601_s2 + $0xd18] sm:$0xff]  }
 0x20c   : > { %7432 = vmatmul.mubr.bf16.vlgmr.msra.gmra.mxu0 %v7901_v36  ;;  %8972 = vmatprep.subr.bf16.mxu1 %v9732_v3  ;;  %v9764_v3 = vld [vmem:[%s12601_s2 + $0xd60] sm:$0xff]  }
 0x20d   : > { %8989 = vmatpush3.bf16.msra.mxu0 %v9731_v19  ;;  %7513 = vmatprep.mubr.bf16.mxu0 %v7906_v20  ;;  %v1787_v40 = vmul.bf16 %v11746_v29, %v1785_v41  ;;  %v7910_v19 = vcombine.high %v11954_v62, %v11957_v2  ;;  %v7905_v20 = vcombine.low %v11833_v1, %v11830_v53  ;;  %v9765_v36 = vld [vmem:[%s12601_s2 + $0xd20] sm:$0xff]   ;;  %v9767_v53 = vld [vmem:[%s12601_s2 + $0xdb0] sm:$0xff]   ;;  %v9770_v1 = vld [vmem:[%s12601_s2 + $0xde8] sm:$0xff]  }
 0x20e   : > { %8990 = vmatprep.subr.bf16.mxu0 %v9734_v38  ;;  %v9768_v38 = vld [vmem:[%s12601_s2 + $0xd58] sm:$0xff]   ;;  %v9771_v41 = vld [vmem:[%s12601_s2 + $0xda8] sm:$0xff]  }
 0x20f   : > { %8973 = vmatpush3.bf16.msra.mxu1 %v9733_v46  ;;  %1789 = vst [vmem:[#allocation2 + $0x1ec] sm:$0xf] %v1787_v40  ;;  %v1792_v47 = vpop.permute.xlu1 %1791  ;;  %v9772_v46 = vld [vmem:[%s12601_s2 + $0xd50] sm:$0xff]   ;;  %v9776_v40 = vld [vmem:[%s12601_s2 + $0xd48] sm:$0xff]  }
 0x210   : > { %8974 = vmatprep.subr.bf16.mxu1 %v9736_v26  ;;  %v1800_v13 = vrot.slane %v1792_v47, %v10174_v15  ;;  %v9774_v26 = vld [vmem:[%s12601_s2 + $0xde0] sm:$0xff]   ;;  %v9777_v47 = vld [vmem:[%s12601_s2 + $0xd08] sm:$0xff]  }
 0x211   : > { %8991 = vmatpush3.bf16.msra.mxu0 %v9735_v51  ;;  %v9773_v51 = vld [vmem:[%s12601_s2 + $0xd10] sm:$0xff]  }
 0x212   : > { %8992 = vmatprep.subr.bf16.mxu0 %v9738_v55  ;;  %v1812_v0 = vmul.bf16 %v11774_v43, %v1800_v13  ;;  %v9775_v55 = vld [vmem:[%s12601_s2 + $0xda0] sm:$0xff]   ;;  %v9779_v13 = vld [vmem:[%s12601_s2 + $0xd98] sm:$0xff]  }
 0x213   : > { %8975 = vmatpush3.bf16.msra.mxu1 %v9737_v28  ;;  %v9778_v28 = vld [vmem:[%s12601_s2 + $0xdd8] sm:$0xff]  }
 0x214   : > { %8976 = vmatprep.subr.bf16.mxu1 %v9740_v30  ;;  %1814 = vst [vmem:[#allocation2 + $0xf0] sm:$0xf] %v1812_v0  ;;  %v1818_v12 = vpop.permute.xlu1 %1817  ;;  %v9780_v30 = vld [vmem:[%s12601_s2 + $0xd40] sm:$0xff]   ;;  %v9784_v0 = vld [vmem:[%s12601_s2 + $0xe78] sm:$0xff]  }
 0x215   : > { %8993 = vmatpush3.bf16.msra.mxu0 %v9739_v31  ;;  %v1826_v14 = vrot.slane %v1818_v12, %v10174_v15  ;;  %v9782_v31 = vld [vmem:[%s12601_s2 + $0xdd0] sm:$0xff]  }
 0x216   : > { %8994 = vmatprep.subr.bf16.mxu0 %v9742_v32  ;;  %v9781_v32 = vld [vmem:[%s12601_s2 + $0xd00] sm:$0xff]   ;;  %v9783_v12 = vld [vmem:[%s12601_s2 + $0xd90] sm:$0xff]  }
 0x217   : > { %8977 = vmatpush3.bf16.msra.mxu1 %v9741_v7  ;;  %v1838_v6 = vmul.bf16 %v11774_v43, %v1826_v14  ;;  %v12030_v7 = vld [vmem:[#allocation2 + $0xe0] sm:$0xff]  ;;  %v9785_v14 = vld [vmem:[%s12601_s2 + $0xe38] sm:$0xff]  }
 0x218   : > { %8978 = vmatprep.subr.bf16.mxu1 %v9744_v16  ;;  %v1829_v24 = vpop.permute.xlu1 %1828  ;;  %v12032_v16 = vld [vmem:[#allocation2 + $0x1e0] sm:$0xff] }
 0x219   : > { %8995 = vmatpush3.bf16.msra.mxu0 %v9743_v9  ;;  %1840 = vst [vmem:[#allocation2 + $0xf4] sm:$0xf] %v1838_v6  ;;  %v1837_v11 = vrot.slane %v1829_v24, %v10174_v15  ;;  %v9786_v9 = vld [vmem:[%s12601_s2 + $0xdc8] sm:$0xff]   ;;  %v9789_v24 = vld [vmem:[%s12601_s2 + $0xe30] sm:$0xff]  }
 0x21a   : > { %8996 = vmatprep.subr.bf16.mxu0 %v9746_v42  ;;  %v7907_v42 = vcombine.low %v11913_v10, %v11916_v48  ;;  %v9787_v6 = vld [vmem:[%s12601_s2 + $0xd88] sm:$0xff]   ;;  %v9796_v48 = vld [vmem:[%s12601_s2 + $0xe60] sm:$0xff]  }
 0x21b   : > { %8979 = vmatpush3.bf16.msra.mxu1 %v9745_v37  ;;  %v1839_v25 = vmul.bf16 %v11746_v29, %v1837_v11  ;;  %v7912_v37 = vcombine.high %v12030_v7, %v12032_v16  ;;  %v9794_v11 = vld [vmem:[%s12601_s2 + $0xef8] sm:$0xff]   ;;  %v12070_v10 = vld [vmem:[#allocation2 + $0x1e8] sm:$0xff] }
 0x21c   : > { %8980 = vmatprep.subr.bf16.mxu1 %v9748_v44  ;;  %v9790_v44 = vld [vmem:[%s12601_s2 + $0xdc0] sm:$0xff]  }
 0x21d   : > { %8997 = vmatpush3.bf16.msra.mxu0 %v9747_v22  ;;  %1841 = vst [vmem:[#allocation2 + $0x1f4] sm:$0xf] %v1839_v25  ;;  %v9788_v22 = vld [vmem:[%s12601_s2 + $0xe70] sm:$0xff]   ;;  %v9793_v25 = vld [vmem:[%s12601_s2 + $0xe28] sm:$0xff]  }
 0x21e   : > { %8998 = vmatprep.subr.bf16.mxu0 %v9750_v45  ;;  %v9791_v45 = vld [vmem:[%s12601_s2 + $0xd80] sm:$0xff]  }
 0x21f   : > { %8981 = vmatpush3.bf16.msra.mxu1 %v9749_v54  ;;  %v1855_v18 = vpop.permute.xlu1 %1854  ;;  %v9792_v54 = vld [vmem:[%s12601_s2 + $0xe68] sm:$0xff]  }
 0x220   : > { %9010 = vmatprep.subr.bf16.mxu1 %v9752_v63  ;;  %v1863_v8 = vrot.slane %v1855_v18, %v10174_v15  ;;  %v12068_v63 = vld [vmem:[#allocation2 + $0xe8] sm:$0xff]  ;;  %v9797_v18 = vld [vmem:[%s12601_s2 + $0xe20] sm:$0xff]  }
 0x221   : > { %8999 = vmatpush3.bf16.msra.mxu0 %v9751_v4  ;;  %v9795_v4 = vld [vmem:[%s12601_s2 + $0xeb8] sm:$0xff]  }
 0x222   : > { %7473 = vmatmul.mubr.bf16.vlgmr.msra.gmra.mxu1 %v7903_v59  ;;  %9000 = vmatprep.subr.bf16.mxu0 %v9754_v5  ;;  %v1865_v35 = vmul.bf16 %v11746_v29, %v1863_v8  ;;  %v7914_v5 = vcombine.high %v12068_v63, %v12070_v10  ;;  %v9800_v59 = vld [vmem:[%s12601_s2 + $0xe58] sm:$0xff]  }
 0x223   : > { %9011 = vmatpush3.bf16.msra.mxu1 %v9753_v33  ;;  %7554 = vmatprep.mubr.bf16.mxu1 %v7908_v49  ;;  %v7909_v33 = vcombine.low %v11954_v62, %v11957_v2  ;;  %v9798_v49 = vld [vmem:[%s12601_s2 + $0xef0] sm:$0xff]   ;;  %v9801_v8 = vld [vmem:[%s12601_s2 + $0xe18] sm:$0xff]   ;;  %v9809_v62 = vld [vmem:[%s12601_s2 + $0xe08] sm:$0xff]  }
 0x224   : > { %9012 = vmatprep.subr.bf16.mxu1 %v9756_v23  ;;  %1867 = vst [vmem:[#allocation2 + $0x1f8] sm:$0xf] %v1865_v35  ;;  %v1870_v50 = vpop.permute.xlu1 %1869  ;;  %v9802_v23 = vld [vmem:[%s12601_s2 + $0xee8] sm:$0xff]   ;;  %v9806_v35 = vld [vmem:[%s12601_s2 + $0xee0] sm:$0xff]   ;;  %v9811_v2 = vld [vmem:[%s12601_s2 + $0xe98] sm:$0xff]  }
 0x225   : > { %9001 = vmatpush3.bf16.msra.mxu0 %v9755_v57  ;;  %v1878_v29 = vrot.slane %v1870_v50, %v10174_v15  ;;  %v9763_v15 = vld [vmem:[%s12601_s2 + $0xdb8] sm:$0xff]   ;;  %v9799_v57 = vld [vmem:[%s12601_s2 + $0xeb0] sm:$0xff]  }
 0x226   : > { %9002 = vmatprep.subr.bf16.mxu0 %v9758_v58  ;;  %v9803_v58 = vld [vmem:[%s12601_s2 + $0xea8] sm:$0xff]   ;;  %v9810_v50 = vld [vmem:[%s12601_s2 + $0xed8] sm:$0xff]  }
 0x227   : > { %9013 = vmatpush3.bf16.msra.mxu1 %v9757_v60  ;;  %v1890_v52 = vmul.bf16 %v11774_v43, %v1878_v29  ;;  %v9766_v43 = vld [vmem:[%s12601_s2 + $0xdf0] sm:$0xff]   ;;  %v9812_v29 = vld [vmem:[%s12601_s2 + $0xe40] sm:$0xff]  }
 0x228   : > { %9014 = vmatprep.subr.bf16.mxu1 %v9760_v27  ;;  %v9804_v60 = vld [vmem:[%s12601_s2 + $0xe50] sm:$0xff]   ;;  %v9808_v27 = vld [vmem:[%s12601_s2 + $0xe48] sm:$0xff]  }
 0x229   : > { %9003 = vmatpush3.bf16.msra.mxu0 %v9759_v39  ;;  %1892 = vst [vmem:[#allocation2 + $0xfc] sm:$0xf] %v1890_v52  ;;  %v9805_v39 = vld [vmem:[%s12601_s2 + $0xe10] sm:$0xff]   ;;  %v9813_v52 = vld [vmem:[%s12601_s2 + $0xe00] sm:$0xff]  }
 0x22a   : > { %9032 = vmatprep.subr.bf16.mxu0 %v9762_v34  ;;  %v9807_v34 = vld [vmem:[%s12601_s2 + $0xea0] sm:$0xff]  }
 0x22b   : > { %9015 = vmatpush3.bf16.msra.mxu1 %v9761_v17  ;;  %v9814_v17 = vld [vmem:[%s12601_s2 + $0xed0] sm:$0xff]  }
 0x22c   : > { %7514 = vmatmul.mubr.bf16.vlgmr.msra.gmra.mxu0 %v7905_v20  ;;  %9016 = vmatprep.subr.bf16.mxu1 %v9764_v3  ;;  %v9816_v3 = vld [vmem:[%s12601_s2 + $0xf78] sm:$0xff]   ;;  %v9815_v20 = vld [vmem:[%s12601_s2 + $0xe90] sm:$0xff]  }
 0x22d   : > { %9033 = vmatpush3.bf16.msra.mxu0 %v9763_v15  ;;  %7595 = vmatprep.mubr.bf16.mxu0 %v7910_v19  ;;  %v12142_v15 = vld [vmem:[#allocation2 + $0xf0] sm:$0xff] }
 0x22e   : > { %9034 = vmatprep.subr.bf16.mxu0 %v9766_v43  ;;  %v12144_v19 = vld [vmem:[#allocation2 + $0x1f0] sm:$0xff]  ;;  %v9818_v43 = vld [vmem:[%s12601_s2 + $0xec8] sm:$0xff]  }
 0x22f   : > { %9017 = vmatpush3.bf16.msra.mxu1 %v9765_v36  ;;  %v9817_v36 = vld [vmem:[%s12601_s2 + $0xf38] sm:$0xff]  }
 0x230   : > { %9018 = vmatprep.subr.bf16.mxu1 %v9768_v38  ;;  %v7916_v38 = vcombine.high %v12142_v15, %v12144_v19 }
 0x231   : > { %9035 = vmatpush3.bf16.msra.mxu0 %v9767_v53  ;;  %v7911_v53 = vcombine.low %v12030_v7, %v12032_v16  ;;  %v9829_v7 = vld [vmem:[%s12601_s2 + $0xf20] sm:$0xff]   ;;  %v9832_v16 = vld [vmem:[%s12601_s2 + $0xf58] sm:$0xff]  }
 0x232   : > { %9036 = vmatprep.subr.bf16.mxu0 %v9770_v1  ;;  %v9820_v1 = vld [vmem:[%s12601_s2 + $0xf70] sm:$0xff]  }
 0x233   : > { %9019 = vmatpush3.bf16.msra.mxu1 %v9769_v56  ;;  %v9819_v56 = vld [vmem:[%s12601_s2 + $0xe88] sm:$0xff]  }
 0x234   : > { %9020 = vmatprep.subr.bf16.mxu1 %v9772_v46  ;;  %v9822_v46 = vld [vmem:[%s12601_s2 + $0xec0] sm:$0xff]  }
 0x235   : > { %9037 = vmatpush3.bf16.msra.mxu0 %v9771_v41  ;;  %v9821_v41 = vld [vmem:[%s12601_s2 + $0xf30] sm:$0xff]  }
 0x236   : > { %9038 = vmatprep.subr.bf16.mxu0 %v9774_v26  ;;  %v9824_v26 = vld [vmem:[%s12601_s2 + $0xf68] sm:$0xff]  }
 0x237   : > { %9021 = vmatpush3.bf16.msra.mxu1 %v9773_v51  ;;  %v9823_v51 = vld [vmem:[%s12601_s2 + $0xe80] sm:$0xff]  }
 0x238   : > { %9022 = vmatprep.subr.bf16.mxu1 %v9776_v40  ;;  %v9826_v40 = vld [vmem:[%s12601_s2 + $0xff8] sm:$0xff]  }
 0x239   : > { %9039 = vmatpush3.bf16.msra.mxu0 %v9775_v55  ;;  %v12180_v55 = vld [vmem:[#allocation2 + $0xf8] sm:$0xff] }
 0x23a   : > { %9040 = vmatprep.subr.bf16.mxu0 %v9778_v28  ;;  %v12182_v28 = vld [vmem:[#allocation2 + $0x1f8] sm:$0xff] }
 0x23b   : > { %9023 = vmatpush3.bf16.msra.mxu1 %v9777_v47  ;;  %v9825_v47 = vld [vmem:[%s12601_s2 + $0xf28] sm:$0xff]  }
 0x23c   : > { %9024 = vmatprep.subr.bf16.mxu1 %v9780_v30  ;;  %v9828_v30 = vld [vmem:[%s12601_s2 + $0xf60] sm:$0xff]  }
 0x23d   : > { %9041 = vmatpush3.bf16.msra.mxu0 %v9779_v13  ;;  %v9827_v13 = vld [vmem:[%s12601_s2 + $0xfb8] sm:$0xff]  }
 0x23e   : > { %9042 = vmatprep.subr.bf16.mxu0 %v9782_v31  ;;  %v7918_v31 = vcombine.high %v12180_v55, %v12182_v28 }
 0x23f   : > { %9025 = vmatpush3.bf16.msra.mxu1 %v9781_v32  ;;  %v7913_v32 = vcombine.low %v12068_v63, %v12070_v10  ;;  %v9841_v63 = vld [vmem:[%s12601_s2 + $0xf08] sm:$0xff]  }
 0x240   : > { %9054 = vmatprep.subr.bf16.mxu1 %v9784_v0  ;;  %v9830_v0 = vld [vmem:[%s12601_s2 + $0xff0] sm:$0xff]  }
 0x241   : > { %9043 = vmatpush3.bf16.msra.mxu0 %v9783_v12  ;;  %v9831_v12 = vld [vmem:[%s12601_s2 + $0xfb0] sm:$0xff]  }
 0x242   : > { %7555 = vmatmul.mubr.bf16.vlgmr.msra.gmra.mxu1 %v7907_v42  ;;  %9044 = vmatprep.subr.bf16.mxu0 %v9786_v9  ;;  %v9834_v9 = vld [vmem:[%s12601_s2 + $0xfe8] sm:$0xff]   ;;  %v9836_v42 = vld [vmem:[%s12601_s2 + $0xf50] sm:$0xff]  }
 0x243   : > { %9055 = vmatpush3.bf16.msra.mxu1 %v9785_v14  ;;  %7636 = vmatprep.mubr.bf16.mxu1 %v7912_v37  ;;  %v9833_v14 = vld [vmem:[%s12601_s2 + $0xf18] sm:$0xff]   ;;  %v12215_v37 = vpop.f32.mrf.mxu1 }
 0x244   : > { %9056 = vmatprep.subr.bf16.mxu1 %v9788_v22  ;;  %v9835_v22 = vld [vmem:[%s12601_s2 + $0xfa8] sm:$0xff]  }
 0x245   : > { %9045 = vmatpush3.bf16.msra.mxu0 %v9787_v6  ;;  %v9838_v6 = vld [vmem:[%s12601_s2 + $0xfe0] sm:$0xff]  }
 0x246   : > { %9046 = vmatprep.subr.bf16.mxu0 %v9790_v44  ;;  %v9837_v44 = vld [vmem:[%s12601_s2 + $0xf10] sm:$0xff]  }
 0x247   : > { %9057 = vmatpush3.bf16.msra.mxu1 %v9789_v24  ;;  %v12229_v24 = vpop.f32.mrf.mxu1 }
 0x248   : > { %9058 = vmatprep.subr.bf16.mxu1 %v9792_v54  ;;  %v9840_v54 = vld [vmem:[%s12601_s2 + $0xf48] sm:$0xff]  }
 0x249   : > { %9047 = vmatpush3.bf16.msra.mxu0 %v9791_v45  ;;  %v9839_v45 = vld [vmem:[%s12601_s2 + $0xfa0] sm:$0xff]   ;;  %v12243_v10 = vpop.f32.mrf.mxu1 }
 0x24a   : > { %9076 = vmatprep.subr.bf16.mxu0 %v9794_v11  ;;  %v9842_v11 = vld [vmem:[%s12601_s2 + $0xfd8] sm:$0xff]  }
 0x24b   : > { %9059 = vmatpush3.bf16.msra.mxu1 %v9793_v25  ;;  %v9844_v25 = vld [vmem:[%s12601_s2 + $0xf40] sm:$0xff]  }
 0x24c   : > { %7596 = vmatmul.mubr.bf16.vlgmr.msra.gmra.mxu0 %v7909_v33  ;;  %9060 = vmatprep.subr.bf16.mxu1 %v9796_v48  ;;  %v9843_v48 = vld [vmem:[%s12601_s2 + $0xf98] sm:$0xff]   ;;  %v9845_v33 = vld [vmem:[%s12601_s2 + $0xf00] sm:$0xff]  }
 0x24d   : > { %9077 = vmatpush3.bf16.msra.mxu0 %v9795_v4  ;;  %7677 = vmatprep.mubr.bf16.mxu0 %v7914_v5  ;;  %v12251_v4 = vpop.f32.mrf.mxu0  ;;  %v9846_v5 = vld [vmem:[%s12601_s2 + $0xfd0] sm:$0xff]  }
 0x24e   : > { %9078 = vmatprep.subr.bf16.mxu0 %v9798_v49  ;;  %v12259_v49 = vpop.f32.mrf.mxu1 }
 0x24f   : > { %9061 = vmatpush3.bf16.msra.mxu1 %v9797_v18  ;;  %v9847_v18 = vld [vmem:[%s12601_s2 + $0xf90] sm:$0xff]  }
 0x250   : > { %9062 = vmatprep.subr.bf16.mxu1 %v9800_v59  ;;  %v12264_v59 = vpop.f32.mrf.mxu0 }
 0x251   : > { %9079 = vmatpush3.bf16.msra.mxu0 %v9799_v57  ;;  %v12266_v57 = vpop.f32.mrf.mxu1 }
 0x252   : > { %9080 = vmatprep.subr.bf16.mxu0 %v9802_v23  ;;  %v9848_v23 = vld [vmem:[%s12601_s2 + $0xfc8] sm:$0xff]  }
 0x253   : > { %9063 = vmatpush3.bf16.msra.mxu1 %v9801_v8  ;;  %v7915_v8 = vcombine.low %v12142_v15, %v12144_v19 }
 0x254   : > { %9064 = vmatprep.subr.bf16.mxu1 %v9804_v60  ;;  %v9849_v60 = vld [vmem:[%s12601_s2 + $0xf88] sm:$0xff]  }
 0x255   : > { %9081 = vmatpush3.bf16.msra.mxu0 %v9803_v58  ;;  %v12276_v58 = vpop.f32.mrf.mxu0 }
 0x256   : > { %9082 = vmatprep.subr.bf16.mxu0 %v9806_v35  ;;  %v12278_v35 = vpop.f32.mrf.mxu1 }
 0x257   : > { %9065 = vmatpush3.bf16.msra.mxu1 %v9805_v39  ;;  %v9850_v39 = vld [vmem:[%s12601_s2 + $0xfc0] sm:$0xff]  }
 0x258   : > { %9066 = vmatprep.subr.bf16.mxu1 %v9808_v27  ;;  %v9851_v27 = vld [vmem:[%s12601_s2 + $0xf80] sm:$0xff]  }
 0x259   : > { %9083 = vmatpush3.bf16.msra.mxu0 %v9807_v34  ;;  %v12286_v34 = vpop.f32.mrf.mxu0 }
 0x25a   : > { %9084 = vmatprep.subr.bf16.mxu0 %v9810_v50  ;;  %v12288_v50 = vpop.f32.mrf.mxu1 }
 0x25b   : > { %9067 = vmatpush3.bf16.msra.mxu1 %v9809_v62  ;;  %v12290_v62 = vpop.f32.mrf.mxu0 }
 0x25c   : > { %9068 = vmatprep.subr.bf16.mxu1 %v9812_v29  ;;  %v12292_v29 = vpop.f32.mrf.mxu1 }
 0x25d   : > { %9085 = vmatpush3.bf16.msra.mxu0 %v9811_v2  ;;  %v7917_v2 = vcombine.low %v12180_v55, %v12182_v28 }
 0x25e   : > { %9086 = vmatprep.subr.bf16.mxu0 %v9814_v17  ;;  %v12296_v17 = vpop.f32.mrf.mxu0 }
 0x25f   : > { %9069 = vmatpush3.bf16.msra.mxu1 %v9813_v52  ;;  %v12298_v52 = vpop.f32.mrf.mxu1 }
 0x260   : > { %9098 = vmatprep.subr.bf16.mxu1 %v9816_v3  ;;  %v12300_v3 = vpop.f32.mrf.mxu0 }
 0x261   : > { %9087 = vmatpush3.bf16.msra.mxu0 %v9815_v20  ;;  %v12302_v15 = vpop.f32.mrf.mxu1 }
 0x262   : > { %7637 = vmatmul.mubr.bf16.vlgmr.msra.gmra.mxu1 %v7911_v53  ;;  %9088 = vmatprep.subr.bf16.mxu0 %v9818_v43  ;;  %v12304_v19 = vpop.f32.mrf.mxu0 }
 0x263   : > { %9099 = vmatpush3.bf16.msra.mxu1 %v9817_v36  ;;  %7718 = vmatprep.mubr.bf16.mxu1 %v7916_v38  ;;  %v12306_v20 = vpop.f32.mrf.mxu1 }
 0x264   : > { %9100 = vmatprep.subr.bf16.mxu1 %v9820_v1  ;;  %v12308_v43 = vpop.f32.mrf.mxu0 }
 0x265   : > { %9089 = vmatpush3.bf16.msra.mxu0 %v9819_v56  ;;  %v12310_v36 = vpop.f32.mrf.mxu1 }
 0x266   : > { %9090 = vmatprep.subr.bf16.mxu0 %v9822_v46  ;;  %v12312_v38 = vpop.f32.mrf.mxu0 }
 0x267   : > { %9101 = vmatpush3.bf16.msra.mxu1 %v9821_v41  ;;  %v12314_v53 = vpop.f32.mrf.mxu1 }
 0x268   : > { %9102 = vmatprep.subr.bf16.mxu1 %v9824_v26  ;;  %v12316_v1 = vpop.f32.mrf.mxu0 }
 0x269   : > { %9091 = vmatpush3.bf16.msra.mxu0 %v9823_v51  ;;  %v12318_v56 = vpop.f32.mrf.mxu1 }
 0x26a   : > { %9120 = vmatprep.subr.bf16.mxu0 %v9826_v40  ;;  %v12320_v46 = vpop.f32.mrf.mxu0 }
 0x26b   : > { %9103 = vmatpush3.bf16.msra.mxu1 %v9825_v47  ;;  %v12322_v41 = vpop.f32.mrf.mxu1 }
 0x26c   : > { %7678 = vmatmul.mubr.bf16.vlgmr.msra.gmra.mxu0 %v7913_v32  ;;  %9104 = vmatprep.subr.bf16.mxu1 %v9828_v30  ;;  %v12324_v26 = vpop.f32.mrf.mxu0 }
 0x26d   : > { %9121 = vmatpush3.bf16.msra.mxu0 %v9827_v13  ;;  %7759 = vmatprep.mubr.bf16.mxu0 %v7918_v31  ;;  %v12326_v51 = vpop.f32.mrf.mxu1 }
 0x26e   : > { %9122 = vmatprep.subr.bf16.mxu0 %v9830_v0  ;;  %v12328_v40 = vpop.f32.mrf.mxu0 }
 0x26f   : > { %9105 = vmatpush3.bf16.msra.mxu1 %v9829_v7  ;;  %v12330_v55 = vpop.f32.mrf.mxu1 }
 0x270   : > { %9106 = vmatprep.subr.bf16.mxu1 %v9832_v16  ;;  %v12332_v28 = vpop.f32.mrf.mxu0 }
 0x271   : > { %9123 = vmatpush3.bf16.msra.mxu0 %v9831_v12  ;;  %v12334_v47 = vpop.f32.mrf.mxu1 }
 0x272   : > { %9124 = vmatprep.subr.bf16.mxu0 %v9834_v9  ;;  %v12336_v30 = vpop.f32.mrf.mxu0 }
 0x273   : > { %9107 = vmatpush3.bf16.msra.mxu1 %v9833_v14  ;;  %v12338_v13 = vpop.f32.mrf.mxu1 }
 0x274   : > { %9108 = vmatprep.subr.bf16.mxu1 %v9836_v42  ;;  %v12340_v31 = vpop.f32.mrf.mxu0 }
 0x275   : > { %9125 = vmatpush3.bf16.msra.mxu0 %v9835_v22  ;;  %v12342_v32 = vpop.f32.mrf.mxu1 }
 0x276   : > { %9126 = vmatprep.subr.bf16.mxu0 %v9838_v6  ;;  %v12344_v0 = vpop.f32.mrf.mxu0 }
 0x277   : > { %9109 = vmatpush3.bf16.msra.mxu1 %v9837_v44  ;;  %v12346_v7 = vpop.f32.mrf.mxu1 }
 0x278   : > { %9110 = vmatprep.subr.bf16.mxu1 %v9840_v54  ;;  %v12348_v16 = vpop.f32.mrf.mxu0 }
 0x279   : > { %9127 = vmatpush3.bf16.msra.mxu0 %v9839_v45  ;;  %v12350_v12 = vpop.f32.mrf.mxu1 }
 0x27a   : > { %9128 = vmatprep.subr.bf16.mxu0 %v9842_v11  ;;  %v12352_v9 = vpop.f32.mrf.mxu0 }
 0x27b   : > { %9111 = vmatpush3.bf16.msra.mxu1 %v9841_v63  ;;  %v12354_v14 = vpop.f32.mrf.mxu1 }
 0x27c   : > { %9112 = vmatprep.subr.bf16.mxu1 %v9844_v25  ;;  %v12356_v42 = vpop.f32.mrf.mxu0 }
 0x27d   : > { %9129 = vmatpush3.bf16.msra.mxu0 %v9843_v48  ;;  %v12358_v22 = vpop.f32.mrf.mxu1 }
 0x27e   : > { %9130 = vmatprep.subr.bf16.mxu0 %v9846_v5  ;;  %v12360_v6 = vpop.f32.mrf.mxu0 }
 0x27f   : > { %9113 = vmatpush3.bf16.msra.mxu1 %v9845_v33  ;;  %v12362_v44 = vpop.f32.mrf.mxu1 }
 0x280   : > { %v12364_v54 = vpop.f32.mrf.mxu0 }
 0x281   : > { %9131 = vmatpush3.bf16.msra.mxu0 %v9847_v18  ;;  %v12366_v45 = vpop.f32.mrf.mxu1 }
 0x282   : > { %7719 = vmatmul.mubr.bf16.vlgmr.msra.gmra.mxu1 %v7915_v8  ;;  %9132 = vmatprep.subr.bf16.mxu0 %v9848_v23  ;;  %v12368_v11 = vpop.f32.mrf.mxu0 }
 0x283   : > { %v12370_v63 = vpop.f32.mrf.mxu1 }
 0x284   : > { %12604 = vst [vmem:[#allocation3_spill] sm:$0xff] %v12370_v63  ;;  %v12372_v25 = vpop.f32.mrf.mxu0 }
 0x285   : > { %9133 = vmatpush3.bf16.msra.mxu0 %v9849_v60  ;;  %v12374_v48 = vpop.f32.mrf.mxu1 }
 0x286   : > { %9134 = vmatprep.subr.bf16.mxu0 %v9850_v39  ;;  %12605 = vst [vmem:[#allocation4_spill] sm:$0xff] %v12374_v48  ;;  %v12376_v5 = vpop.f32.mrf.mxu0 }
 0x287   : > { %12606 = vst [vmem:[#allocation5_spill] sm:$0xff] %v12376_v5  ;;  %v12378_v33 = vpop.f32.mrf.mxu1 }
 0x288   : > { %12607 = vst [vmem:[#allocation6_spill] sm:$0xff] %v12378_v33  ;;  %v12380_v18 = vpop.f32.mrf.mxu0 }
 0x289   : > { %9135 = vmatpush3.bf16.msra.mxu0 %v9851_v27  ;;  %12608 = vst [vmem:[#allocation7_spill] sm:$0xff] %v12380_v18  ;;  %v12382_v23 = vpop.f32.mrf.mxu1 }
 0x28a   : > { %12609 = vst [vmem:[#allocation8_spill] sm:$0xff] %v12382_v23  ;;  %v12384_v8 = vpop.f32.mrf.mxu0 }
 0x28b   : > { %12610 = vst [vmem:[#allocation9_spill] sm:$0xff] %v12384_v8  ;;  %v12386_v60 = vpop.f32.mrf.mxu1 }
 0x28c   : > { %7760 = vmatmul.mubr.bf16.vlgmr.msra.gmra.mxu0 %v7917_v2  ;;  %12611 = vst [vmem:[#allocation10_spill] sm:$0xff] %v12386_v60  ;;  %v12388_v39 = vpop.f32.mrf.mxu0 }
 0x28d   : > { %12612 = vst [vmem:[#allocation11_spill] sm:$0xff] %v12388_v39  ;;  %v12390_v27 = vpop.f32.mrf.mxu1 }
 0x28e   : > { %12613 = vst [vmem:[#allocation12_spill] sm:$0xff] %v12390_v27  ;;  %v12392_v2 = vpop.f32.mrf.mxu0 }
 0x28f   : > { %12614 = vst [vmem:[#allocation13_spill] sm:$0xff] %v12392_v2  ;;  %v12394_v63 = vpop.f32.mrf.mxu1 }
 0x290   : > { %12615 = vst [vmem:[#allocation14_spill] sm:$0xff] %v12394_v63  ;;  %v12396_v48 = vpop.f32.mrf.mxu0 }
 0x291   : > { %12616 = vst [vmem:[#allocation15_spill] sm:$0xff] %v12396_v48  ;;  %v12398_v5 = vpop.f32.mrf.mxu1 }
 0x292   : > { %12617 = vst [vmem:[#allocation16_spill] sm:$0xff] %v12398_v5  ;;  %v12400_v33 = vpop.f32.mrf.mxu0 }
 0x293   : > { %12618 = vst [vmem:[#allocation17_spill] sm:$0xff] %v12400_v33  ;;  %v12402_v18 = vpop.f32.mrf.mxu1 }
 0x294   : > { %12619 = vst [vmem:[#allocation18_spill] sm:$0xff] %v12402_v18  ;;  %v12404_v23 = vpop.f32.mrf.mxu0 }
 0x295   : > { %12620 = vst [vmem:[#allocation19_spill] sm:$0xff] %v12404_v23  ;;  %v12406_v8 = vpop.f32.mrf.mxu1 }
 0x296   : > { %12621 = vst [vmem:[#allocation20_spill] sm:$0xff] %v12406_v8  ;;  %v12408_v60 = vpop.f32.mrf.mxu0 }
 0x297   : > { %12622 = vst [vmem:[#allocation21_spill] sm:$0xff] %v12408_v60  ;;  %v12410_v39 = vpop.f32.mrf.mxu1 }
 0x298   : > { %12623 = vst [vmem:[#allocation22_spill] sm:$0xff] %v12410_v39  ;;  %v12412_v27 = vpop.f32.mrf.mxu0 }
 0x299   : > { %12624 = vst [vmem:[#allocation23_spill] sm:$0xff] %v12412_v27  ;;  %v12414_v2 = vpop.f32.mrf.mxu1 }
 0x29a   : > { %12625 = vst [vmem:[#allocation24_spill] sm:$0xff] %v12414_v2  ;;  %v12416_v63 = vpop.f32.mrf.mxu0 }
 0x29b   : > { %12626 = vst [vmem:[#allocation25_spill] sm:$0xff] %v12416_v63  ;;  %v12418_v48 = vpop.f32.mrf.mxu1 }
 0x29c   : > { %12627 = vst [vmem:[#allocation26_spill] sm:$0xff] %v12418_v48  ;;  %v12420_v5 = vpop.f32.mrf.mxu0 }
 0x29d   : > { %12628 = vst [vmem:[#allocation27_spill] sm:$0xff] %v12420_v5  ;;  %v12422_v33 = vpop.f32.mrf.mxu1 }
 0x29e   : > { %12629 = vst [vmem:[#allocation28_spill] sm:$0xff] %v12422_v33  ;;  %v12424_v18 = vpop.f32.mrf.mxu0 }
 0x29f   : > { %12630 = vst [vmem:[#allocation29_spill] sm:$0xff] %v12424_v18 }
 0x2a0   : > { %v12428_v8 = vpop.f32.mrf.mxu0 }
 0x2a1   : > { %12631 = vst [vmem:[#allocation30_spill] sm:$0xff] %v12428_v8  ;;  %v8456_v8 = vadd.f32 %v12229_v24, %v12215_v37  ;;  %v8481_v37 = vadd.f32 %v12286_v34, %v12276_v58  ;;  %v8522_v24 = vadd.f32 %v12296_v17, %v12290_v62  ;;  %v8525_v34 = vadd.f32 %v12304_v19, %v12300_v3 }
 0x2a2   : > { %v12426_v23 = vpop.f32.mrf.mxu1  ;;  %v12432_v39 = vpop.f32.mrf.mxu0  ;;  %v8566_v62 = vadd.f32 %v12312_v38, %v12308_v43  ;;  %v8569_v3 = vadd.f32 %v12320_v46, %v12316_v1  ;;  %v8610_v19 = vadd.f32 %v12328_v40, %v12324_v26  ;;  %v8613_v1 = vadd.f32 %v12336_v30, %v12332_v28 }
 0x2a3   : > { %12633 = vst [vmem:[#allocation32_spill] sm:$0xff] %v12432_v39  ;;  %v8478_v39 = vadd.f32 %v12264_v59, %v12251_v4  ;;  %v8654_v46 = vadd.f32 %v12344_v0, %v12340_v31  ;;  %v8657_v28 = vadd.f32 %v12352_v9, %v12348_v16  ;;  %v8698_v30 = vadd.f32 %v12360_v6, %v12356_v42  ;;  %v12640_v9 = vld [vmem:[#allocation5_spill] sm:$0xff] }
 0x2a4   : > { %v12430_v60 = vpop.f32.mrf.mxu1  ;;  %v8701_v16 = vadd.f32 %v12368_v11, %v12364_v54  ;;  %v8742_v42 = vadd.f32 %v12640_v9, %v12372_v25  ;;  %v12647_v11 = vld [vmem:[#allocation11_spill] sm:$0xff] }
 0x2a5   : > { %12632 = vst [vmem:[#allocation31_spill] sm:$0xff] %v12430_v60 }
 0x2a6   : > { %v12434_v27 = vpop.f32.mrf.mxu1 }
 0x2a7   : > { %12634 = vst [vmem:[#allocation33_spill] sm:$0xff] %v12434_v27 }
 0x2a8   : > { %v12438_v63 = vpop.f32.mrf.mxu1 }
 0x2a9   : > { %12635 = vst [vmem:[#allocation34_spill] sm:$0xff] %v12438_v63  ;;  %v6491_v63 = vadd.f32 %v8456_v8, %v10504_v61 }
 0x2ac   : > { %v12436_v2 = vpop.f32.mrf.mxu0 }
 0x2ae   : > { %v12440_v48 = vpop.f32.mrf.mxu0 }
 0x2af   : > { %12636 = vst [vmem:[#allocation35_spill] sm:$0xff] %v12440_v48  ;;  %v8459_v48 = vadd.f32 %v12259_v49, %v12243_v10  ;;  %v8503_v10 = vadd.f32 %v12292_v29, %v12288_v50  ;;  %v8544_v49 = vadd.f32 %v12302_v15, %v12298_v52  ;;  %v8547_v50 = vadd.f32 %v12310_v36, %v12306_v20 }
 0x2b0   : > { %v12444_v33 = vpop.f32.mrf.mxu0  ;;  %v8588_v29 = vadd.f32 %v12318_v56, %v12314_v53  ;;  %v8591_v20 = vadd.f32 %v12326_v51, %v12322_v41  ;;  %v8632_v36 = vadd.f32 %v12334_v47, %v12330_v55  ;;  %v8635_v41 = vadd.f32 %v12342_v32, %v12338_v13 }
 0x2b1   : > { %12638 = vst [vmem:[#allocation37_spill] sm:$0xff] %v12444_v33  ;;  %v8500_v33 = vadd.f32 %v12278_v35, %v12266_v57  ;;  %v6494_v59 = vadd.f32 %v8459_v48, %v10530_v21  ;;  %v8676_v51 = vadd.f32 %v12350_v12, %v12346_v7  ;;  %v8679_v13 = vadd.f32 %v12358_v22, %v12354_v14  ;;  %v12643_v22 = vld [vmem:[#allocation6_spill] sm:$0xff] }
 0x2b2   : > { %v12452_v60 = vpop.f32.mrf.mxu0  ;;  %v8720_v32 = vadd.f32 %v12366_v45, %v12362_v44 }
 0x2c2   : > { %v12442_v5 = vpop.f32.mrf.mxu1 }
 0x2c3   : > { %12637 = vst [vmem:[#allocation36_spill] sm:$0xff] %v12442_v5 }
 0x2c4   : > { %v12446_v18 = vpop.f32.mrf.mxu1 }
 0x2c5   : > { %12639 = vst [vmem:[#allocation38_spill] sm:$0xff] %v12446_v18  ;;  %v6532_v18 = vadd.f32 %v8478_v39, %v6491_v63  ;;  %v6535_v63 = vadd.f32 %v8481_v37, %v6494_v59 }
 0x2c6   : > { %v12454_v27 = vpop.f32.mrf.mxu1 }
 0x2c7   : > { %v6573_v61 = vadd.f32 %v8500_v33, %v6532_v18  ;;  %v6576_v21 = vadd.f32 %v8503_v10, %v6535_v63  ;;  %v12641_v63 = vld [vmem:[#allocation3_spill] sm:$0xff] }
 0x2c8   : > { %v12467_v4 = vpop.f32.mrf.mxu1 }
 0x2c9   : > { %v6614_v58 = vadd.f32 %v8522_v24, %v6573_v61  ;;  %v6617_v48 = vadd.f32 %v8525_v34, %v6576_v21  ;;  %v12644_v34 = vld [vmem:[#allocation8_spill] sm:$0xff]  ;;  %v12645_v21 = vld [vmem:[#allocation7_spill] sm:$0xff] }
 0x2ca   : > { %v8764_v44 = vadd.f32 %v12644_v34, %v12643_v22  ;;  %v12663_v22 = vld [vmem:[#allocation27_spill] sm:$0xff]  ;;  %v12664_v34 = vld [vmem:[#allocation29_spill] sm:$0xff] }
 0x2cb   : > { %v6655_v17 = vadd.f32 %v8544_v49, %v6614_v58  ;;  %v6658_v43 = vadd.f32 %v8547_v50, %v6617_v48  ;;  %v12642_v58 = vld [vmem:[#allocation4_spill] sm:$0xff]  ;;  %v12648_v50 = vld [vmem:[#allocation13_spill] sm:$0xff] }
 0x2cc   : > { %v12461_v5 = vpop.f32.mrf.mxu0  ;;  %v8723_v14 = vadd.f32 %v12642_v58, %v12641_v63  ;;  %v8786_v25 = vadd.f32 %v12648_v50, %v12647_v11  ;;  %v12661_v63 = vld [vmem:[#allocation23_spill] sm:$0xff]  ;;  %v12662_v58 = vld [vmem:[#allocation25_spill] sm:$0xff] }
 0x2cd   : > { %v6696_v33 = vadd.f32 %v8566_v62, %v6655_v17  ;;  %v6699_v18 = vadd.f32 %v8569_v3, %v6658_v43  ;;  %v12646_v17 = vld [vmem:[#allocation9_spill] sm:$0xff]  ;;  %v12650_v43 = vld [vmem:[#allocation12_spill] sm:$0xff]  ;;  %v12667_v11 = vld [vmem:[#allocation31_spill] sm:$0xff] }
 0x2ce   : > { %v12474_v57 = vpop.f32.mrf.mxu0  ;;  %v8745_v54 = vadd.f32 %v12646_v17, %v12645_v21  ;;  %v12665_v21 = vld [vmem:[#allocation26_spill] sm:$0xff]  ;;  %v12666_v17 = vld [vmem:[#allocation28_spill] sm:$0xff]  ;;  %v8896_v50 = vadd.f32 %v12667_v11, %v12426_v23 }
 0x2cf   : > { %v6737_v38 = vadd.f32 %v8588_v29, %v6696_v33  ;;  %v6740_v40 = vadd.f32 %v8591_v20, %v6699_v18  ;;  %v12651_v20 = vld [vmem:[#allocation14_spill] sm:$0xff] }
 0x2d0   : > { %v12486_v52 = vpop.f32.mrf.mxu0 }
 0x2d1   : > { %v6778_v8 = vadd.f32 %v8610_v19, %v6737_v38  ;;  %v6781_v47 = vadd.f32 %v8613_v1, %v6740_v40  ;;  %v12649_v19 = vld [vmem:[#allocation10_spill] sm:$0xff]  ;;  %v12653_v40 = vld [vmem:[#allocation15_spill] sm:$0xff] }
 0x2d2   : > { %v12498_v53 = vpop.f32.mrf.mxu0  ;;  %v8767_v38 = vadd.f32 %v12650_v43, %v12649_v19  ;;  %v12668_v43 = vld [vmem:[#allocation30_spill] sm:$0xff] }
 0x2d3   : > { %v6819_v39 = vadd.f32 %v8632_v36, %v6778_v8  ;;  %v6822_v24 = vadd.f32 %v8635_v41, %v6781_v47  ;;  %v12652_v36 = vld [vmem:[#allocation16_spill] sm:$0xff]  ;;  %v12656_v47 = vld [vmem:[#allocation21_spill] sm:$0xff] }
 0x2d4   : > { %v8808_v18 = vadd.f32 %v12652_v36, %v12651_v20  ;;  %v12670_v36 = vld [vmem:[#allocation35_spill] sm:$0xff] }
 0x2d5   : > { %v6860_v37 = vadd.f32 %v8654_v46, %v6819_v39  ;;  %v6863_v7 = vadd.f32 %v8657_v28, %v6822_v24  ;;  %v12654_v39 = vld [vmem:[#allocation17_spill] sm:$0xff] }
 0x2d6   : > { %v8789_v41 = vadd.f32 %v12654_v39, %v12653_v40  ;;  %v12671_v40 = vld [vmem:[#allocation33_spill] sm:$0xff]  ;;  %v12672_v39 = vld [vmem:[#allocation34_spill] sm:$0xff] }
 0x2d7   : > { %v6901_v59 = vadd.f32 %v8676_v51, %v6860_v37  ;;  %v6904_v10 = vadd.f32 %v8679_v13, %v6863_v7  ;;  %v12655_v51 = vld [vmem:[#allocation19_spill] sm:$0xff]  ;;  %v12658_v13 = vld [vmem:[#allocation20_spill] sm:$0xff]  ;;  %v12659_v7 = vld [vmem:[#allocation22_spill] sm:$0xff] }
 0x2d8   : > { %v8830_v37 = vadd.f32 %v12656_v47, %v12655_v51  ;;  %v12673_v51 = vld [vmem:[#allocation36_spill] sm:$0xff]  ;;  %v12674_v47 = vld [vmem:[#allocation38_spill] sm:$0xff] }
 0x2d9   : > { %v6942_v12 = vadd.f32 %v8698_v30, %v6901_v59  ;;  %v6945_v45 = vadd.f32 %v8701_v16, %v6904_v10  ;;  %v12657_v59 = vld [vmem:[#allocation18_spill] sm:$0xff] }
 0x2db   : > { %v6983_v49 = vadd.f32 %v8720_v32, %v6942_v12  ;;  %v6986_v33 = vadd.f32 %v8723_v14, %v6945_v45  ;;  %v8811_v32 = vadd.f32 %v12658_v13, %v12657_v59  ;;  %v12660_v12 = vld [vmem:[#allocation24_spill] sm:$0xff]  ;;  %v8833_v14 = vadd.f32 %v12662_v58, %v12661_v63  ;;  %v12675_v13 = vld [vmem:[#allocation37_spill] sm:$0xff] }
 0x2dc   : > { %v8852_v16 = vadd.f32 %v12660_v12, %v12659_v7  ;;  %v8962_v7 = vadd.f32 %v12474_v57, %v12461_v5 }
 0x2dd   : > { %v7024_v62 = vadd.f32 %v8742_v42, %v6983_v49  ;;  %v7027_v1 = vadd.f32 %v8745_v54, %v6986_v33  ;;  %v8855_v54 = vadd.f32 %v12666_v17, %v12665_v21 }
 0x2df   : > { %v7065_v3 = vadd.f32 %v8764_v44, %v7024_v62  ;;  %v7068_v30 = vadd.f32 %v8767_v38, %v7027_v1  ;;  %v8874_v44 = vadd.f32 %v12664_v34, %v12663_v22  ;;  %v12669_v38 = vld [vmem:[#allocation32_spill] sm:$0xff]  ;;  %v8965_v22 = vadd.f32 %v12498_v53, %v12486_v52 }
 0x2e0   : > { %v8877_v20 = vadd.f32 %v12669_v38, %v12668_v43 }
 0x2e1   : > { %v7106_v46 = vadd.f32 %v8786_v25, %v7065_v3  ;;  %v7109_v10 = vadd.f32 %v8789_v41, %v7068_v30  ;;  %v8899_v41 = vadd.f32 %v12672_v39, %v12671_v40 }
 0x2e2   : > { %v12476_v35 = vpop.f32.mrf.mxu1 }
 0x2e3   : > { %v7147_v24 = vadd.f32 %v8808_v18, %v7106_v46  ;;  %v7150_v45 = vadd.f32 %v8811_v32, %v7109_v10  ;;  %v8918_v18 = vadd.f32 %v12670_v36, %v12436_v2  ;;  %v8921_v32 = vadd.f32 %v12452_v60, %v12675_v13 }
 0x2e4   : > { %v12488_v15 = vpop.f32.mrf.mxu1  ;;  %v8943_v10 = vadd.f32 %v12467_v4, %v12454_v27 }
 0x2e5   : > { %v7188_v49 = vadd.f32 %v8830_v37, %v7147_v24  ;;  %v7191_v3 = vadd.f32 %v8833_v14, %v7150_v45  ;;  %v8940_v37 = vadd.f32 %v12674_v47, %v12673_v51 }
 0x2e6   : > { %v12500_v56 = vpop.f32.mrf.mxu1 }
 0x2e7   : > { %v7229_v62 = vadd.f32 %v8852_v16, %v7188_v49  ;;  %v7232_v1 = vadd.f32 %v8855_v54, %v7191_v3  ;;  %v8984_v49 = vadd.f32 %v12488_v15, %v12476_v35 }
 0x2e8   : > { %v12512_v55 = vpop.f32.mrf.mxu1 }
 0x2e9   : > { %v7270_v19 = vadd.f32 %v8874_v44, %v7229_v62  ;;  %v7273_v24 = vadd.f32 %v8877_v20, %v7232_v1  ;;  %v8987_v45 = vadd.f32 %v12512_v55, %v12500_v56 }
 0x2eb   : > { %v7311_v46 = vadd.f32 %v8896_v50, %v7270_v19  ;;  %v7314_v2 = vadd.f32 %v8899_v41, %v7273_v24 }
 0x2ec   : > { %v12506_v26 = vpop.f32.mrf.mxu0 }
 0x2ed   : > { %v7352_v59 = vadd.f32 %v8918_v18, %v7311_v46  ;;  %v7355_v58 = vadd.f32 %v8921_v32, %v7314_v2 }
 0x2ee   : > { %v12518_v31 = vpop.f32.mrf.mxu0 }
 0x2ef   : > { %v7393_v16 = vadd.f32 %v8940_v37, %v7352_v59  ;;  %v9006_v60 = vadd.f32 %v12518_v31, %v12506_v26  ;;  %v7396_v57 = vadd.f32 %v8943_v10, %v7355_v58 }
 0x2f0   : > { %v12530_v6 = vpop.f32.mrf.mxu0 }
 0x2f1   : > { %v7434_v14 = vadd.f32 %v8962_v7, %v7393_v16  ;;  %v7437_v35 = vadd.f32 %v8965_v22, %v7396_v57 }
 0x2f2   : > { %v9008_v29 = vpop.f32.mrf.mxu0 }
 0x2f3   : > { %v7475_v44 = vadd.f32 %v8984_v49, %v7434_v14  ;;  %v9009_v62 = vadd.f32 %v9008_v29, %v12530_v6  ;;  %v7478_v53 = vadd.f32 %v8987_v45, %v7437_v35 }
 0x2f5   : > { %v7516_v15 = vadd.f32 %v9006_v60, %v7475_v44  ;;  %v7519_v11 = vadd.f32 %v9009_v62, %v7478_v53 }
 0x302   : > { %v12520_v0 = vpop.f32.mrf.mxu1 }
 0x304   : > { %v12532_v61 = vpop.f32.mrf.mxu1 }
 0x305   : > { %v9028_v27 = vadd.f32 %v12532_v61, %v12520_v0 }
 0x306   : > { %v12542_v48 = vpop.f32.mrf.mxu1 }
 0x307   : > { %v7557_v17 = vadd.f32 %v9028_v27, %v7516_v15 }
 0x308   : > { %v9030_v28 = vpop.f32.mrf.mxu1 }
 0x309   : > { %v9031_v26 = vadd.f32 %v9030_v28, %v12542_v48 }
 0x30b   : > { %v7560_v0 = vadd.f32 %v9031_v26, %v7519_v11 }
 0x30c   : > { %v9048_v8 = vpop.f32.mrf.mxu0 }
 0x30e   : > { %v9049_v9 = vpop.f32.mrf.mxu0 }
 0x30f   : > { %v9050_v21 = vadd.f32 %v9049_v9, %v9048_v8 }
 0x310   : > { %v9051_v25 = vpop.f32.mrf.mxu0 }
 0x311   : > { %v7598_v50 = vadd.f32 %v9050_v21, %v7557_v17 }
 0x312   : > { %v9052_v30 = vpop.f32.mrf.mxu0 }
 0x313   : > { %v9053_v56 = vadd.f32 %v9052_v30, %v9051_v25 }
 0x315   : > { %v7601_v29 = vadd.f32 %v9053_v56, %v7560_v0 }
 0x322   : > { %v9070_v42 = vpop.f32.mrf.mxu1 }
 0x324   : > { %v9071_v33 = vpop.f32.mrf.mxu1 }
 0x325   : > { %v9072_v31 = vadd.f32 %v9071_v33, %v9070_v42 }
 0x326   : > { %v9073_v23 = vpop.f32.mrf.mxu1 }
 0x327   : > { %v7639_v61 = vadd.f32 %v9072_v31, %v7598_v50 }
 0x328   : > { %v9074_v63 = vpop.f32.mrf.mxu1 }
 0x329   : > { %v9075_v19 = vadd.f32 %v9074_v63, %v9073_v23 }
 0x32b   : > { %v7642_v48 = vadd.f32 %v9075_v19, %v7601_v29 }
 0x32c   : > { %v9092_v12 = vpop.f32.mrf.mxu0 }
 0x32e   : > { %v9093_v34 = vpop.f32.mrf.mxu0 }
 0x32f   : > { %v9094_v55 = vadd.f32 %v9093_v34, %v9092_v12 }
 0x330   : > { %v9095_v52 = vpop.f32.mrf.mxu0 }
 0x331   : > { %v7680_v8 = vadd.f32 %v9094_v55, %v7639_v61 }
 0x332   : > { %v9096_v3 = vpop.f32.mrf.mxu0 }
 0x333   : > { %v9097_v9 = vadd.f32 %v9096_v3, %v9095_v52 }
 0x335   : > { %v7683_v36 = vadd.f32 %v9097_v9, %v7642_v48 }
 0x342   : > { %v9114_v5 = vpop.f32.mrf.mxu1 }
 0x344   : > { %v9115_v4 = vpop.f32.mrf.mxu1 }
 0x345   : > { %v9116_v43 = vadd.f32 %v9115_v4, %v9114_v5 }
 0x346   : > { %v9117_v54 = vpop.f32.mrf.mxu1 }
 0x347   : > { %v7721_v28 = vadd.f32 %v9116_v43, %v7680_v8 }
 0x348   : > { %v9118_v38 = vpop.f32.mrf.mxu1 }
 0x349   : > { %v9119_v42 = vadd.f32 %v9118_v38, %v9117_v54 }
 0x34b   : > { %v7724_v46 = vadd.f32 %v9119_v42, %v7683_v36 }
 0x34c   : > { %v9136_v6 = vpop.f32.mrf.mxu0 }
 0x34e   : > { %v9137_v20 = vpop.f32.mrf.mxu0 }
 0x34f   : > { %v9138_v33 = vadd.f32 %v9137_v20, %v9136_v6 }
 0x350   : > { %v9139_v25 = vpop.f32.mrf.mxu0 }
 0x351   : > { %v7762_v18 = vadd.f32 %v9138_v33, %v7721_v28 }
 0x352   : > { %v9140_v1 = vpop.f32.mrf.mxu0 }
 0x353   : > { %7768 = vst.msk [vmem:[%s221_s12] sm:$0xff] %vm3019_vm1, %v7762_v18  ;;  %v9141_v40 = vadd.f32 %v9140_v1, %v9139_v25 }
 0x355   : > { %v7765_v39 = vadd.f32 %v9141_v40, %v7724_v46 }
 0x357   : > { %7769 = vst.msk [vmem:[%s221_s12 + $0x8] sm:$0xff] %vm3019_vm1, %v7765_v39 }
 0x358 PF: > { %s14_s15 = sadd.s32 1, %s9874_s15  }
 0x359   : > { %p11_p4 = scmp.ge.s32.totalorder %s14_s15, 4  }
 0x35b   :  { %13 = sbr.rel (!%p11_p4) target bundleno = 1 (0x1), region = 69 }

</bundles_post_ra>
